<compile_context>
chip_gen: v7x
topology: tpu7x:2x2x1
jax: 0.10.0
libtpu: 0.0.40
codegen_flags: <defaults>
</compile_context>

<pallas_src>
import jax
import jax.numpy as jnp
import numpy as np
from jax.experimental import pallas as pl
from jax.experimental.pallas import tpu as pltpu

PAD = 3
KW = 7


def conv_bn_kernel(x_ref, w_ref, scale_ref, bias_ref, o_ref):
    # x_ref    : [M_in,  Cin ] bf16  flat padded activation slab
    #            (row p = r*(W+2*PAD) + u, i.e. per-image-row stride W+6, plus a
    #             few zero tail rows so every tap slice stays in bounds)
    # w_ref    : [KW, Cin, Cout] bf16  raw conv weights (BN scale NOT folded)
    # scale_ref: [1, Cout] f32   gamma / sqrt(var + eps)
    # bias_ref : [1, Cout] f32   beta - mean * scale
    # o_ref    : [M_out, Cout] f32   (M_out = N*H*(W+2*PAD); valid rows extracted
    #                                 by the wrapper)
    kw_taps = w_ref.shape[0]
    m_out = o_ref.shape[0]

    x = x_ref[...]                                   # one aligned full load
    acc = jnp.zeros(o_ref.shape, jnp.float32)
    for kw in range(kw_taps):                        # static unroll (7 taps)
        # Full-slab MXU matmul for this tap, then a static f32 row-offset slice:
        # out[p] += X[p + kw] @ W_kw   <=>   slice rows [kw : kw + m_out).
        p = jnp.dot(x, w_ref[kw], preferred_element_type=jnp.float32)
        acc = acc + p[kw:kw + m_out, :]

    # Eval-mode BatchNorm epilogue in f32.
    o_ref[...] = acc * scale_ref[...] + bias_ref[...]


def prepare_params(weight, gamma, beta, running_mean, running_var, eps=1e-3):
    """One-time (init) prep: weight layout + BN fold. Reused across forwards."""
    # [Cout, Cin, 1, KW] -> [KW, Cin, Cout]; keep raw magnitude, cast to bf16.
    w_k = jnp.transpose(weight[:, :, 0, :], (2, 1, 0)).astype(jnp.bfloat16)
    inv_std = jax.lax.rsqrt(running_var + eps)
    scale = (gamma * inv_std).astype(jnp.float32).reshape(1, -1)
    bias = (beta - running_mean * gamma * inv_std).astype(jnp.float32).reshape(1, -1)
    return w_k, scale, bias


def conv_bn_forward(x_nchw, w_k, scale, bias):
    """Module-equivalent forward: NCHW in -> NCHW out (eval-mode BN)."""
    N, Cin, H, W = x_nchw.shape
    Cout = w_k.shape[-1]
    rows = N * H                       # 12
    Wp = W + 2 * PAD                   # per-row flat stride = 18
    m_out = rows * Wp                  # 216 (multiple of 8)
    m_in = ((m_out + KW - 1 + 7) // 8) * 8   # 224: tap slices in bounds, 8-aligned

    # NCHW -> NHWC rows, zero-pad width by PAD on each side, flatten to 2D slab.
    x_rows = jnp.transpose(x_nchw, (0, 2, 3, 1)).reshape(rows, W, Cin)
    x_pad = jnp.pad(x_rows, ((0, 0), (PAD, PAD), (0, 0)))            # [rows, Wp, Cin]
    x_flat = jnp.pad(x_pad.reshape(m_out, Cin), ((0, m_in - m_out), (0, 0)))
    x_flat = x_flat.astype(jnp.bfloat16)                             # [224, 192]

    out_rows = pl.pallas_call(
        conv_bn_kernel,
        out_shape=jax.ShapeDtypeStruct((m_out, Cout), jnp.float32),
        in_specs=[
            pl.BlockSpec(memory_space=pltpu.MemorySpace.VMEM),
            pl.BlockSpec(memory_space=pltpu.MemorySpace.VMEM),
            pl.BlockSpec(memory_space=pltpu.MemorySpace.VMEM),
            pl.BlockSpec(memory_space=pltpu.MemorySpace.VMEM),
        ],
        out_specs=pl.BlockSpec(memory_space=pltpu.MemorySpace.VMEM),
    )(x_flat, w_k, scale, bias)

    # Valid outputs live at flat rows p = r*Wp + w with w < W; rest is discarded.
    out_nhwc = out_rows.reshape(rows, Wp, Cout)[:, :W, :].reshape(N, H, W, Cout)
    return jnp.transpose(out_nhwc, (0, 3, 1, 2)).astype(x_nchw.dtype)


def _reference(x_nchw, weight, gamma, beta, mean, var, eps=1e-3):
    """Pure-JAX f32 reference (conv + eval BatchNorm) for correctness check."""
    y = jax.lax.conv_general_dilated(
        x_nchw, weight, window_strides=(1, 1), padding=((0, 0), (PAD, PAD)),
        dimension_numbers=("NCHW", "OIHW", "NCHW"))
    s = (gamma / jnp.sqrt(var + eps)).reshape(1, -1, 1, 1)
    b = (beta - mean * gamma / jnp.sqrt(var + eps)).reshape(1, -1, 1, 1)
    return y * s + b


if __name__ == "__main__":
    key = jax.random.PRNGKey(0)
    k_x, k_w, k_g, k_b, k_m, k_v = jax.random.split(key, 6)

    N, Cin, H, W = 1, 192, 12, 12
    Cout = 192

    x = jax.random.normal(k_x, (N, Cin, H, W), dtype=jnp.float32)
    weight = jax.random.normal(k_w, (Cout, Cin, 1, KW), dtype=jnp.float32) * 0.05
    gamma = 1.0 + 0.1 * jax.random.normal(k_g, (Cout,), dtype=jnp.float32)
    beta = 0.1 * jax.random.normal(k_b, (Cout,), dtype=jnp.float32)
    running_mean = 0.1 * jax.random.normal(k_m, (Cout,), dtype=jnp.float32)
    running_var = 1.0 + 0.1 * jax.random.uniform(k_v, (Cout,), dtype=jnp.float32)

    # Init-time prep (hoisted out of the per-call path).
    w_k, scale, bias = prepare_params(weight, gamma, beta, running_mean,
                                      running_var, eps=1e-3)
    w_k, scale, bias = jax.block_until_ready((w_k, scale, bias))

    fwd = jax.jit(conv_bn_forward)
    out = jax.block_until_ready(fwd(x, w_k, scale, bias))

    ref = jax.block_until_ready(
        _reference(x, weight, gamma, beta, running_mean, running_var, eps=1e-3))

    assert out.shape == (N, Cout, H, W), out.shape
    # bf16 operands with f32 accumulation over a 7*192=1344-term contraction.
    np.testing.assert_allclose(np.asarray(out), np.asarray(ref),
                               rtol=2e-2, atol=2e-2)
    print("KERNEL_OK")
</pallas_src>

<mosaic_0001>
module attributes {stable_mosaic.version = 11 : i64} {
  func.func @conv_bn_kernel(%arg0: memref<224x192xbf16, #tpu.memory_space<vmem>>, %arg1: memref<7x192x192xbf16, #tpu.memory_space<vmem>>, %arg2: memref<1x192xf32, #tpu.memory_space<vmem>>, %arg3: memref<1x192xf32, #tpu.memory_space<vmem>>, %arg4: memref<216x192xf32, #tpu.memory_space<vmem>>) attributes {dimension_semantics = [], scalar_prefetch = 0 : i64, scratch_operands = 0 : i64, tpu.core_type = #tpu.core_type<tc>} {
    %c0 = arith.constant 0 : index
    %c0_0 = arith.constant 0 : index
    %0 = vector.load %arg0[%c0, %c0_0] : memref<224x192xbf16, #tpu.memory_space<vmem>>, vector<224x192xbf16>
    %cst = arith.constant 0.000000e+00 : f32
    %1 = vector.broadcast %cst : f32 to vector<216x192xf32>
    %c0_1 = arith.constant 0 : index
    %c0_2 = arith.constant 0 : index
    %c0_3 = arith.constant 0 : index
    %2 = vector.load %arg1[%c0_1, %c0_2, %c0_3] : memref<7x192x192xbf16, #tpu.memory_space<vmem>>, vector<1x192x192xbf16>
    %3 = vector.shape_cast %2 : vector<1x192x192xbf16> to vector<192x192xbf16>
    %cst_4 = arith.constant dense<0.000000e+00> : vector<224x192xf32>
    %4 = tpu.matmul %0, %3, %cst_4 {dimension_numbers = #tpu.dot_dimension_numbers<[1], [0], [0], [1], [0, 0, 1, 1], [], []>} : vector<224x192xbf16>, vector<192x192xbf16>, vector<224x192xf32> -> vector<224x192xf32>
    %5 = vector.extract_strided_slice %4 {offsets = [0, 0], sizes = [216, 192], strides = [1, 1]} : vector<224x192xf32> to vector<216x192xf32>
    %6 = arith.addf %1, %5 : vector<216x192xf32>
    %c1 = arith.constant 1 : index
    %c0_5 = arith.constant 0 : index
    %c0_6 = arith.constant 0 : index
    %7 = vector.load %arg1[%c1, %c0_5, %c0_6] : memref<7x192x192xbf16, #tpu.memory_space<vmem>>, vector<1x192x192xbf16>
    %8 = vector.shape_cast %7 : vector<1x192x192xbf16> to vector<192x192xbf16>
    %cst_7 = arith.constant dense<0.000000e+00> : vector<224x192xf32>
    %9 = tpu.matmul %0, %8, %cst_7 {dimension_numbers = #tpu.dot_dimension_numbers<[1], [0], [0], [1], [0, 0, 1, 1], [], []>} : vector<224x192xbf16>, vector<192x192xbf16>, vector<224x192xf32> -> vector<224x192xf32>
    %10 = vector.extract_strided_slice %9 {offsets = [1, 0], sizes = [216, 192], strides = [1, 1]} : vector<224x192xf32> to vector<216x192xf32>
    %11 = arith.addf %6, %10 : vector<216x192xf32>
    %c2 = arith.constant 2 : index
    %c0_8 = arith.constant 0 : index
    %c0_9 = arith.constant 0 : index
    %12 = vector.load %arg1[%c2, %c0_8, %c0_9] : memref<7x192x192xbf16, #tpu.memory_space<vmem>>, vector<1x192x192xbf16>
    %13 = vector.shape_cast %12 : vector<1x192x192xbf16> to vector<192x192xbf16>
    %cst_10 = arith.constant dense<0.000000e+00> : vector<224x192xf32>
    %14 = tpu.matmul %0, %13, %cst_10 {dimension_numbers = #tpu.dot_dimension_numbers<[1], [0], [0], [1], [0, 0, 1, 1], [], []>} : vector<224x192xbf16>, vector<192x192xbf16>, vector<224x192xf32> -> vector<224x192xf32>
    %15 = vector.extract_strided_slice %14 {offsets = [2, 0], sizes = [216, 192], strides = [1, 1]} : vector<224x192xf32> to vector<216x192xf32>
    %16 = arith.addf %11, %15 : vector<216x192xf32>
    %c3 = arith.constant 3 : index
    %c0_11 = arith.constant 0 : index
    %c0_12 = arith.constant 0 : index
    %17 = vector.load %arg1[%c3, %c0_11, %c0_12] : memref<7x192x192xbf16, #tpu.memory_space<vmem>>, vector<1x192x192xbf16>
    %18 = vector.shape_cast %17 : vector<1x192x192xbf16> to vector<192x192xbf16>
    %cst_13 = arith.constant dense<0.000000e+00> : vector<224x192xf32>
    %19 = tpu.matmul %0, %18, %cst_13 {dimension_numbers = #tpu.dot_dimension_numbers<[1], [0], [0], [1], [0, 0, 1, 1], [], []>} : vector<224x192xbf16>, vector<192x192xbf16>, vector<224x192xf32> -> vector<224x192xf32>
    %20 = vector.extract_strided_slice %19 {offsets = [3, 0], sizes = [216, 192], strides = [1, 1]} : vector<224x192xf32> to vector<216x192xf32>
    %21 = arith.addf %16, %20 : vector<216x192xf32>
    %c4 = arith.constant 4 : index
    %c0_14 = arith.constant 0 : index
    %c0_15 = arith.constant 0 : index
    %22 = vector.load %arg1[%c4, %c0_14, %c0_15] : memref<7x192x192xbf16, #tpu.memory_space<vmem>>, vector<1x192x192xbf16>
    %23 = vector.shape_cast %22 : vector<1x192x192xbf16> to vector<192x192xbf16>
    %cst_16 = arith.constant dense<0.000000e+00> : vector<224x192xf32>
    %24 = tpu.matmul %0, %23, %cst_16 {dimension_numbers = #tpu.dot_dimension_numbers<[1], [0], [0], [1], [0, 0, 1, 1], [], []>} : vector<224x192xbf16>, vector<192x192xbf16>, vector<224x192xf32> -> vector<224x192xf32>
    %25 = vector.extract_strided_slice %24 {offsets = [4, 0], sizes = [216, 192], strides = [1, 1]} : vector<224x192xf32> to vector<216x192xf32>
    %26 = arith.addf %21, %25 : vector<216x192xf32>
    %c5 = arith.constant 5 : index
    %c0_17 = arith.constant 0 : index
    %c0_18 = arith.constant 0 : index
    %27 = vector.load %arg1[%c5, %c0_17, %c0_18] : memref<7x192x192xbf16, #tpu.memory_space<vmem>>, vector<1x192x192xbf16>
    %28 = vector.shape_cast %27 : vector<1x192x192xbf16> to vector<192x192xbf16>
    %cst_19 = arith.constant dense<0.000000e+00> : vector<224x192xf32>
    %29 = tpu.matmul %0, %28, %cst_19 {dimension_numbers = #tpu.dot_dimension_numbers<[1], [0], [0], [1], [0, 0, 1, 1], [], []>} : vector<224x192xbf16>, vector<192x192xbf16>, vector<224x192xf32> -> vector<224x192xf32>
    %30 = vector.extract_strided_slice %29 {offsets = [5, 0], sizes = [216, 192], strides = [1, 1]} : vector<224x192xf32> to vector<216x192xf32>
    %31 = arith.addf %26, %30 : vector<216x192xf32>
    %c6 = arith.constant 6 : index
    %c0_20 = arith.constant 0 : index
    %c0_21 = arith.constant 0 : index
    %32 = vector.load %arg1[%c6, %c0_20, %c0_21] : memref<7x192x192xbf16, #tpu.memory_space<vmem>>, vector<1x192x192xbf16>
    %33 = vector.shape_cast %32 : vector<1x192x192xbf16> to vector<192x192xbf16>
    %cst_22 = arith.constant dense<0.000000e+00> : vector<224x192xf32>
    %34 = tpu.matmul %0, %33, %cst_22 {dimension_numbers = #tpu.dot_dimension_numbers<[1], [0], [0], [1], [0, 0, 1, 1], [], []>} : vector<224x192xbf16>, vector<192x192xbf16>, vector<224x192xf32> -> vector<224x192xf32>
    %35 = vector.extract_strided_slice %34 {offsets = [6, 0], sizes = [216, 192], strides = [1, 1]} : vector<224x192xf32> to vector<216x192xf32>
    %36 = arith.addf %31, %35 : vector<216x192xf32>
    %c0_23 = arith.constant 0 : index
    %c0_24 = arith.constant 0 : index
    %37 = vector.load %arg2[%c0_23, %c0_24] : memref<1x192xf32, #tpu.memory_space<vmem>>, vector<1x192xf32>
    %38 = vector.broadcast %37 : vector<1x192xf32> to vector<216x192xf32>
    %39 = arith.mulf %36, %38 : vector<216x192xf32>
    %c0_25 = arith.constant 0 : index
    %c0_26 = arith.constant 0 : index
    %40 = vector.load %arg3[%c0_25, %c0_26] : memref<1x192xf32, #tpu.memory_space<vmem>>, vector<1x192xf32>
    %41 = vector.broadcast %40 : vector<1x192xf32> to vector<216x192xf32>
    %42 = arith.addf %39, %41 : vector<216x192xf32>
    %c0_27 = arith.constant 0 : index
    %c0_28 = arith.constant 0 : index
    %43 = vector.load %arg4[%c0_27, %c0_28] : memref<216x192xf32, #tpu.memory_space<vmem>>, vector<216x192xf32>
    tpu.vector_store %arg4[%c0_27, %c0_28], %42 {strides = array<i32>} : memref<216x192xf32, #tpu.memory_space<vmem>>, vector<216x192xf32>,
    return
  }
}

</mosaic_0001>

<bundles_post_ra>
// kernel: conv_bn_forward.1
= control target key start
LH: loop header
LB: loop body
LE: loop exit
PB: predicated region body
PF: predicated region fallthrough
CT: control target
= control target key end

     0   :  { %vm316_vm0 = vcmask 523264   ;;  %vm958_vm1 = vcmask 1046528   ;;  %vm1551_vm2 = vcmask 1045504   ;;  %vm2144_vm3 = vcmask 1044480   ;;  %s7260_s1 = inlined_call_operand.vmem [shape: bf16[7,192,192], index: 1, kind: input, shape index: {}]   ;;  %s7261_s0 = inlined_call_operand.vmem [shape: bf16[224,192], index: 0, kind: input, shape index: {}]   ;;  %s7262_s2 = inlined_call_operand.vmem [shape: f32[1,192], index: 2, kind: input, shape index: {}]   ;;  %s7263_s3 = inlined_call_operand.vmem [shape: f32[1,192], index: 3, kind: input, shape index: {}]   ;;  %s7264_s4 = inlined_call_operand.vmem [shape: f32[216,192], index: 4, kind: output, shape index: {}]  }
   0x1   :  { %v4794_v0 = vld [vmem:[%s7260_s1 + $0x4] ss:$8 sps:$4 sm:$0xff]   ;;  %v4796_v1 = vld [vmem:[%s7260_s1] ss:$8 sps:$4 sm:$0xff]   ;;  %v4797_v2 = vld [vmem:[%s7260_s1 + $0x14] ss:$8 sps:$4 sm:$0xff]  }
   0x2   :  { %359 = vmatprep.subr.bf16.mxu0 %v4794_v0  ;;  %4770 = vmatprep.subr.bf16.mxu1 %v4794_v0  ;;  %v4799_v3 = vld [vmem:[%s7260_s1 + $0x10] ss:$8 sps:$4 sm:$0xff]   ;;  %v4800_v4 = vld [vmem:[%s7260_s1 + $0x24] ss:$8 sps:$4 sm:$0xff]   ;;  %v4802_v5 = vld [vmem:[%s7260_s1 + $0x20] ss:$8 sps:$4 sm:$0xff]  }
   0x3   :  { %360 = vmatpush1.bf16.msra.mxu0 %v4796_v1  ;;  %4782 = vmatpush1.bf16.msra.mxu1 %v4796_v1  ;;  %v4803_v6 = vld [vmem:[%s7260_s1 + $0x34] ss:$8 sps:$4 sm:$0xff]   ;;  %v4805_v7 = vld [vmem:[%s7260_s1 + $0x30] ss:$8 sps:$4 sm:$0xff]   ;;  %v4806_v8 = vld [vmem:[%s7260_s1 + $0x44] ss:$8 sps:$4 sm:$0xff]  }
   0x4   :  { %361 = vmatprep.subr.bf16.mxu0 %v4797_v2  ;;  %4771 = vmatprep.subr.bf16.mxu1 %v4797_v2  ;;  %v4808_v9 = vld [vmem:[%s7260_s1 + $0x40] ss:$8 sps:$4 sm:$0xff]   ;;  %v4809_v10 = vld [vmem:[%s7260_s1 + $0x54] ss:$8 sps:$4 sm:$0xff]   ;;  %v5177_v11 = vld [vmem:[%s7261_s0 + $0x4] ss:$8 sps:$4 sm:$0xff]  }
   0x5   :  { %v5182_v12 = vld [vmem:[%s7261_s0 + $0x74] ss:$8 sps:$4 sm:$0xff]   ;;  %4384 = vmatprep.mubr.msk.bf16.mxu0 %vm316_vm0, %v5177_v11  ;;  %v4811_v13 = vld [vmem:[%s7260_s1 + $0x50] ss:$8 sps:$4 sm:$0xff]   ;;  %v4812_v14 = vld [vmem:[%s7260_s1 + $0x64] ss:$8 sps:$4 sm:$0xff]  }
   0x6   :  { %4391 = vmatprep.mubr.msk.bf16.mxu1 %vm316_vm0, %v5182_v12  ;;  %v4814_v15 = vld [vmem:[%s7260_s1 + $0x60] ss:$8 sps:$4 sm:$0xff]   ;;  %v4815_v16 = vld [vmem:[%s7260_s1 + $0x74] ss:$8 sps:$4 sm:$0xff]   ;;  %v4817_v17 = vld [vmem:[%s7260_s1 + $0x70] ss:$8 sps:$4 sm:$0xff]  }
   0x7   :  { %362 = vmatpush1.bf16.msra.mxu0 %v4799_v3  ;;  %4783 = vmatpush1.bf16.msra.mxu1 %v4799_v3  ;;  %v4818_v18 = vld [vmem:[%s7260_s1 + $0x84] ss:$8 sps:$4 sm:$0xff]   ;;  %v4820_v19 = vld [vmem:[%s7260_s1 + $0x80] ss:$8 sps:$4 sm:$0xff]   ;;  %v4821_v20 = vld [vmem:[%s7260_s1 + $0x94] ss:$8 sps:$4 sm:$0xff]  }
   0x8   :  { %363 = vmatprep.subr.bf16.mxu0 %v4800_v4  ;;  %4772 = vmatprep.subr.bf16.mxu1 %v4800_v4  ;;  %v4823_v21 = vld [vmem:[%s7260_s1 + $0x90] ss:$8 sps:$4 sm:$0xff]   ;;  %v4824_v22 = vld [vmem:[%s7260_s1 + $0xa4] ss:$8 sps:$4 sm:$0xff]   ;;  %v4826_v23 = vld [vmem:[%s7260_s1 + $0xa0] ss:$8 sps:$4 sm:$0xff]  }
   0x9   :  { %v4827_v24 = vld [vmem:[%s7260_s1 + $0xb4] ss:$8 sps:$4 sm:$0xff]   ;;  %v4829_v25 = vld [vmem:[%s7260_s1 + $0xb0] ss:$8 sps:$4 sm:$0xff]   ;;  %v4838_v26 = vld [vmem:[%s7260_s1 + $0xc4] ss:$8 sps:$4 sm:$0xff]  }
   0xa   :  { %v5233_v27 = vld [vmem:[%s7261_s0] ss:$8 sps:$4 sm:$0xff]   ;;  %v4841_v28 = vld [vmem:[%s7260_s1 + $0x184] ss:$8 sps:$4 sm:$0xff]   ;;  %v5241_v29 = vld [vmem:[%s7261_s0 + $0x70] ss:$8 sps:$4 sm:$0xff]  }
   0xb   :  { %364 = vmatpush1.bf16.msra.mxu0 %v4802_v5  ;;  %4784 = vmatpush1.bf16.msra.mxu1 %v4802_v5  ;;  %v4836_v30 = vld [vmem:[%s7260_s1 + $0xc0] ss:$8 sps:$4 sm:$0xff]   ;;  %v4844_v32 = vld [vmem:[%s7260_s1 + $0xd4] ss:$8 sps:$4 sm:$0xff]   ;;  %v5260_v34 = vld [vmem:[%s7261_s0 + $0x84] ss:$8 sps:$4 sm:$0xff]  }
   0xc   :  { %365 = vmatprep.subr.bf16.mxu0 %v4803_v6  ;;  %4773 = vmatprep.subr.bf16.mxu1 %v4803_v6  ;;  %v4839_v31 = vld [vmem:[%s7260_s1 + $0x180] ss:$8 sps:$4 sm:$0xff]   ;;  %v5255_v33 = vld [vmem:[%s7261_s0 + $0x14] ss:$8 sps:$4 sm:$0xff]   ;;  %v4842_v36 = vld [vmem:[%s7260_s1 + $0xd0] ss:$8 sps:$4 sm:$0xff]  }
   0xd   :  { %v4851_v35 = vld [vmem:[%s7260_s1 + $0x194] ss:$8 sps:$4 sm:$0xff]   ;;  %v4849_v37 = vld [vmem:[%s7260_s1 + $0x190] ss:$8 sps:$4 sm:$0xff]   ;;  %v4856_v38 = vld [vmem:[%s7260_s1 + $0xe4] ss:$8 sps:$4 sm:$0xff]  }
   0xe   :  { %v5281_v39 = vld [vmem:[%s7261_s0 + $0x10] ss:$8 sps:$4 sm:$0xff]   ;;  %v4859_v40 = vld [vmem:[%s7260_s1 + $0x1a4] ss:$8 sps:$4 sm:$0xff]   ;;  %v5291_v41 = vld [vmem:[%s7261_s0 + $0x80] ss:$8 sps:$4 sm:$0xff]  }
   0xf   :  { %366 = vmatpush1.bf16.msra.mxu0 %v4805_v7  ;;  %4785 = vmatpush1.bf16.msra.mxu1 %v4805_v7  ;;  %v4854_v42 = vld [vmem:[%s7260_s1 + $0xe0] ss:$8 sps:$4 sm:$0xff]   ;;  %v4862_v44 = vld [vmem:[%s7260_s1 + $0xf4] ss:$8 sps:$4 sm:$0xff]   ;;  %v5305_v45 = vld [vmem:[%s7261_s0 + $0x24] ss:$8 sps:$4 sm:$0xff]  }
  0x10   :  { %367 = vmatprep.subr.bf16.mxu0 %v4806_v8  ;;  %4774 = vmatprep.subr.bf16.mxu1 %v4806_v8  ;;  %v4857_v43 = vld [vmem:[%s7260_s1 + $0x1a0] ss:$8 sps:$4 sm:$0xff]   ;;  %v5310_v46 = vld [vmem:[%s7261_s0 + $0x94] ss:$8 sps:$4 sm:$0xff]   ;;  %v4860_v48 = vld [vmem:[%s7260_s1 + $0xf0] ss:$8 sps:$4 sm:$0xff]  }
  0x11   :  { %v4871_v47 = vld [vmem:[%s7260_s1 + $0x1b4] ss:$8 sps:$4 sm:$0xff]   ;;  %v4869_v49 = vld [vmem:[%s7260_s1 + $0x1b0] ss:$8 sps:$4 sm:$0xff]   ;;  %v4874_v50 = vld [vmem:[%s7260_s1 + $0x104] ss:$8 sps:$4 sm:$0xff]  }
  0x12   :  { %v4877_v51 = vld [vmem:[%s7260_s1 + $0x1c4] ss:$8 sps:$4 sm:$0xff]   ;;  %v5336_v52 = vld [vmem:[%s7261_s0 + $0x20] ss:$8 sps:$4 sm:$0xff]   ;;  %v5341_v53 = vld [vmem:[%s7261_s0 + $0x90] ss:$8 sps:$4 sm:$0xff]  }
  0x13   :  { %368 = vmatpush1.bf16.msra.mxu0 %v4808_v9  ;;  %4786 = vmatpush1.bf16.msra.mxu1 %v4808_v9  ;;  %v4872_v54 = vld [vmem:[%s7260_s1 + $0x100] ss:$8 sps:$4 sm:$0xff]   ;;  %v5352_v56 = vld [vmem:[%s7261_s0 + $0x34] ss:$8 sps:$4 sm:$0xff]   ;;  %v5357_v57 = vld [vmem:[%s7261_s0 + $0xa4] ss:$8 sps:$4 sm:$0xff]  }
  0x14   :  { %369 = vmatprep.subr.bf16.mxu0 %v4809_v10  ;;  %4775 = vmatprep.subr.bf16.mxu1 %v4809_v10  ;;  %v4875_v55 = vld [vmem:[%s7260_s1 + $0x1c0] ss:$8 sps:$4 sm:$0xff]   ;;  %v4886_v58 = vld [vmem:[%s7260_s1 + $0x114] ss:$8 sps:$4 sm:$0xff]   ;;  %v4884_v60 = vld [vmem:[%s7260_s1 + $0x110] ss:$8 sps:$4 sm:$0xff]  }
  0x15   :  { %v4889_v59 = vld [vmem:[%s7260_s1 + $0x1d4] ss:$8 sps:$4 sm:$0xff]   ;;  %v4887_v61 = vld [vmem:[%s7260_s1 + $0x1d0] ss:$8 sps:$4 sm:$0xff]   ;;  %v4892_v62 = vld [vmem:[%s7260_s1 + $0x124] ss:$8 sps:$4 sm:$0xff]  }
  0x16   :  { %v5383_v63 = vld [vmem:[%s7261_s0 + $0x30] ss:$8 sps:$4 sm:$0xff]   ;;  %v4895_v0 = vld [vmem:[%s7260_s1 + $0x1e4] ss:$8 sps:$4 sm:$0xff]   ;;  %v5391_v1 = vld [vmem:[%s7261_s0 + $0xa0] ss:$8 sps:$4 sm:$0xff]  }
  0x17   :  { %370 = vmatpush1.bf16.msra.mxu0 %v4811_v13  ;;  %4787 = vmatpush1.bf16.msra.mxu1 %v4811_v13  ;;  %v4890_v2 = vld [vmem:[%s7260_s1 + $0x120] ss:$8 sps:$4 sm:$0xff]   ;;  %v5402_v4 = vld [vmem:[%s7261_s0 + $0x44] ss:$8 sps:$4 sm:$0xff]   ;;  %v5407_v5 = vld [vmem:[%s7261_s0 + $0xb4] ss:$8 sps:$4 sm:$0xff]  }
  0x18   :  { %371 = vmatprep.subr.bf16.mxu0 %v4812_v14  ;;  %4776 = vmatprep.subr.bf16.mxu1 %v4812_v14  ;;  %v4893_v3 = vld [vmem:[%s7260_s1 + $0x1e0] ss:$8 sps:$4 sm:$0xff]   ;;  %v4904_v6 = vld [vmem:[%s7260_s1 + $0x134] ss:$8 sps:$4 sm:$0xff]   ;;  %v4902_v8 = vld [vmem:[%s7260_s1 + $0x130] ss:$8 sps:$4 sm:$0xff]  }
  0x19   :  { %v4907_v7 = vld [vmem:[%s7260_s1 + $0x1f4] ss:$8 sps:$4 sm:$0xff]   ;;  %v4905_v9 = vld [vmem:[%s7260_s1 + $0x1f0] ss:$8 sps:$4 sm:$0xff]   ;;  %v5430_v10 = vld [vmem:[%s7261_s0 + $0x40] ss:$8 sps:$4 sm:$0xff]  }
  0x1a   :  { %v5435_v13 = vld [vmem:[%s7261_s0 + $0xb0] ss:$8 sps:$4 sm:$0xff]   ;;  %v4910_v14 = vld [vmem:[%s7260_s1 + $0x144] ss:$8 sps:$4 sm:$0xff]   ;;  %vm2737_vm4 = vcmask 1043456   ;;  %vm3330_vm5 = vcmask 1042432  }
  0x1b   :  { %372 = vmatpush1.bf16.msra.mxu0 %v4814_v15  ;;  %4788 = vmatpush1.bf16.msra.mxu1 %v4814_v15  ;;  %v4919_v15 = vld [vmem:[%s7260_s1 + $0x204] ss:$8 sps:$4 sm:$0xff]   ;;  %vm3923_vm6 = vcmask 1041408  }
  0x1c   :  { %373 = vmatprep.subr.bf16.mxu0 %v4815_v16  ;;  %4777 = vmatprep.subr.bf16.mxu1 %v4815_v16  ;;  %v4908_v16 = vld [vmem:[%s7260_s1 + $0x140] ss:$8 sps:$4 sm:$0xff]  }
  0x1f   :  { %374 = vmatpush1.bf16.msra.mxu0 %v4817_v17  ;;  %4789 = vmatpush1.bf16.msra.mxu1 %v4817_v17  ;;  %v5449_v17 = vld [vmem:[%s7261_s0 + $0x54] ss:$8 sps:$4 sm:$0xff]  }
  0x20   :  { %375 = vmatprep.subr.bf16.mxu0 %v4818_v18  ;;  %4778 = vmatprep.subr.bf16.mxu1 %v4818_v18  ;;  %v5454_v18 = vld [vmem:[%s7261_s0 + $0xc4] ss:$8 sps:$4 sm:$0xff]  }
  0x23   :  { %376 = vmatpush1.bf16.msra.mxu0 %v4820_v19  ;;  %4790 = vmatpush1.bf16.msra.mxu1 %v4820_v19  ;;  %v4917_v19 = vld [vmem:[%s7260_s1 + $0x200] ss:$8 sps:$4 sm:$0xff]  }
  0x24   :  { %377 = vmatprep.subr.bf16.mxu0 %v4821_v20  ;;  %4779 = vmatprep.subr.bf16.mxu1 %v4821_v20  ;;  %v4922_v20 = vld [vmem:[%s7260_s1 + $0x154] ss:$8 sps:$4 sm:$0xff]  }
  0x27   :  { %378 = vmatpush1.bf16.msra.mxu0 %v4823_v21  ;;  %4791 = vmatpush1.bf16.msra.mxu1 %v4823_v21  ;;  %v4925_v21 = vld [vmem:[%s7260_s1 + $0x214] ss:$8 sps:$4 sm:$0xff]  }
  0x28   :  { %379 = vmatprep.subr.bf16.mxu0 %v4824_v22  ;;  %4780 = vmatprep.subr.bf16.mxu1 %v4824_v22  ;;  %v4920_v22 = vld [vmem:[%s7260_s1 + $0x150] ss:$8 sps:$4 sm:$0xff]  }
  0x2b   :  { %380 = vmatpush1.bf16.msra.mxu0 %v4826_v23  ;;  %4792 = vmatpush1.bf16.msra.mxu1 %v4826_v23  ;;  %v4923_v23 = vld [vmem:[%s7260_s1 + $0x210] ss:$8 sps:$4 sm:$0xff]  }
  0x2c   :  { %381 = vmatprep.subr.bf16.mxu0 %v4827_v24  ;;  %4781 = vmatprep.subr.bf16.mxu1 %v4827_v24  ;;  %v5480_v24 = vld [vmem:[%s7261_s0 + $0x50] ss:$8 sps:$4 sm:$0xff]  }
  0x2f   :  { %382 = vmatpush1.bf16.msra.mxu0 %v4829_v25  ;;  %4793 = vmatpush1.bf16.msra.mxu1 %v4829_v25  ;;  %v5485_v25 = vld [vmem:[%s7261_s0 + $0xc0] ss:$8 sps:$4 sm:$0xff]  }
  0x30   :  { %729 = vmatprep.subr.bf16.mxu1 %v4838_v26  ;;  %1322 = vmatprep.subr.bf16.mxu0 %v4841_v28  ;;  %v4932_v26 = vld [vmem:[%s7260_s1 + $0x164] ss:$8 sps:$4 sm:$0xff]  }
  0x31   :  { %v4937_v28 = vld [vmem:[%s7260_s1 + $0x224] ss:$8 sps:$4 sm:$0xff]  }
  0x32   :  { %392 = vmatmul.mubr.bf16.vlgmr.msra.gmra.mrb[0].mxu0 %v5233_v27  ;;  %462 = vmatmul.mubr.bf16.vlgmr.msra.gmra.mrb[0].mxu1 %v5241_v29 }
  0x33   :  { %730 = vmatpush1.bf16.msra.mxu1 %v4836_v30  ;;  %1323 = vmatpush1.bf16.msra.mxu0 %v4839_v31  ;;  %v5496_v30 = vld [vmem:[%s7261_s0 + $0x64] ss:$8 sps:$4 sm:$0xff]   ;;  %v5501_v31 = vld [vmem:[%s7261_s0 + $0xd4] ss:$8 sps:$4 sm:$0xff]  }
  0x34   :  { %731 = vmatprep.subr.bf16.mxu1 %v4844_v32  ;;  %4385 = vmatprep.mubr.msk.bf16.mxu0 %vm316_vm0, %v5255_v33  ;;  %v4930_v32 = vld [vmem:[%s7260_s1 + $0x160] ss:$8 sps:$4 sm:$0xff]  }
  0x35   :  { %4392 = vmatprep.mubr.msk.bf16.mxu1 %vm316_vm0, %v5260_v34  ;;  %1324 = vmatprep.subr.bf16.mxu0 %v4851_v35  ;;  %v4935_v35 = vld [vmem:[%s7260_s1 + $0x220] ss:$8 sps:$4 sm:$0xff]  }
  0x37   :  { %732 = vmatpush1.bf16.msra.mxu1 %v4842_v36  ;;  %1325 = vmatpush1.bf16.msra.mxu0 %v4849_v37  ;;  %v4940_v36 = vld [vmem:[%s7260_s1 + $0x174] ss:$8 sps:$4 sm:$0xff]  }
  0x38   :  { %733 = vmatprep.subr.bf16.mxu1 %v4856_v38  ;;  %1326 = vmatprep.subr.bf16.mxu0 %v4859_v40  ;;  %v4943_v37 = vld [vmem:[%s7260_s1 + $0x234] ss:$8 sps:$4 sm:$0xff]   ;;  %v4938_v38 = vld [vmem:[%s7260_s1 + $0x170] ss:$8 sps:$4 sm:$0xff]  }
  0x39   :  { %v4941_v40 = vld [vmem:[%s7260_s1 + $0x230] ss:$8 sps:$4 sm:$0xff]  }
  0x3a   :  { %402 = vmatmul.mubr.bf16.gmra.mrb[4].mxu0 %v5281_v39  ;;  %472 = vmatmul.mubr.bf16.gmra.mrb[4].mxu1 %v5291_v41 }
  0x3b   :  { %734 = vmatpush1.bf16.msra.mxu1 %v4854_v42  ;;  %1327 = vmatpush1.bf16.msra.mxu0 %v4857_v43  ;;  %v4946_v42 = vld [vmem:[%s7260_s1 + $0x244] ss:$8 sps:$4 sm:$0xff]  }
  0x3c   :  { %735 = vmatprep.subr.bf16.mxu1 %v4862_v44  ;;  %4386 = vmatprep.mubr.msk.bf16.mxu0 %vm316_vm0, %v5305_v45  ;;  %v4949_v43 = vld [vmem:[%s7260_s1 + $0x304] ss:$8 sps:$4 sm:$0xff]   ;;  %v5536_v44 = vld [vmem:[%s7261_s0 + $0x60] ss:$8 sps:$4 sm:$0xff]  }
  0x3d   :  { %4393 = vmatprep.mubr.msk.bf16.mxu1 %vm316_vm0, %v5310_v46  ;;  %1328 = vmatprep.subr.bf16.mxu0 %v4871_v47  ;;  %v5541_v47 = vld [vmem:[%s7261_s0 + $0xd0] ss:$8 sps:$4 sm:$0xff]  }
  0x3f   :  { %736 = vmatpush1.bf16.msra.mxu1 %v4860_v48  ;;  %1329 = vmatpush1.bf16.msra.mxu0 %v4869_v49  ;;  %v4944_v48 = vld [vmem:[%s7260_s1 + $0x240] ss:$8 sps:$4 sm:$0xff]  }
  0x40   :  { %737 = vmatprep.subr.bf16.mxu1 %v4874_v50  ;;  %1330 = vmatprep.subr.bf16.mxu0 %v4877_v51  ;;  %v4947_v49 = vld [vmem:[%s7260_s1 + $0x300] ss:$8 sps:$4 sm:$0xff]   ;;  %v4952_v50 = vld [vmem:[%s7260_s1 + $0x254] ss:$8 sps:$4 sm:$0xff]  }
  0x41   :  { %v4955_v51 = vld [vmem:[%s7260_s1 + $0x314] ss:$8 sps:$4 sm:$0xff]  }
  0x42   :  { %412 = vmatmul.mubr.bf16.gmra.mrb[8].mxu0 %v5336_v52  ;;  %482 = vmatmul.mubr.bf16.gmra.mrb[8].mxu1 %v5341_v53 }
  0x43   :  { %738 = vmatpush1.bf16.msra.mxu1 %v4872_v54  ;;  %1331 = vmatpush1.bf16.msra.mxu0 %v4875_v55  ;;  %v4953_v54 = vld [vmem:[%s7260_s1 + $0x310] ss:$8 sps:$4 sm:$0xff]   ;;  %v4958_v55 = vld [vmem:[%s7260_s1 + $0x264] ss:$8 sps:$4 sm:$0xff]  }
  0x44   :  { %4387 = vmatprep.mubr.msk.bf16.mxu0 %vm316_vm0, %v5352_v56  ;;  %4394 = vmatprep.mubr.msk.bf16.mxu1 %vm316_vm0, %v5357_v57 }
  0x45   :  { %739 = vmatprep.subr.bf16.mxu1 %v4886_v58  ;;  %1332 = vmatprep.subr.bf16.mxu0 %v4889_v59  ;;  %v4961_v58 = vld [vmem:[%s7260_s1 + $0x324] ss:$8 sps:$4 sm:$0xff]   ;;  %v4956_v59 = vld [vmem:[%s7260_s1 + $0x260] ss:$8 sps:$4 sm:$0xff]  }
  0x47   :  { %740 = vmatpush1.bf16.msra.mxu1 %v4884_v60  ;;  %1333 = vmatpush1.bf16.msra.mxu0 %v4887_v61  ;;  %v4959_v60 = vld [vmem:[%s7260_s1 + $0x320] ss:$8 sps:$4 sm:$0xff]   ;;  %v4964_v61 = vld [vmem:[%s7260_s1 + $0x274] ss:$8 sps:$4 sm:$0xff]  }
  0x48   :  { %741 = vmatprep.subr.bf16.mxu1 %v4892_v62  ;;  %1334 = vmatprep.subr.bf16.mxu0 %v4895_v0  ;;  %v4967_v62 = vld [vmem:[%s7260_s1 + $0x334] ss:$8 sps:$4 sm:$0xff]   ;;  %v4962_v0 = vld [vmem:[%s7260_s1 + $0x270] ss:$8 sps:$4 sm:$0xff]  }
  0x4a   :  { %422 = vmatmul.mubr.bf16.gmra.mrb[12].mxu0 %v5383_v63  ;;  %492 = vmatmul.mubr.bf16.gmra.mrb[12].mxu1 %v5391_v1 }
  0x4b   :  { %742 = vmatpush1.bf16.msra.mxu1 %v4890_v2  ;;  %4388 = vmatprep.mubr.msk.bf16.mxu0 %vm316_vm0, %v5402_v4  ;;  %v4965_v2 = vld [vmem:[%s7260_s1 + $0x330] ss:$8 sps:$4 sm:$0xff]  }
  0x4c   :  { %4395 = vmatprep.mubr.msk.bf16.mxu1 %vm316_vm0, %v5407_v5  ;;  %1335 = vmatpush1.bf16.msra.mxu0 %v4893_v3  ;;  %v4970_v3 = vld [vmem:[%s7260_s1 + $0x284] ss:$8 sps:$4 sm:$0xff]  }
  0x4d   :  { %743 = vmatprep.subr.bf16.mxu1 %v4904_v6  ;;  %1336 = vmatprep.subr.bf16.mxu0 %v4907_v7  ;;  %v4973_v6 = vld [vmem:[%s7260_s1 + $0x344] ss:$8 sps:$4 sm:$0xff]   ;;  %v4968_v7 = vld [vmem:[%s7260_s1 + $0x280] ss:$8 sps:$4 sm:$0xff]  }
  0x4f   :  { %744 = vmatpush1.bf16.msra.mxu1 %v4902_v8  ;;  %v4971_v8 = vld [vmem:[%s7260_s1 + $0x340] ss:$8 sps:$4 sm:$0xff]  }
  0x50   :  { %1337 = vmatpush1.bf16.msra.mxu0 %v4905_v9  ;;  %745 = vmatprep.subr.bf16.mxu1 %v4910_v14  ;;  %v4976_v9 = vld [vmem:[%s7260_s1 + $0x294] ss:$8 sps:$4 sm:$0xff]  }
  0x51   :  { %1338 = vmatprep.subr.bf16.mxu0 %v4919_v15  ;;  %v4979_v14 = vld [vmem:[%s7260_s1 + $0x354] ss:$8 sps:$4 sm:$0xff]   ;;  %v4974_v15 = vld [vmem:[%s7260_s1 + $0x290] ss:$8 sps:$4 sm:$0xff]  }
  0x52   :  { %432 = vmatmul.mubr.bf16.gmra.mrb[16].mxu0 %v5430_v10  ;;  %502 = vmatmul.mubr.bf16.gmra.mrb[16].mxu1 %v5435_v13 }
  0x53   :  { %4389 = vmatprep.mubr.msk.bf16.mxu0 %vm316_vm0, %v5449_v17  ;;  %4396 = vmatprep.mubr.msk.bf16.mxu1 %vm316_vm0, %v5454_v18 }
  0x54   :  { %746 = vmatpush1.bf16.msra.mxu1 %v4908_v16  ;;  %1339 = vmatpush1.bf16.msra.mxu0 %v4917_v19  ;;  %v4977_v16 = vld [vmem:[%s7260_s1 + $0x350] ss:$8 sps:$4 sm:$0xff]   ;;  %v4982_v19 = vld [vmem:[%s7260_s1 + $0x2a4] ss:$8 sps:$4 sm:$0xff]  }
  0x55   :  { %747 = vmatprep.subr.bf16.mxu1 %v4922_v20  ;;  %1340 = vmatprep.subr.bf16.mxu0 %v4925_v21  ;;  %v4985_v20 = vld [vmem:[%s7260_s1 + $0x364] ss:$8 sps:$4 sm:$0xff]   ;;  %v4980_v21 = vld [vmem:[%s7260_s1 + $0x2a0] ss:$8 sps:$4 sm:$0xff]  }
  0x58   :  { %748 = vmatpush1.bf16.msra.mxu1 %v4920_v22  ;;  %1341 = vmatpush1.bf16.msra.mxu0 %v4923_v23  ;;  %v4983_v22 = vld [vmem:[%s7260_s1 + $0x360] ss:$8 sps:$4 sm:$0xff]   ;;  %v4988_v23 = vld [vmem:[%s7260_s1 + $0x2b4] ss:$8 sps:$4 sm:$0xff]  }
  0x59   :  { %749 = vmatprep.subr.bf16.mxu1 %v4932_v26  ;;  %1342 = vmatprep.subr.bf16.mxu0 %v4937_v28  ;;  %v4991_v26 = vld [vmem:[%s7260_s1 + $0x374] ss:$8 sps:$4 sm:$0xff]   ;;  %v4986_v28 = vld [vmem:[%s7260_s1 + $0x2b0] ss:$8 sps:$4 sm:$0xff]  }
  0x5a   :  { %442 = vmatmul.mubr.bf16.gmra.mrb[20].mxu0 %v5480_v24  ;;  %512 = vmatmul.mubr.bf16.gmra.mrb[20].mxu1 %v5485_v25 }
  0x5b   :  { %4390 = vmatprep.mubr.msk.bf16.mxu0 %vm316_vm0, %v5496_v30  ;;  %4397 = vmatprep.mubr.msk.bf16.mxu1 %vm316_vm0, %v5501_v31 }
  0x5c   :  { %750 = vmatpush1.bf16.msra.mxu1 %v4930_v32  ;;  %1343 = vmatpush1.bf16.msra.mxu0 %v4935_v35  ;;  %v4989_v32 = vld [vmem:[%s7260_s1 + $0x370] ss:$8 sps:$4 sm:$0xff]   ;;  %v4994_v35 = vld [vmem:[%s7260_s1 + $0x2c4] ss:$8 sps:$4 sm:$0xff]  }
  0x5d   :  { %751 = vmatprep.subr.bf16.mxu1 %v4940_v36  ;;  %1344 = vmatprep.subr.bf16.mxu0 %v4943_v37  ;;  %v4997_v36 = vld [vmem:[%s7260_s1 + $0x384] ss:$8 sps:$4 sm:$0xff]   ;;  %v4992_v37 = vld [vmem:[%s7260_s1 + $0x2c0] ss:$8 sps:$4 sm:$0xff]  }
  0x60   :  { %752 = vmatpush1.bf16.msra.mxu1 %v4938_v38  ;;  %1345 = vmatpush1.bf16.msra.mxu0 %v4941_v40  ;;  %v4995_v38 = vld [vmem:[%s7260_s1 + $0x380] ss:$8 sps:$4 sm:$0xff]   ;;  %v5000_v40 = vld [vmem:[%s7260_s1 + $0x2d4] ss:$8 sps:$4 sm:$0xff]  }
  0x61   :  { %1915 = vmatprep.subr.bf16.mxu1 %v4946_v42  ;;  %2508 = vmatprep.subr.bf16.mxu0 %v4949_v43  ;;  %v5003_v42 = vld [vmem:[%s7260_s1 + $0x394] ss:$8 sps:$4 sm:$0xff]   ;;  %v4998_v43 = vld [vmem:[%s7260_s1 + $0x2d0] ss:$8 sps:$4 sm:$0xff]  }
  0x62   :  { %452 = vmatmul.mubr.bf16.gmra.mrb[24].mxu0 %v5536_v44  ;;  %522 = vmatmul.mubr.bf16.gmra.mrb[24].mxu1 %v5541_v47 }
  0x63   :  { %4446 = vmatprep.mubr.msk.bf16.mxu1 %vm316_vm0, %v5177_v11  ;;  %4508 = vmatprep.mubr.msk.bf16.mxu0 %vm316_vm0, %v5177_v11  ;;  %v4950_v11 = vld [vmem:[%s7260_s1 + $0x250] ss:$8 sps:$4 sm:$0xff]  }
  0x6a   :  { %762 = vmatmul.mubr.bf16.vlgmr.msra.gmra.mrb[28].mxu1 %v5233_v27  ;;  %1355 = vmatmul.mubr.bf16.vlgmr.msra.gmra.mrb[28].mxu0 %v5233_v27 }
  0x6b   :  { %1916 = vmatpush1.bf16.msra.mxu1 %v4944_v48  ;;  %2509 = vmatpush1.bf16.msra.mxu0 %v4947_v49  ;;  %v5001_v48 = vld [vmem:[%s7260_s1 + $0x390] ss:$8 sps:$4 sm:$0xff]   ;;  %v5006_v49 = vld [vmem:[%s7260_s1 + $0x2e4] ss:$8 sps:$4 sm:$0xff]  }
  0x6c   :  { %4447 = vmatprep.mubr.msk.bf16.mxu1 %vm316_vm0, %v5255_v33  ;;  %4509 = vmatprep.mubr.msk.bf16.mxu0 %vm316_vm0, %v5255_v33 }
  0x6d   :  { %1917 = vmatprep.subr.bf16.mxu1 %v4952_v50  ;;  %2510 = vmatprep.subr.bf16.mxu0 %v4955_v51  ;;  %v5009_v50 = vld [vmem:[%s7260_s1 + $0x3a4] ss:$8 sps:$4 sm:$0xff]   ;;  %v5004_v51 = vld [vmem:[%s7260_s1 + $0x2e0] ss:$8 sps:$4 sm:$0xff]  }
  0x6f   :  { %1918 = vmatpush1.bf16.msra.mxu1 %v4950_v11  ;;  %2511 = vmatpush1.bf16.msra.mxu0 %v4953_v54  ;;  %v5007_v11 = vld [vmem:[%s7260_s1 + $0x3a0] ss:$8 sps:$4 sm:$0xff]   ;;  %v5012_v54 = vld [vmem:[%s7260_s1 + $0x2f4] ss:$8 sps:$4 sm:$0xff]  }
  0x70   :  { %1919 = vmatprep.subr.bf16.mxu1 %v4958_v55  ;;  %2512 = vmatprep.subr.bf16.mxu0 %v4961_v58  ;;  %v5015_v55 = vld [vmem:[%s7260_s1 + $0x3b4] ss:$8 sps:$4 sm:$0xff]   ;;  %v5010_v58 = vld [vmem:[%s7260_s1 + $0x2f0] ss:$8 sps:$4 sm:$0xff]  }
  0x72   :  { %772 = vmatmul.mubr.bf16.gmra.mrb[32].mxu1 %v5281_v39  ;;  %1365 = vmatmul.mubr.bf16.gmra.mrb[32].mxu0 %v5281_v39 }
  0x73   :  { %4448 = vmatprep.mubr.msk.bf16.mxu1 %vm316_vm0, %v5305_v45  ;;  %4510 = vmatprep.mubr.msk.bf16.mxu0 %vm316_vm0, %v5305_v45 }
  0x74   :  { %1920 = vmatpush1.bf16.msra.mxu1 %v4956_v59  ;;  %2513 = vmatpush1.bf16.msra.mxu0 %v4959_v60  ;;  %v5013_v59 = vld [vmem:[%s7260_s1 + $0x3b0] ss:$8 sps:$4 sm:$0xff]   ;;  %v5018_v60 = vld [vmem:[%s7260_s1 + $0x3c4] ss:$8 sps:$4 sm:$0xff]  }
  0x75   :  { %1921 = vmatprep.subr.bf16.mxu1 %v4964_v61  ;;  %2514 = vmatprep.subr.bf16.mxu0 %v4967_v62  ;;  %v5021_v61 = vld [vmem:[%s7260_s1 + $0x484] ss:$8 sps:$4 sm:$0xff]  }
  0x76   :  { %v5033_v62 = vld [vmem:[%s7260_s1 + $0x4a4] ss:$8 sps:$4 sm:$0xff]  }
  0x78   :  { %1922 = vmatpush1.bf16.msra.mxu1 %v4962_v0  ;;  %2515 = vmatpush1.bf16.msra.mxu0 %v4965_v2  ;;  %v5028_v0 = vld [vmem:[%s7260_s1 + $0x3e0] ss:$8 sps:$4 sm:$0xff]   ;;  %v5036_v2 = vld [vmem:[%s7260_s1 + $0x3f4] ss:$8 sps:$4 sm:$0xff]  }
  0x79   :  { %1923 = vmatprep.subr.bf16.mxu1 %v4970_v3  ;;  %2516 = vmatprep.subr.bf16.mxu0 %v4973_v6  ;;  %v5039_v3 = vld [vmem:[%s7260_s1 + $0x4b4] ss:$8 sps:$4 sm:$0xff]   ;;  %v5034_v6 = vld [vmem:[%s7260_s1 + $0x3f0] ss:$8 sps:$4 sm:$0xff]  }
  0x7a   :  { %782 = vmatmul.mubr.bf16.gmra.mrb[36].mxu1 %v5336_v52  ;;  %1375 = vmatmul.mubr.bf16.gmra.mrb[36].mxu0 %v5336_v52 }
  0x7b   :  { %4449 = vmatprep.mubr.msk.bf16.mxu1 %vm316_vm0, %v5352_v56  ;;  %4511 = vmatprep.mubr.msk.bf16.mxu0 %vm316_vm0, %v5352_v56 }
  0x7c   :  { %1924 = vmatpush1.bf16.msra.mxu1 %v4968_v7  ;;  %2517 = vmatpush1.bf16.msra.mxu0 %v4971_v8  ;;  %v5037_v7 = vld [vmem:[%s7260_s1 + $0x4b0] ss:$8 sps:$4 sm:$0xff]   ;;  %v5040_v8 = vld [vmem:[%s7260_s1 + $0x400] ss:$8 sps:$4 sm:$0xff]  }
  0x7d   :  { %1925 = vmatprep.subr.bf16.mxu1 %v4976_v9  ;;  %2518 = vmatprep.subr.bf16.mxu0 %v4979_v14  ;;  %v5043_v9 = vld [vmem:[%s7260_s1 + $0x4c0] ss:$8 sps:$4 sm:$0xff]   ;;  %v5048_v14 = vld [vmem:[%s7260_s1 + $0x414] ss:$8 sps:$4 sm:$0xff]  }
  0x80   :  { %1926 = vmatpush1.bf16.msra.mxu1 %v4974_v15  ;;  %2519 = vmatpush1.bf16.msra.mxu0 %v4977_v16  ;;  %v5051_v15 = vld [vmem:[%s7260_s1 + $0x4d4] ss:$8 sps:$4 sm:$0xff]   ;;  %v5046_v16 = vld [vmem:[%s7260_s1 + $0x410] ss:$8 sps:$4 sm:$0xff]  }
  0x81   :  { %1927 = vmatprep.subr.bf16.mxu1 %v4982_v19  ;;  %2520 = vmatprep.subr.bf16.mxu0 %v4985_v20  ;;  %v5049_v19 = vld [vmem:[%s7260_s1 + $0x4d0] ss:$8 sps:$4 sm:$0xff]   ;;  %v5052_v20 = vld [vmem:[%s7260_s1 + $0x420] ss:$8 sps:$4 sm:$0xff]  }
  0x82   :  { %792 = vmatmul.mubr.bf16.gmra.mrb[40].mxu1 %v5383_v63  ;;  %1385 = vmatmul.mubr.bf16.gmra.mrb[40].mxu0 %v5383_v63 }
  0x83   :  { %4450 = vmatprep.mubr.msk.bf16.mxu1 %vm316_vm0, %v5402_v4  ;;  %4512 = vmatprep.mubr.msk.bf16.mxu0 %vm316_vm0, %v5402_v4 }
  0x84   :  { %1928 = vmatpush1.bf16.msra.mxu1 %v4980_v21  ;;  %2521 = vmatpush1.bf16.msra.mxu0 %v4983_v22  ;;  %v5055_v21 = vld [vmem:[%s7260_s1 + $0x4e0] ss:$8 sps:$4 sm:$0xff]   ;;  %v5060_v22 = vld [vmem:[%s7260_s1 + $0x434] ss:$8 sps:$4 sm:$0xff]  }
  0x85   :  { %1929 = vmatprep.subr.bf16.mxu1 %v4988_v23  ;;  %2522 = vmatprep.subr.bf16.mxu0 %v4991_v26  ;;  %v5063_v23 = vld [vmem:[%s7260_s1 + $0x4f4] ss:$8 sps:$4 sm:$0xff]   ;;  %v5058_v26 = vld [vmem:[%s7260_s1 + $0x430] ss:$8 sps:$4 sm:$0xff]  }
  0x88   :  { %1930 = vmatpush1.bf16.msra.mxu1 %v4986_v28  ;;  %2523 = vmatpush1.bf16.msra.mxu0 %v4989_v32  ;;  %v5061_v28 = vld [vmem:[%s7260_s1 + $0x4f0] ss:$8 sps:$4 sm:$0xff]   ;;  %v5064_v32 = vld [vmem:[%s7260_s1 + $0x440] ss:$8 sps:$4 sm:$0xff]  }
  0x89   :  { %1931 = vmatprep.subr.bf16.mxu1 %v4994_v35  ;;  %2524 = vmatprep.subr.bf16.mxu0 %v4997_v36  ;;  %v5067_v35 = vld [vmem:[%s7260_s1 + $0x500] ss:$8 sps:$4 sm:$0xff]   ;;  %v5072_v36 = vld [vmem:[%s7260_s1 + $0x454] ss:$8 sps:$4 sm:$0xff]  }
  0x8a   :  { %802 = vmatmul.mubr.bf16.gmra.mrb[44].mxu1 %v5430_v10  ;;  %1395 = vmatmul.mubr.bf16.gmra.mrb[44].mxu0 %v5430_v10 }
  0x8b   :  { %4451 = vmatprep.mubr.msk.bf16.mxu1 %vm316_vm0, %v5449_v17  ;;  %4513 = vmatprep.mubr.msk.bf16.mxu0 %vm316_vm0, %v5449_v17 }
  0x8c   :  { %1932 = vmatpush1.bf16.msra.mxu1 %v4992_v37  ;;  %2525 = vmatpush1.bf16.msra.mxu0 %v4995_v38  ;;  %v5075_v37 = vld [vmem:[%s7260_s1 + $0x514] ss:$8 sps:$4 sm:$0xff]   ;;  %v5070_v38 = vld [vmem:[%s7260_s1 + $0x450] ss:$8 sps:$4 sm:$0xff]  }
  0x8d   :  { %1933 = vmatprep.subr.bf16.mxu1 %v5000_v40  ;;  %2526 = vmatprep.subr.bf16.mxu0 %v5003_v42  ;;  %v5073_v40 = vld [vmem:[%s7260_s1 + $0x510] ss:$8 sps:$4 sm:$0xff]   ;;  %v5076_v42 = vld [vmem:[%s7260_s1 + $0x460] ss:$8 sps:$4 sm:$0xff]  }
  0x90   :  { %1934 = vmatpush1.bf16.msra.mxu1 %v4998_v43  ;;  %2527 = vmatpush1.bf16.msra.mxu0 %v5001_v48  ;;  %v5079_v43 = vld [vmem:[%s7260_s1 + $0x520] ss:$8 sps:$4 sm:$0xff]   ;;  %v5084_v48 = vld [vmem:[%s7260_s1 + $0x474] ss:$8 sps:$4 sm:$0xff]  }
  0x91   :  { %1935 = vmatprep.subr.bf16.mxu1 %v5006_v49  ;;  %2528 = vmatprep.subr.bf16.mxu0 %v5009_v50  ;;  %v5087_v49 = vld [vmem:[%s7260_s1 + $0x534] ss:$8 sps:$4 sm:$0xff]   ;;  %v5082_v50 = vld [vmem:[%s7260_s1 + $0x470] ss:$8 sps:$4 sm:$0xff]  }
  0x92   :  { %812 = vmatmul.mubr.bf16.gmra.mrb[48].mxu1 %v5480_v24  ;;  %1405 = vmatmul.mubr.bf16.gmra.mrb[48].mxu0 %v5480_v24 }
  0x93   :  { %4452 = vmatprep.mubr.msk.bf16.mxu1 %vm316_vm0, %v5496_v30  ;;  %4514 = vmatprep.mubr.msk.bf16.mxu0 %vm316_vm0, %v5496_v30 }
  0x94   :  { %1936 = vmatpush1.bf16.msra.mxu1 %v5004_v51  ;;  %2529 = vmatpush1.bf16.msra.mxu0 %v5007_v11  ;;  %v5085_v51 = vld [vmem:[%s7260_s1 + $0x530] ss:$8 sps:$4 sm:$0xff]  }
  0x95   :  { %1937 = vmatprep.subr.bf16.mxu1 %v5012_v54  ;;  %2530 = vmatprep.subr.bf16.mxu0 %v5015_v55 }
  0x98   :  { %1938 = vmatpush1.bf16.msra.mxu1 %v5010_v58  ;;  %2531 = vmatpush1.bf16.msra.mxu0 %v5013_v59 }
  0x99   :  { %3101 = vmatprep.subr.bf16.mxu1 %v5018_v60  ;;  %3694 = vmatprep.subr.bf16.mxu0 %v5021_v61  ;;  %v5977_v61 = vld [vmem:[%s7261_s0 + $0x74] ss:$8 sps:$4 sm:$0xff]  }
  0x9a   :  { %822 = vmatmul.mubr.bf16.gmra.mrb[52].mxu1 %v5536_v44  ;;  %1415 = vmatmul.mubr.bf16.gmra.mrb[52].mxu0 %v5536_v44 }
  0x9b   :  { %4453 = vmatprep.mubr.msk.bf16.mxu1 %vm316_vm0, %v5182_v12  ;;  %4515 = vmatprep.mubr.msk.bf16.mxu0 %vm316_vm0, %v5182_v12  ;;  %v5776_v12 = vld [vmem:[%s7261_s0 + $0x4] ss:$8 sps:$4 sm:$0xff]  }
  0xa2   :  { %832 = vmatmul.mubr.bf16.gmra.mrb[56].mxu1 %v5241_v29  ;;  %1425 = vmatmul.mubr.bf16.gmra.mrb[56].mxu0 %v5241_v29  ;;  %v5016_v29 = vld [vmem:[%s7260_s1 + $0x3c0] ss:$8 sps:$4 sm:$0xff]  }
  0xa3   :  { %4454 = vmatprep.mubr.msk.bf16.mxu1 %vm316_vm0, %v5260_v34  ;;  %4516 = vmatprep.mubr.msk.bf16.mxu0 %vm316_vm0, %v5260_v34  ;;  %v5019_v34 = vld [vmem:[%s7260_s1 + $0x480] ss:$8 sps:$4 sm:$0xff]  }
  0xaa   :  { %842 = vmatmul.mubr.bf16.gmra.mrb[60].mxu1 %v5291_v41  ;;  %1435 = vmatmul.mubr.bf16.gmra.mrb[60].mxu0 %v5291_v41  ;;  %v5024_v41 = vld [vmem:[%s7260_s1 + $0x3d4] ss:$8 sps:$4 sm:$0xff]  }
  0xab   :  { %4455 = vmatprep.mubr.msk.bf16.mxu1 %vm316_vm0, %v5310_v46  ;;  %4517 = vmatprep.mubr.msk.bf16.mxu0 %vm316_vm0, %v5310_v46  ;;  %v5027_v46 = vld [vmem:[%s7260_s1 + $0x494] ss:$8 sps:$4 sm:$0xff]  }
  0xb2   :  { %852 = vmatmul.mubr.bf16.gmra.mrb[64].mxu1 %v5341_v53  ;;  %1445 = vmatmul.mubr.bf16.gmra.mrb[64].mxu0 %v5341_v53  ;;  %v5022_v53 = vld [vmem:[%s7260_s1 + $0x3d0] ss:$8 sps:$4 sm:$0xff]  }
  0xb3   :  { %4456 = vmatprep.mubr.msk.bf16.mxu1 %vm316_vm0, %v5357_v57  ;;  %4518 = vmatprep.mubr.msk.bf16.mxu0 %vm316_vm0, %v5357_v57  ;;  %v5025_v57 = vld [vmem:[%s7260_s1 + $0x490] ss:$8 sps:$4 sm:$0xff]  }
  0xba   :  { %862 = vmatmul.mubr.bf16.gmra.mrb[68].mxu1 %v5391_v1  ;;  %1455 = vmatmul.mubr.bf16.gmra.mrb[68].mxu0 %v5391_v1 }
  0xbb   :  { %4457 = vmatprep.mubr.msk.bf16.mxu1 %vm316_vm0, %v5407_v5  ;;  %4519 = vmatprep.mubr.msk.bf16.mxu0 %vm316_vm0, %v5407_v5 }
  0xc2   :  { %872 = vmatmul.mubr.bf16.gmra.mrb[72].mxu1 %v5435_v13  ;;  %1465 = vmatmul.mubr.bf16.gmra.mrb[72].mxu0 %v5435_v13 }
  0xc3   :  { %4458 = vmatprep.mubr.msk.bf16.mxu1 %vm316_vm0, %v5454_v18  ;;  %4520 = vmatprep.mubr.msk.bf16.mxu0 %vm316_vm0, %v5454_v18 }
  0xca   :  { %882 = vmatmul.mubr.bf16.gmra.mrb[76].mxu1 %v5485_v25  ;;  %1475 = vmatmul.mubr.bf16.gmra.mrb[76].mxu0 %v5485_v25 }
  0xcb   :  { %4459 = vmatprep.mubr.msk.bf16.mxu1 %vm316_vm0, %v5501_v31  ;;  %4521 = vmatprep.mubr.msk.bf16.mxu0 %vm316_vm0, %v5501_v31 }
  0xd2   :  { %892 = vmatmul.mubr.bf16.gmra.mrb[80].mxu1 %v5541_v47  ;;  %1485 = vmatmul.mubr.bf16.gmra.mrb[80].mxu0 %v5541_v47 }
  0xd3   :  { %4570 = vmatprep.mubr.msk.bf16.mxu1 %vm316_vm0, %v5776_v12  ;;  %4632 = vmatprep.mubr.msk.bf16.mxu0 %vm316_vm0, %v5776_v12 }
  0xda   :  { %1948 = vmatmul.mubr.bf16.vlgmr.msra.gmra.mrb[84].mxu1 %v5233_v27  ;;  %2541 = vmatmul.mubr.bf16.vlgmr.msra.gmra.mrb[84].mxu0 %v5233_v27  ;;  %v5030_v27 = vld [vmem:[%s7260_s1 + $0x3e4] ss:$8 sps:$4 sm:$0xff]  }
  0xdb   :  { %3102 = vmatpush1.bf16.msra.mxu1 %v5016_v29  ;;  %3695 = vmatpush1.bf16.msra.mxu0 %v5019_v34 }
  0xdc   :  { %4571 = vmatprep.mubr.msk.bf16.mxu1 %vm316_vm0, %v5255_v33  ;;  %4633 = vmatprep.mubr.msk.bf16.mxu0 %vm316_vm0, %v5255_v33  ;;  %v5031_v33 = vld [vmem:[%s7260_s1 + $0x4a0] ss:$8 sps:$4 sm:$0xff]  }
  0xdd   :  { %3103 = vmatprep.subr.bf16.mxu1 %v5024_v41  ;;  %3696 = vmatprep.subr.bf16.mxu0 %v5027_v46 }
  0xdf   :  { %3104 = vmatpush1.bf16.msra.mxu1 %v5022_v53  ;;  %3697 = vmatpush1.bf16.msra.mxu0 %v5025_v57 }
  0xe0   :  { %3105 = vmatprep.subr.bf16.mxu1 %v5030_v27  ;;  %3698 = vmatprep.subr.bf16.mxu0 %v5033_v62  ;;  %v6002_v62 = vld [vmem:[%s7261_s0 + $0x70] ss:$8 sps:$4 sm:$0xff]  }
  0xe2   :  { %1958 = vmatmul.mubr.bf16.gmra.mrb[88].mxu1 %v5281_v39  ;;  %2551 = vmatmul.mubr.bf16.gmra.mrb[88].mxu0 %v5281_v39  ;;  %v5042_v39 = vld [vmem:[%s7260_s1 + $0x404] ss:$8 sps:$4 sm:$0xff]  }
  0xe3   :  { %4572 = vmatprep.mubr.msk.bf16.mxu1 %vm316_vm0, %v5305_v45  ;;  %4634 = vmatprep.mubr.msk.bf16.mxu0 %vm316_vm0, %v5305_v45  ;;  %v5045_v45 = vld [vmem:[%s7260_s1 + $0x4c4] ss:$8 sps:$4 sm:$0xff]  }
  0xe4   :  { %3106 = vmatpush1.bf16.msra.mxu1 %v5028_v0  ;;  %3699 = vmatpush1.bf16.msra.mxu0 %v5031_v33  ;;  %v6009_v0 = vld [vmem:[%s7261_s0 + $0x84] ss:$8 sps:$4 sm:$0xff]  }
  0xe5   :  { %3107 = vmatprep.subr.bf16.mxu1 %v5036_v2  ;;  %3700 = vmatprep.subr.bf16.mxu0 %v5039_v3 }
  0xe8   :  { %3108 = vmatpush1.bf16.msra.mxu1 %v5034_v6  ;;  %3701 = vmatpush1.bf16.msra.mxu0 %v5037_v7 }
  0xe9   :  { %3109 = vmatprep.subr.bf16.mxu1 %v5042_v39  ;;  %3702 = vmatprep.subr.bf16.mxu0 %v5045_v45 }
  0xea   :  { %1968 = vmatmul.mubr.bf16.gmra.mrb[92].mxu1 %v5336_v52  ;;  %2561 = vmatmul.mubr.bf16.gmra.mrb[92].mxu0 %v5336_v52  ;;  %v5054_v52 = vld [vmem:[%s7260_s1 + $0x424] ss:$8 sps:$4 sm:$0xff]  }
  0xeb   :  { %4573 = vmatprep.mubr.msk.bf16.mxu1 %vm316_vm0, %v5352_v56  ;;  %4635 = vmatprep.mubr.msk.bf16.mxu0 %vm316_vm0, %v5352_v56  ;;  %v5057_v56 = vld [vmem:[%s7260_s1 + $0x4e4] ss:$8 sps:$4 sm:$0xff]  }
  0xec   :  { %3110 = vmatpush1.bf16.msra.mxu1 %v5040_v8  ;;  %3703 = vmatpush1.bf16.msra.mxu0 %v5043_v9  ;;  %v6034_v9 = vld [vmem:[%s7261_s0 + $0x80] ss:$8 sps:$4 sm:$0xff]  }
  0xed   :  { %3111 = vmatprep.subr.bf16.mxu1 %v5048_v14  ;;  %3704 = vmatprep.subr.bf16.mxu0 %v5051_v15  ;;  %v6041_v14 = vld [vmem:[%s7261_s0 + $0x94] ss:$8 sps:$4 sm:$0xff]  }
  0xee   :  { %7274 = vst [vmem:[#allocation5_spill] sm:$0xff] %v6041_v14 }
  0xf0   :  { %3112 = vmatpush1.bf16.msra.mxu1 %v5046_v16  ;;  %3705 = vmatpush1.bf16.msra.mxu0 %v5049_v19 }
  0xf1   :  { %3113 = vmatprep.subr.bf16.mxu1 %v5054_v52  ;;  %3706 = vmatprep.subr.bf16.mxu0 %v5057_v56 }
  0xf2   :  { %1978 = vmatmul.mubr.bf16.gmra.mrb[96].mxu1 %v5383_v63  ;;  %2571 = vmatmul.mubr.bf16.gmra.mrb[96].mxu0 %v5383_v63  ;;  %v5066_v63 = vld [vmem:[%s7260_s1 + $0x444] ss:$8 sps:$4 sm:$0xff]  }
  0xf3   :  { %4574 = vmatprep.mubr.msk.bf16.mxu1 %vm316_vm0, %v5402_v4  ;;  %4636 = vmatprep.mubr.msk.bf16.mxu0 %vm316_vm0, %v5402_v4  ;;  %v5069_v4 = vld [vmem:[%s7260_s1 + $0x504] ss:$8 sps:$4 sm:$0xff]  }
  0xf4   :  { %3114 = vmatpush1.bf16.msra.mxu1 %v5052_v20  ;;  %3707 = vmatpush1.bf16.msra.mxu0 %v5055_v21 }
  0xf5   :  { %3115 = vmatprep.subr.bf16.mxu1 %v5060_v22  ;;  %3708 = vmatprep.subr.bf16.mxu0 %v5063_v23  ;;  %v6066_v23 = vld [vmem:[%s7261_s0 + $0x90] ss:$8 sps:$4 sm:$0xff]  }
  0xf6   :  { %7279 = vst [vmem:[#allocation10_spill] sm:$0xff] %v6066_v23 }
  0xf8   :  { %3116 = vmatpush1.bf16.msra.mxu1 %v5058_v26  ;;  %3709 = vmatpush1.bf16.msra.mxu0 %v5061_v28  ;;  %v6073_v26 = vld [vmem:[%s7261_s0 + $0xa4] ss:$8 sps:$4 sm:$0xff]  }
  0xf9   :  { %3117 = vmatprep.subr.bf16.mxu1 %v5066_v63  ;;  %3710 = vmatprep.subr.bf16.mxu0 %v5069_v4  ;;  %7280 = vst [vmem:[#allocation11_spill] sm:$0xff] %v6073_v26 }
  0xfa   :  { %1988 = vmatmul.mubr.bf16.gmra.mrb[100].mxu1 %v5430_v10  ;;  %2581 = vmatmul.mubr.bf16.gmra.mrb[100].mxu0 %v5430_v10  ;;  %v5078_v10 = vld [vmem:[%s7260_s1 + $0x464] ss:$8 sps:$4 sm:$0xff]  }
  0xfb   :  { %4575 = vmatprep.mubr.msk.bf16.mxu1 %vm316_vm0, %v5449_v17  ;;  %4637 = vmatprep.mubr.msk.bf16.mxu0 %vm316_vm0, %v5449_v17  ;;  %v5081_v17 = vld [vmem:[%s7260_s1 + $0x524] ss:$8 sps:$4 sm:$0xff]  }
  0xfc   :  { %3118 = vmatpush1.bf16.msra.mxu1 %v5064_v32  ;;  %3711 = vmatpush1.bf16.msra.mxu0 %v5067_v35 }
  0xfd   :  { %3119 = vmatprep.subr.bf16.mxu1 %v5072_v36  ;;  %3712 = vmatprep.subr.bf16.mxu0 %v5075_v37 }
 0x100   :  { %3120 = vmatpush1.bf16.msra.mxu1 %v5070_v38  ;;  %3713 = vmatpush1.bf16.msra.mxu0 %v5073_v40 }
 0x101   :  { %3121 = vmatprep.subr.bf16.mxu1 %v5078_v10  ;;  %3714 = vmatprep.subr.bf16.mxu0 %v5081_v17 }
 0x102   :  { %1998 = vmatmul.mubr.bf16.gmra.mrb[104].mxu1 %v5480_v24  ;;  %2591 = vmatmul.mubr.bf16.gmra.mrb[104].mxu0 %v5480_v24 }
 0x103   :  { %4576 = vmatprep.mubr.msk.bf16.mxu1 %vm316_vm0, %v5496_v30  ;;  %4638 = vmatprep.mubr.msk.bf16.mxu0 %vm316_vm0, %v5496_v30 }
 0x104   :  { %3122 = vmatpush1.bf16.msra.mxu1 %v5076_v42  ;;  %3715 = vmatpush1.bf16.msra.mxu0 %v5079_v43 }
 0x105   :  { %v5956_v11 = vpop.f32.mrb[0].mxu0  ;;  %v5958_v54 = vpop.f32.mrb[0].mxu1  ;;  %3123 = vmatprep.subr.bf16.mxu1 %v5084_v48  ;;  %3716 = vmatprep.subr.bf16.mxu0 %v5087_v49 }
 0x106   :  { %v5960_v24 = vpop.f32.mrb[1].mxu0  ;;  %v5962_v55 = vpop.f32.mrb[1].mxu1 }
 0x107   :  { %v5964_v30 = vpop.f32.mrb[2].mxu0  ;;  %v5966_v58 = vpop.f32.mrb[2].mxu1 }
 0x108   :  { %v5968_v59 = vpop.f32.mrb[3].mxu0  ;;  %v5970_v60 = vpop.f32.mrb[3].mxu1  ;;  %3124 = vmatpush1.bf16.msra.mxu1 %v5082_v50  ;;  %3717 = vmatpush1.bf16.msra.mxu0 %v5085_v51 }
 0x10a   :  { %2008 = vmatmul.mubr.bf16.gmra.mrb[108].mxu1 %v5536_v44  ;;  %2601 = vmatmul.mubr.bf16.gmra.mrb[108].mxu0 %v5536_v44 }
 0x10b   :  { %4577 = vmatprep.mubr.msk.bf16.mxu1 %vm316_vm0, %v5977_v61  ;;  %4639 = vmatprep.mubr.msk.bf16.mxu0 %vm316_vm0, %v5977_v61 }
 0x10d   :  { %v5983_v29 = vpop.f32.mrb[4].mxu0  ;;  %v5985_v34 = vpop.f32.mrb[4].mxu1 }
 0x10e   :  { %v5987_v41 = vpop.f32.mrb[5].mxu0  ;;  %v5989_v46 = vpop.f32.mrb[5].mxu1 }
 0x10f   :  { %v5991_v44 = vpop.f32.mrb[6].mxu0  ;;  %v5993_v53 = vpop.f32.mrb[6].mxu1 }
 0x110   :  { %v5995_v57 = vpop.f32.mrb[7].mxu0  ;;  %v5997_v27 = vpop.f32.mrb[7].mxu1 }
 0x112   :  { %2018 = vmatmul.mubr.bf16.gmra.mrb[112].mxu1 %v6002_v62  ;;  %2611 = vmatmul.mubr.bf16.gmra.mrb[112].mxu0 %v6002_v62 }
 0x113   :  { %4578 = vmatprep.mubr.msk.bf16.mxu1 %vm316_vm0, %v6009_v0  ;;  %4640 = vmatprep.mubr.msk.bf16.mxu0 %vm316_vm0, %v6009_v0 }
 0x115   :  { %v6015_v33 = vpop.f32.mrb[8].mxu0  ;;  %v6017_v2 = vpop.f32.mrb[8].mxu1 }
 0x116   :  { %v6019_v3 = vpop.f32.mrb[9].mxu0  ;;  %v6021_v6 = vpop.f32.mrb[9].mxu1 }
 0x117   :  { %7271 = vst [vmem:[#allocation2_spill] sm:$0xff] %v6021_v6  ;;  %v6023_v7 = vpop.f32.mrb[10].mxu0  ;;  %v6025_v39 = vpop.f32.mrb[10].mxu1 }
 0x118   :  { %7272 = vst [vmem:[#allocation3_spill] sm:$0xff] %v6025_v39  ;;  %v6027_v45 = vpop.f32.mrb[11].mxu0  ;;  %v6029_v8 = vpop.f32.mrb[11].mxu1 }
 0x119   :  { %7273 = vst [vmem:[#allocation4_spill] sm:$0xff] %v6029_v8 }
 0x11a   :  { %2028 = vmatmul.mubr.bf16.gmra.mrb[116].mxu1 %v6034_v9  ;;  %2621 = vmatmul.mubr.bf16.gmra.mrb[116].mxu0 %v6034_v9 }
 0x11b   :  { %4579 = vmatprep.mubr.msk.bf16.mxu1 %vm316_vm0, %v6041_v14  ;;  %4641 = vmatprep.mubr.msk.bf16.mxu0 %vm316_vm0, %v6041_v14 }
 0x11d   :  { %v6047_v15 = vpop.f32.mrb[12].mxu0  ;;  %v6049_v16 = vpop.f32.mrb[12].mxu1 }
 0x11e   :  { %7275 = vst [vmem:[#allocation6_spill] sm:$0xff] %v6049_v16  ;;  %v6051_v19 = vpop.f32.mrb[13].mxu0  ;;  %v6053_v52 = vpop.f32.mrb[13].mxu1 }
 0x11f   :  { %7276 = vst [vmem:[#allocation7_spill] sm:$0xff] %v6053_v52  ;;  %v6055_v56 = vpop.f32.mrb[14].mxu0  ;;  %v6057_v20 = vpop.f32.mrb[14].mxu1 }
 0x120   :  { %7277 = vst [vmem:[#allocation8_spill] sm:$0xff] %v6057_v20  ;;  %v6059_v21 = vpop.f32.mrb[15].mxu0  ;;  %v6061_v22 = vpop.f32.mrb[15].mxu1 }
 0x121   :  { %7278 = vst [vmem:[#allocation9_spill] sm:$0xff] %v6061_v22 }
 0x122   :  { %2038 = vmatmul.mubr.bf16.gmra.mrb[120].mxu1 %v6066_v23  ;;  %2631 = vmatmul.mubr.bf16.gmra.mrb[120].mxu0 %v6066_v23 }
 0x123   :  { %4580 = vmatprep.mubr.msk.bf16.mxu1 %vm316_vm0, %v6073_v26  ;;  %4642 = vmatprep.mubr.msk.bf16.mxu0 %vm316_vm0, %v6073_v26 }
 0x125   :  { %v6079_v28 = vpop.f32.mrb[16].mxu0  ;;  %v6081_v63 = vpop.f32.mrb[16].mxu1 }
 0x126   :  { %7281 = vst [vmem:[#allocation12_spill] sm:$0xff] %v6081_v63  ;;  %v6083_v4 = vpop.f32.mrb[17].mxu0  ;;  %v6085_v32 = vpop.f32.mrb[17].mxu1 }
 0x127   :  { %7282 = vst [vmem:[#allocation13_spill] sm:$0xff] %v6085_v32  ;;  %v6087_v35 = vpop.f32.mrb[18].mxu0  ;;  %v6089_v36 = vpop.f32.mrb[18].mxu1 }
 0x128   :  { %7283 = vst [vmem:[#allocation14_spill] sm:$0xff] %v6089_v36  ;;  %v6091_v37 = vpop.f32.mrb[19].mxu0  ;;  %v6093_v38 = vpop.f32.mrb[19].mxu1 }
 0x129   :  { %7284 = vst [vmem:[#allocation15_spill] sm:$0xff] %v6093_v38 }
 0x12a   :  { %2048 = vmatmul.mubr.bf16.gmra.mrb[124].mxu1 %v5391_v1  ;;  %2641 = vmatmul.mubr.bf16.gmra.mrb[124].mxu0 %v5391_v1 }
 0x12b   :  { %4581 = vmatprep.mubr.msk.bf16.mxu1 %vm316_vm0, %v5407_v5  ;;  %4643 = vmatprep.mubr.msk.bf16.mxu0 %vm316_vm0, %v5407_v5 }
 0x12d   :  { %v6101_v40 = vpop.f32.mrb[20].mxu0  ;;  %v6103_v10 = vpop.f32.mrb[20].mxu1 }
 0x12e   :  { %7285 = vst [vmem:[#allocation16_spill] sm:$0xff] %v6103_v10  ;;  %v6105_v17 = vpop.f32.mrb[21].mxu0  ;;  %v6107_v42 = vpop.f32.mrb[21].mxu1 }
 0x12f   :  { %7286 = vst [vmem:[#allocation17_spill] sm:$0xff] %v6107_v42  ;;  %v6109_v43 = vpop.f32.mrb[22].mxu0  ;;  %v6111_v48 = vpop.f32.mrb[22].mxu1 }
 0x130   :  { %7287 = vst [vmem:[#allocation18_spill] sm:$0xff] %v6111_v48  ;;  %v6113_v49 = vpop.f32.mrb[23].mxu0  ;;  %v6115_v1 = vpop.f32.mrb[23].mxu1 }
 0x131   :  { %7288 = vst [vmem:[#allocation19_spill] sm:$0xff] %v6115_v1 }
 0x132   :  { %2058 = vmatmul.mubr.bf16.gmra.mrb[128].mxu1 %v5435_v13  ;;  %2651 = vmatmul.mubr.bf16.gmra.mrb[128].mxu0 %v5435_v13 }
 0x133   :  { %4582 = vmatprep.mubr.msk.bf16.mxu1 %vm316_vm0, %v5454_v18  ;;  %4644 = vmatprep.mubr.msk.bf16.mxu0 %vm316_vm0, %v5454_v18 }
 0x135   :  { %v6123_v5 = vpop.f32.mrb[24].mxu0  ;;  %v6125_v50 = vpop.f32.mrb[24].mxu1 }
 0x136   :  { %7289 = vst [vmem:[#allocation20_spill] sm:$0xff] %v6125_v50  ;;  %v6127_v51 = vpop.f32.mrb[25].mxu0  ;;  %v6129_v48 = vpop.f32.mrb[25].mxu1 }
 0x137   :  { %7290 = vst [vmem:[#allocation21_spill] sm:$0xff] %v6129_v48  ;;  %v6131_v42 = vpop.f32.mrb[26].mxu0  ;;  %v527_v1 = vpop.f32.mrb[26].mxu1 }
 0x138   :  { %v6133_v10 = vpop.f32.mrb[27].mxu0  ;;  %v528_v13 = vpop.f32.mrb[27].mxu1 }
 0x13a   :  { %2068 = vmatmul.mubr.bf16.gmra.mrb[132].mxu1 %v5485_v25  ;;  %2661 = vmatmul.mubr.bf16.gmra.mrb[132].mxu0 %v5485_v25 }
 0x13b   :  { %4583 = vmatprep.mubr.msk.bf16.mxu1 %vm316_vm0, %v5501_v31  ;;  %4645 = vmatprep.mubr.msk.bf16.mxu0 %vm316_vm0, %v5501_v31 }
 0x13d   :  { %v763_v18 = vpop.f32.mrb[28].mxu1  ;;  %v1356_v50 = vpop.f32.mrb[28].mxu0 }
 0x13e   :  { %v1552_v38 = vrot.slane %v1356_v50, 2  ;;  %v765_v48 = vpop.f32.mrb[29].mxu1  ;;  %v1358_v36 = vpop.f32.mrb[29].mxu0  ;;  %v959_v13 = vrot.slane %v763_v18, 1 }
 0x13f   :  { %v1555_v32 = vrot.slane %v1358_v36, 2  ;;  %v767_v1 = vpop.f32.mrb[30].mxu1  ;;  %v1360_v63 = vpop.f32.mrb[30].mxu0  ;;  %v962_v26 = vrot.slane %v765_v48, 1 }
 0x140   :  { %v960_v22 = vrot.slane %v767_v1, 1  ;;  %v1553_v20 = vrot.slane %v1360_v63, 2  ;;  %v769_v25 = vpop.f32.mrb[31].mxu1  ;;  %v1362_v52 = vpop.f32.mrb[31].mxu0 }
 0x141   :  { %v963_v16 = vrot.slane %v769_v25, 1  ;;  %v1556_v23 = vrot.slane %v1362_v52, 2 }
 0x142   :  { %v961_v31 = vsel %vm958_vm1, %v959_v13, %v960_v22  ;;  %v1554_v8 = vsel %vm1551_vm2, %v1552_v38, %v1553_v20  ;;  %2078 = vmatmul.mubr.bf16.gmra.mrb[136].mxu1 %v5541_v47  ;;  %2671 = vmatmul.mubr.bf16.gmra.mrb[136].mxu0 %v5541_v47 }
 0x143   :  { %v1123_v36 = vadd.f32 %v961_v31, %v5956_v11  ;;  %v964_v50 = vsel %vm958_vm1, %v962_v26, %v963_v16  ;;  %v1557_v18 = vsel %vm1551_vm2, %v1555_v32, %v1556_v23  ;;  %4694 = vmatprep.mubr.msk.bf16.mxu1 %vm316_vm0, %v5776_v12  ;;  %4756 = vmatprep.mubr.msk.bf16.mxu0 %vm316_vm0, %v5776_v12 }
 0x144   :  { %v1124_v52 = vadd.f32 %v964_v50, %v5960_v24 }
 0x145   :  { %v6153_v63 = vadd.f32 %v1554_v8, %v1123_v36  ;;  %v773_v38 = vpop.f32.mrb[32].mxu1  ;;  %v1366_v48 = vpop.f32.mrb[32].mxu0 }
 0x146   :  { %v6155_v1 = vadd.f32 %v1557_v18, %v1124_v52  ;;  %v965_v47 = vrot.slane %v773_v38, 1  ;;  %v1558_v11 = vrot.slane %v1366_v48, 2  ;;  %v775_v13 = vpop.f32.mrb[33].mxu1  ;;  %v1368_v26 = vpop.f32.mrb[33].mxu0 }
 0x147   :  { %v967_v25 = vrot.slane %v775_v13, 1  ;;  %v1560_v32 = vrot.slane %v1368_v26, 2  ;;  %v777_v31 = vpop.f32.mrb[34].mxu1  ;;  %v1370_v39 = vpop.f32.mrb[34].mxu0 }
 0x148   :  { %v966_v6 = vsel %vm958_vm1, %v960_v22, %v965_v47  ;;  %v1559_v12 = vsel %vm1551_vm2, %v1553_v20, %v1558_v11  ;;  %v969_v14 = vrot.slane %v777_v31, 1  ;;  %v1562_v24 = vrot.slane %v1370_v39, 2  ;;  %v779_v8 = vpop.f32.mrb[35].mxu1  ;;  %v1372_v36 = vpop.f32.mrb[35].mxu0  ;;  %v5096_v39 = vld [vmem:[%s7261_s0] ss:$8 sps:$4 sm:$0xff]  }
 0x149   :  { %v1125_v50 = vadd.f32 %v966_v6, %v5964_v30  ;;  %v968_v18 = vsel %vm958_vm1, %v963_v16, %v967_v25  ;;  %v1561_v52 = vsel %vm1551_vm2, %v1556_v23, %v1560_v32  ;;  %v971_v38 = vrot.slane %v779_v8, 1 }
 0x14a   :  { %v1126_v48 = vadd.f32 %v968_v18, %v5968_v59  ;;  %v970_v13 = vsel %vm958_vm1, %v965_v47, %v969_v14  ;;  %v1563_v26 = vsel %vm1551_vm2, %v1558_v11, %v1562_v24  ;;  %v1564_v22 = vrot.slane %v1372_v36, 2  ;;  %3134 = vmatmul.mubr.bf16.vlgmr.msra.gmra.mrb[140].mxu1 %v5096_v39  ;;  %3727 = vmatmul.mubr.bf16.vlgmr.msra.gmra.mrb[140].mxu0 %v5096_v39  ;;  %v5097_v59 = vld [vmem:[%s7261_s0 + $0x14] ss:$8 sps:$4 sm:$0xff]  }
 0x14b   :  { %v6168_v20 = vadd.f32 %v1559_v12, %v1125_v50  ;;  %v1127_v30 = vadd.f32 %v970_v13, %v5983_v29  ;;  %v972_v6 = vsel %vm958_vm1, %v967_v25, %v971_v38  ;;  %4695 = vmatprep.mubr.msk.bf16.mxu1 %vm316_vm0, %v5097_v59  ;;  %4757 = vmatprep.mubr.msk.bf16.mxu0 %vm316_vm0, %v5097_v59 }
 0x14c   :  { %v6177_v16 = vadd.f32 %v1561_v52, %v1126_v48  ;;  %v1128_v23 = vadd.f32 %v972_v6, %v5987_v41  ;;  %v1565_v47 = vsel %vm1551_vm2, %v1560_v32, %v1564_v22 }
 0x14d   :  { %v6181_v11 = vadd.f32 %v1563_v26, %v1127_v30  ;;  %v783_v31 = vpop.f32.mrb[36].mxu1  ;;  %v1376_v29 = vpop.f32.mrb[36].mxu0 }
 0x14e   :  { %v6183_v12 = vadd.f32 %v1565_v47, %v1128_v23  ;;  %v973_v25 = vrot.slane %v783_v31, 1  ;;  %v1566_v8 = vrot.slane %v1376_v29, 2  ;;  %v785_v36 = vpop.f32.mrb[37].mxu1  ;;  %v1378_v50 = vpop.f32.mrb[37].mxu0 }
 0x14f   :  { %v975_v18 = vrot.slane %v785_v36, 1  ;;  %v1568_v13 = vrot.slane %v1378_v50, 2  ;;  %v787_v39 = vpop.f32.mrb[38].mxu1  ;;  %v1380_v59 = vpop.f32.mrb[38].mxu0 }
 0x150   :  { %v974_v52 = vsel %vm958_vm1, %v969_v14, %v973_v25  ;;  %v1567_v41 = vsel %vm1551_vm2, %v1562_v24, %v1566_v8  ;;  %v977_v48 = vrot.slane %v787_v39, 1  ;;  %v1570_v32 = vrot.slane %v1380_v59, 2  ;;  %v789_v26 = vpop.f32.mrb[39].mxu1  ;;  %v1382_v30 = vpop.f32.mrb[39].mxu0  ;;  %v5098_v24 = vld [vmem:[%s7261_s0 + $0x10] ss:$8 sps:$4 sm:$0xff]  }
 0x151   :  { %v1129_v6 = vadd.f32 %v974_v52, %v5991_v44  ;;  %v976_v23 = vsel %vm958_vm1, %v971_v38, %v975_v18  ;;  %v1569_v47 = vsel %vm1551_vm2, %v1564_v22, %v1568_v13  ;;  %v979_v31 = vrot.slane %v789_v26, 1 }
 0x152   :  { %v1130_v29 = vadd.f32 %v976_v23, %v5995_v57  ;;  %v978_v36 = vsel %vm958_vm1, %v973_v25, %v977_v48  ;;  %v1571_v50 = vsel %vm1551_vm2, %v1566_v8, %v1570_v32  ;;  %v1572_v14 = vrot.slane %v1382_v30, 2  ;;  %3144 = vmatmul.mubr.bf16.gmra.mrb[144].mxu1 %v5098_v24  ;;  %3737 = vmatmul.mubr.bf16.gmra.mrb[144].mxu0 %v5098_v24  ;;  %v5099_v57 = vld [vmem:[%s7261_s0 + $0x24] ss:$8 sps:$4 sm:$0xff]  }
 0x153   :  { %v6196_v39 = vadd.f32 %v1567_v41, %v1129_v6  ;;  %v1131_v44 = vadd.f32 %v978_v36, %v6015_v33  ;;  %v980_v38 = vsel %vm958_vm1, %v975_v18, %v979_v31  ;;  %4696 = vmatprep.mubr.msk.bf16.mxu1 %vm316_vm0, %v5099_v57  ;;  %4758 = vmatprep.mubr.msk.bf16.mxu0 %vm316_vm0, %v5099_v57 }
 0x154   :  { %v6205_v22 = vadd.f32 %v1569_v47, %v1130_v29  ;;  %v1132_v25 = vadd.f32 %v980_v38, %v6019_v3  ;;  %v1573_v8 = vsel %vm1551_vm2, %v1568_v13, %v1572_v14 }
 0x155   :  { %v6209_v59 = vadd.f32 %v1571_v50, %v1131_v44  ;;  %v793_v52 = vpop.f32.mrb[40].mxu1  ;;  %v1386_v33 = vpop.f32.mrb[40].mxu0 }
 0x156   :  { %v6211_v41 = vadd.f32 %v1573_v8, %v1132_v25  ;;  %v981_v18 = vrot.slane %v793_v52, 1  ;;  %v1574_v26 = vrot.slane %v1386_v33, 2  ;;  %v795_v30 = vpop.f32.mrb[41].mxu1  ;;  %v1388_v6 = vpop.f32.mrb[41].mxu0 }
 0x157   :  { %v983_v23 = vrot.slane %v795_v30, 1  ;;  %v1576_v36 = vrot.slane %v1388_v6, 2  ;;  %v797_v24 = vpop.f32.mrb[42].mxu1  ;;  %v1390_v57 = vpop.f32.mrb[42].mxu0 }
 0x158   :  { %v982_v47 = vsel %vm958_vm1, %v977_v48, %v981_v18  ;;  %v1575_v3 = vsel %vm1551_vm2, %v1570_v32, %v1574_v26  ;;  %v985_v29 = vrot.slane %v797_v24, 1  ;;  %v1578_v13 = vrot.slane %v1390_v57, 2  ;;  %v799_v50 = vpop.f32.mrb[43].mxu1  ;;  %v1392_v44 = vpop.f32.mrb[43].mxu0  ;;  %v5100_v32 = vld [vmem:[%s7261_s0 + $0x20] ss:$8 sps:$4 sm:$0xff]  }
 0x159   :  { %v1133_v38 = vadd.f32 %v982_v47, %v6023_v7  ;;  %v984_v25 = vsel %vm958_vm1, %v979_v31, %v983_v23  ;;  %v1577_v8 = vsel %vm1551_vm2, %v1572_v14, %v1576_v36  ;;  %v987_v52 = vrot.slane %v799_v50, 1 }
 0x15a   :  { %v1134_v33 = vadd.f32 %v984_v25, %v6027_v45  ;;  %v986_v30 = vsel %vm958_vm1, %v981_v18, %v985_v29  ;;  %v1579_v6 = vsel %vm1551_vm2, %v1574_v26, %v1578_v13  ;;  %v1580_v48 = vrot.slane %v1392_v44, 2  ;;  %3154 = vmatmul.mubr.bf16.gmra.mrb[148].mxu1 %v5100_v32  ;;  %3747 = vmatmul.mubr.bf16.gmra.mrb[148].mxu0 %v5100_v32  ;;  %v5101_v45 = vld [vmem:[%s7261_s0 + $0x34] ss:$8 sps:$4 sm:$0xff]  }
 0x15b   :  { %v6224_v24 = vadd.f32 %v1575_v3, %v1133_v38  ;;  %v1135_v7 = vadd.f32 %v986_v30, %v6047_v15  ;;  %v988_v31 = vsel %vm958_vm1, %v983_v23, %v987_v52  ;;  %4697 = vmatprep.mubr.msk.bf16.mxu1 %vm316_vm0, %v5101_v45  ;;  %4759 = vmatprep.mubr.msk.bf16.mxu0 %vm316_vm0, %v5101_v45 }
 0x15c   :  { %v6233_v14 = vadd.f32 %v1577_v8, %v1134_v33  ;;  %v1136_v18 = vadd.f32 %v988_v31, %v6051_v19  ;;  %v1581_v26 = vsel %vm1551_vm2, %v1576_v36, %v1580_v48 }
 0x15d   :  { %v6237_v57 = vadd.f32 %v1579_v6, %v1135_v7  ;;  %v803_v47 = vpop.f32.mrb[44].mxu1  ;;  %v1396_v15 = vpop.f32.mrb[44].mxu0 }
 0x15e   :  { %v6239_v3 = vadd.f32 %v1581_v26, %v1136_v18  ;;  %v989_v23 = vrot.slane %v803_v47, 1  ;;  %v1582_v50 = vrot.slane %v1396_v15, 2  ;;  %v805_v44 = vpop.f32.mrb[45].mxu1  ;;  %v1398_v38 = vpop.f32.mrb[45].mxu0 }
 0x15f   :  { %v991_v25 = vrot.slane %v805_v44, 1  ;;  %v1584_v30 = vrot.slane %v1398_v38, 2  ;;  %v807_v32 = vpop.f32.mrb[46].mxu1  ;;  %v1400_v45 = vpop.f32.mrb[46].mxu0 }
 0x160   :  { %v990_v8 = vsel %vm958_vm1, %v985_v29, %v989_v23  ;;  %v1583_v19 = vsel %vm1551_vm2, %v1578_v13, %v1582_v50  ;;  %v993_v33 = vrot.slane %v807_v32, 1  ;;  %v1586_v36 = vrot.slane %v1400_v45, 2  ;;  %v809_v6 = vpop.f32.mrb[47].mxu1  ;;  %v1402_v7 = vpop.f32.mrb[47].mxu0  ;;  %v5102_v13 = vld [vmem:[%s7261_s0 + $0x30] ss:$8 sps:$4 sm:$0xff]  }
 0x161   :  { %v1137_v31 = vadd.f32 %v990_v8, %v6055_v56  ;;  %v992_v18 = vsel %vm958_vm1, %v987_v52, %v991_v25  ;;  %v1585_v26 = vsel %vm1551_vm2, %v1580_v48, %v1584_v30  ;;  %v995_v47 = vrot.slane %v809_v6, 1 }
 0x162   :  { %v1138_v15 = vadd.f32 %v992_v18, %v6059_v21  ;;  %v994_v44 = vsel %vm958_vm1, %v989_v23, %v993_v33  ;;  %v1587_v38 = vsel %vm1551_vm2, %v1582_v50, %v1586_v36  ;;  %v1588_v29 = vrot.slane %v1402_v7, 2  ;;  %3164 = vmatmul.mubr.bf16.gmra.mrb[152].mxu1 %v5102_v13  ;;  %3757 = vmatmul.mubr.bf16.gmra.mrb[152].mxu0 %v5102_v13  ;;  %v5103_v21 = vld [vmem:[%s7261_s0 + $0x44] ss:$8 sps:$4 sm:$0xff]  }
 0x163   :  { %v6252_v32 = vadd.f32 %v1583_v19, %v1137_v31  ;;  %v1139_v56 = vadd.f32 %v994_v44, %v6079_v28  ;;  %v996_v52 = vsel %vm958_vm1, %v991_v25, %v995_v47  ;;  %4698 = vmatprep.mubr.msk.bf16.mxu1 %vm316_vm0, %v5103_v21  ;;  %4760 = vmatprep.mubr.msk.bf16.mxu0 %vm316_vm0, %v5103_v21 }
 0x164   :  { %v6261_v48 = vadd.f32 %v1585_v26, %v1138_v15  ;;  %v1140_v23 = vadd.f32 %v996_v52, %v6083_v4  ;;  %v1589_v50 = vsel %vm1551_vm2, %v1584_v30, %v1588_v29 }
 0x165   :  { %v6265_v45 = vadd.f32 %v1587_v38, %v1139_v56  ;;  %v813_v8 = vpop.f32.mrb[48].mxu1  ;;  %v1406_v28 = vpop.f32.mrb[48].mxu0 }
 0x166   :  { %v6267_v19 = vadd.f32 %v1589_v50, %v1140_v23  ;;  %v997_v25 = vrot.slane %v813_v8, 1  ;;  %v1590_v6 = vrot.slane %v1406_v28, 2  ;;  %v815_v7 = vpop.f32.mrb[49].mxu1  ;;  %v1408_v31 = vpop.f32.mrb[49].mxu0 }
 0x167   :  { %v999_v18 = vrot.slane %v815_v7, 1  ;;  %v1592_v44 = vrot.slane %v1408_v31, 2  ;;  %v817_v13 = vpop.f32.mrb[50].mxu1  ;;  %v1410_v21 = vpop.f32.mrb[50].mxu0 }
 0x168   :  { %v998_v26 = vsel %vm958_vm1, %v993_v33, %v997_v25  ;;  %v1591_v4 = vsel %vm1551_vm2, %v1586_v36, %v1590_v6  ;;  %v1001_v15 = vrot.slane %v817_v13, 1  ;;  %v1594_v30 = vrot.slane %v1410_v21, 2  ;;  %v819_v38 = vpop.f32.mrb[51].mxu1  ;;  %v1412_v56 = vpop.f32.mrb[51].mxu0  ;;  %v5104_v36 = vld [vmem:[%s7261_s0 + $0x40] ss:$8 sps:$4 sm:$0xff]  }
 0x169   :  { %v1141_v52 = vadd.f32 %v998_v26, %v6087_v35  ;;  %v1000_v23 = vsel %vm958_vm1, %v995_v47, %v999_v18  ;;  %v1593_v50 = vsel %vm1551_vm2, %v1588_v29, %v1592_v44  ;;  %v1003_v8 = vrot.slane %v819_v38, 1 }
 0x16a   :  { %v1142_v28 = vadd.f32 %v1000_v23, %v6091_v37  ;;  %v1002_v7 = vsel %vm958_vm1, %v997_v25, %v1001_v15  ;;  %v1595_v31 = vsel %vm1551_vm2, %v1590_v6, %v1594_v30  ;;  %v1596_v33 = vrot.slane %v1412_v56, 2  ;;  %3174 = vmatmul.mubr.bf16.gmra.mrb[156].mxu1 %v5104_v36  ;;  %3767 = vmatmul.mubr.bf16.gmra.mrb[156].mxu0 %v5104_v36  ;;  %v5105_v37 = vld [vmem:[%s7261_s0 + $0x54] ss:$8 sps:$4 sm:$0xff]  }
 0x16b   :  { %v6280_v13 = vadd.f32 %v1591_v4, %v1141_v52  ;;  %v1143_v35 = vadd.f32 %v1002_v7, %v6101_v40  ;;  %v1004_v47 = vsel %vm958_vm1, %v999_v18, %v1003_v8  ;;  %4699 = vmatprep.mubr.msk.bf16.mxu1 %vm316_vm0, %v5105_v37  ;;  %4761 = vmatprep.mubr.msk.bf16.mxu0 %vm316_vm0, %v5105_v37 }
 0x16c   :  { %v6289_v29 = vadd.f32 %v1593_v50, %v1142_v28  ;;  %v1144_v25 = vadd.f32 %v1004_v47, %v6105_v17  ;;  %v1597_v6 = vsel %vm1551_vm2, %v1592_v44, %v1596_v33 }
 0x16d   :  { %v6293_v21 = vadd.f32 %v1595_v31, %v1143_v35  ;;  %v823_v26 = vpop.f32.mrb[52].mxu1  ;;  %v1416_v40 = vpop.f32.mrb[52].mxu0 }
 0x16e   :  { %v6295_v4 = vadd.f32 %v1597_v6, %v1144_v25  ;;  %v1005_v18 = vrot.slane %v823_v26, 1  ;;  %v1598_v38 = vrot.slane %v1416_v40, 2  ;;  %v825_v56 = vpop.f32.mrb[53].mxu1  ;;  %v1418_v52 = vpop.f32.mrb[53].mxu0 }
 0x16f   :  { %v1007_v23 = vrot.slane %v825_v56, 1  ;;  %v1600_v7 = vrot.slane %v1418_v52, 2  ;;  %v827_v36 = vpop.f32.mrb[54].mxu1  ;;  %v1420_v37 = vpop.f32.mrb[54].mxu0 }
 0x170   :  { %v1006_v50 = vsel %vm958_vm1, %v1001_v15, %v1005_v18  ;;  %v1599_v17 = vsel %vm1551_vm2, %v1594_v30, %v1598_v38  ;;  %v1009_v28 = vrot.slane %v827_v36, 1  ;;  %v1602_v44 = vrot.slane %v1420_v37, 2  ;;  %v829_v31 = vpop.f32.mrb[55].mxu1  ;;  %v1422_v35 = vpop.f32.mrb[55].mxu0  ;;  %v5106_v30 = vld [vmem:[%s7261_s0 + $0x50] ss:$8 sps:$4 sm:$0xff]  }
 0x171   :  { %v1145_v47 = vadd.f32 %v1006_v50, %v6109_v43  ;;  %v1008_v25 = vsel %vm958_vm1, %v1003_v8, %v1007_v23  ;;  %v1601_v6 = vsel %vm1551_vm2, %v1596_v33, %v1600_v7  ;;  %v1011_v26 = vrot.slane %v829_v31, 1 }
 0x172   :  { %v1146_v40 = vadd.f32 %v1008_v25, %v6113_v49  ;;  %v1010_v56 = vsel %vm958_vm1, %v1005_v18, %v1009_v28  ;;  %v1603_v52 = vsel %vm1551_vm2, %v1598_v38, %v1602_v44  ;;  %v1604_v15 = vrot.slane %v1422_v35, 2  ;;  %3184 = vmatmul.mubr.bf16.gmra.mrb[160].mxu1 %v5106_v30  ;;  %3777 = vmatmul.mubr.bf16.gmra.mrb[160].mxu0 %v5106_v30  ;;  %v5107_v49 = vld [vmem:[%s7261_s0 + $0x64] ss:$8 sps:$4 sm:$0xff]  }
 0x173   :  { %v6308_v36 = vadd.f32 %v1599_v17, %v1145_v47  ;;  %v1147_v43 = vadd.f32 %v1010_v56, %v6123_v5  ;;  %v1012_v8 = vsel %vm958_vm1, %v1007_v23, %v1011_v26  ;;  %4700 = vmatprep.mubr.msk.bf16.mxu1 %vm316_vm0, %v5107_v49  ;;  %4762 = vmatprep.mubr.msk.bf16.mxu0 %vm316_vm0, %v5107_v49 }
 0x174   :  { %v6317_v33 = vadd.f32 %v1601_v6, %v1146_v40  ;;  %v1148_v18 = vadd.f32 %v1012_v8, %v6127_v51  ;;  %v1605_v38 = vsel %vm1551_vm2, %v1600_v7, %v1604_v15 }
 0x175   :  { %v6321_v37 = vadd.f32 %v1603_v52, %v1147_v43  ;;  %v833_v50 = vpop.f32.mrb[56].mxu1  ;;  %v1426_v5 = vpop.f32.mrb[56].mxu0 }
 0x176   :  { %v6323_v17 = vadd.f32 %v1605_v38, %v1148_v18  ;;  %v1013_v23 = vrot.slane %v833_v50, 1  ;;  %v1606_v31 = vrot.slane %v1426_v5, 2  ;;  %v835_v35 = vpop.f32.mrb[57].mxu1  ;;  %v1428_v47 = vpop.f32.mrb[57].mxu0 }
 0x177   :  { %v1015_v25 = vrot.slane %v835_v35, 1  ;;  %v1608_v56 = vrot.slane %v1428_v47, 2  ;;  %v837_v30 = vpop.f32.mrb[58].mxu1  ;;  %v1430_v49 = vpop.f32.mrb[58].mxu0 }
 0x178   :  { %v1014_v6 = vsel %vm958_vm1, %v1009_v28, %v1013_v23  ;;  %v1607_v51 = vsel %vm1551_vm2, %v1602_v44, %v1606_v31  ;;  %v1017_v40 = vrot.slane %v837_v30, 1  ;;  %v1610_v7 = vrot.slane %v1430_v49, 2  ;;  %v839_v52 = vpop.f32.mrb[59].mxu1  ;;  %v1432_v43 = vpop.f32.mrb[59].mxu0  ;;  %v5108_v44 = vld [vmem:[%s7261_s0 + $0x60] ss:$8 sps:$4 sm:$0xff]  }
 0x179   :  { %v1149_v8 = vadd.f32 %v1014_v6, %v6131_v42  ;;  %v1016_v18 = vsel %vm958_vm1, %v1011_v26, %v1015_v25  ;;  %v1609_v38 = vsel %vm1551_vm2, %v1604_v15, %v1608_v56  ;;  %v1019_v50 = vrot.slane %v839_v52, 1 }
 0x17a   :  { %v1150_v5 = vadd.f32 %v1016_v18, %v6133_v10  ;;  %v1018_v35 = vsel %vm958_vm1, %v1013_v23, %v1017_v40  ;;  %v1611_v47 = vsel %vm1551_vm2, %v1606_v31, %v1610_v7  ;;  %v1612_v28 = vrot.slane %v1432_v43, 2  ;;  %3194 = vmatmul.mubr.bf16.gmra.mrb[164].mxu1 %v5108_v44  ;;  %3787 = vmatmul.mubr.bf16.gmra.mrb[164].mxu0 %v5108_v44 }
 0x17b   :  { %v6336_v30 = vadd.f32 %v1607_v51, %v1149_v8  ;;  %v1151_v42 = vadd.f32 %v1018_v35, %v5958_v54  ;;  %v1020_v26 = vsel %vm958_vm1, %v1015_v25, %v1019_v50  ;;  %4701 = vmatprep.mubr.msk.bf16.mxu1 %vm316_vm0, %v5977_v61  ;;  %4763 = vmatprep.mubr.msk.bf16.mxu0 %vm316_vm0, %v5977_v61 }
 0x17c   :  { %v6344_v10 = vadd.f32 %v1609_v38, %v1150_v5  ;;  %v1152_v15 = vadd.f32 %v1020_v26, %v5962_v55  ;;  %v1613_v23 = vsel %vm1551_vm2, %v1608_v56, %v1612_v28 }
 0x17d   :  { %v6348_v31 = vadd.f32 %v1611_v47, %v1151_v42  ;;  %v843_v49 = vpop.f32.mrb[60].mxu1  ;;  %v1436_v6 = vpop.f32.mrb[60].mxu0 }
 0x17e   :  { %v6350_v51 = vadd.f32 %v1613_v23, %v1152_v15  ;;  %v1021_v54 = vrot.slane %v843_v49, 1  ;;  %v1614_v25 = vrot.slane %v1436_v6, 2  ;;  %v845_v52 = vpop.f32.mrb[61].mxu1  ;;  %v1438_v43 = vpop.f32.mrb[61].mxu0 }
 0x17f   :  { %v1023_v8 = vrot.slane %v845_v52, 1  ;;  %v1616_v18 = vrot.slane %v1438_v43, 2  ;;  %v847_v35 = vpop.f32.mrb[62].mxu1  ;;  %v1440_v61 = vpop.f32.mrb[62].mxu0 }
 0x180   :  { %v1022_v38 = vsel %vm958_vm1, %v1017_v40, %v1021_v54  ;;  %v1615_v55 = vsel %vm1551_vm2, %v1610_v7, %v1614_v25  ;;  %v1025_v5 = vrot.slane %v847_v35, 1  ;;  %v1618_v56 = vrot.slane %v1440_v61, 2  ;;  %v849_v47 = vpop.f32.mrb[63].mxu1  ;;  %v1442_v44 = vpop.f32.mrb[63].mxu0 }
 0x181   :  { %v1153_v42 = vadd.f32 %v1022_v38, %v5966_v58  ;;  %v1024_v26 = vsel %vm958_vm1, %v1019_v50, %v1023_v8  ;;  %v1617_v15 = vsel %vm1551_vm2, %v1612_v28, %v1616_v18  ;;  %v1027_v23 = vrot.slane %v849_v47, 1 }
 0x182   :  { %v1154_v49 = vadd.f32 %v1024_v26, %v5970_v60  ;;  %v1026_v6 = vsel %vm958_vm1, %v1021_v54, %v1025_v5  ;;  %v1619_v52 = vsel %vm1551_vm2, %v1614_v25, %v1618_v56  ;;  %v1620_v40 = vrot.slane %v1442_v44, 2  ;;  %3204 = vmatmul.mubr.bf16.gmra.mrb[168].mxu1 %v6002_v62  ;;  %3797 = vmatmul.mubr.bf16.gmra.mrb[168].mxu0 %v6002_v62 }
 0x183   :  { %v6362_v7 = vadd.f32 %v1615_v55, %v1153_v42  ;;  %v1155_v58 = vadd.f32 %v1026_v6, %v5985_v34  ;;  %v1028_v50 = vsel %vm958_vm1, %v1023_v8, %v1027_v23  ;;  %4702 = vmatprep.mubr.msk.bf16.mxu1 %vm316_vm0, %v6009_v0  ;;  %4764 = vmatprep.mubr.msk.bf16.mxu0 %vm316_vm0, %v6009_v0 }
 0x184   :  { %v6370_v60 = vadd.f32 %v1617_v15, %v1154_v49  ;;  %v1156_v28 = vadd.f32 %v1028_v50, %v5989_v46  ;;  %v1621_v54 = vsel %vm1551_vm2, %v1616_v18, %v1620_v40 }
 0x185   :  { %v6374_v25 = vadd.f32 %v1619_v52, %v1155_v58  ;;  %v853_v62 = vpop.f32.mrb[64].mxu1  ;;  %v1446_v43 = vpop.f32.mrb[64].mxu0 }
 0x186   :  { %v6376_v35 = vadd.f32 %v1621_v54, %v1156_v28  ;;  %v1029_v34 = vrot.slane %v853_v62, 1  ;;  %v1622_v8 = vrot.slane %v1446_v43, 2  ;;  %v855_v61 = vpop.f32.mrb[65].mxu1  ;;  %v1448_v38 = vpop.f32.mrb[65].mxu0  ;;  %v7291_v43 = vld [vmem:[#allocation5_spill] sm:$0xff] }
 0x187   :  { %v1031_v55 = vrot.slane %v855_v61, 1  ;;  %v1624_v47 = vrot.slane %v1448_v38, 2  ;;  %v857_v44 = vpop.f32.mrb[66].mxu1  ;;  %v1450_v0 = vpop.f32.mrb[66].mxu0 }
 0x188   :  { %v1030_v42 = vsel %vm958_vm1, %v1025_v5, %v1029_v34  ;;  %v1623_v46 = vsel %vm1551_vm2, %v1618_v56, %v1622_v8  ;;  %v1033_v26 = vrot.slane %v857_v44, 1  ;;  %v1626_v18 = vrot.slane %v1450_v0, 2  ;;  %v859_v15 = vpop.f32.mrb[67].mxu1  ;;  %v1452_v49 = vpop.f32.mrb[67].mxu0 }
 0x189   :  { %v1157_v6 = vadd.f32 %v1030_v42, %v5993_v53  ;;  %v1032_v52 = vsel %vm958_vm1, %v1027_v23, %v1031_v55  ;;  %v1625_v58 = vsel %vm1551_vm2, %v1620_v40, %v1624_v47  ;;  %v1035_v50 = vrot.slane %v859_v15, 1  ;;  %v7292_v40 = vld [vmem:[#allocation2_spill] sm:$0xff] }
 0x18a   :  { %v1158_v28 = vadd.f32 %v1032_v52, %v5997_v27  ;;  %v1034_v54 = vsel %vm958_vm1, %v1029_v34, %v1033_v26  ;;  %v1627_v62 = vsel %vm1551_vm2, %v1622_v8, %v1626_v18  ;;  %v1628_v5 = vrot.slane %v1452_v49, 2  ;;  %3214 = vmatmul.mubr.bf16.gmra.mrb[172].mxu1 %v6034_v9  ;;  %3807 = vmatmul.mubr.bf16.gmra.mrb[172].mxu0 %v6034_v9 }
 0x18b   :  { %v6388_v56 = vadd.f32 %v1623_v46, %v1157_v6  ;;  %v1159_v53 = vadd.f32 %v1034_v54, %v6017_v2  ;;  %v1036_v23 = vsel %vm958_vm1, %v1031_v55, %v1035_v50  ;;  %4703 = vmatprep.mubr.msk.bf16.mxu1 %vm316_vm0, %v7291_v43  ;;  %4765 = vmatprep.mubr.msk.bf16.mxu0 %vm316_vm0, %v7291_v43 }
 0x18c   :  { %v6396_v27 = vadd.f32 %v1625_v58, %v1158_v28  ;;  %v1160_v34 = vadd.f32 %v1036_v23, %v7292_v40  ;;  %v1629_v8 = vsel %vm1551_vm2, %v1624_v47, %v1628_v5 }
 0x18d   :  { %v6400_v61 = vadd.f32 %v1627_v62, %v1159_v53  ;;  %v863_v9 = vpop.f32.mrb[68].mxu1  ;;  %v1456_v38 = vpop.f32.mrb[68].mxu0  ;;  %v7293_v53 = vld [vmem:[#allocation3_spill] sm:$0xff] }
 0x18e   :  { %v6402_v44 = vadd.f32 %v1629_v8, %v1160_v34  ;;  %v1037_v2 = vrot.slane %v863_v9, 1  ;;  %v1630_v55 = vrot.slane %v1456_v38, 2  ;;  %v865_v0 = vpop.f32.mrb[69].mxu1  ;;  %v1458_v42 = vpop.f32.mrb[69].mxu0  ;;  %v7294_v8 = vld [vmem:[#allocation4_spill] sm:$0xff] }
 0x18f   :  { %v1039_v46 = vrot.slane %v865_v0, 1  ;;  %v1632_v15 = vrot.slane %v1458_v42, 2  ;;  %v867_v49 = vpop.f32.mrb[70].mxu1  ;;  %v1460_v6 = vpop.f32.mrb[70].mxu0  ;;  %v7295_v42 = vld [vmem:[#allocation10_spill] sm:$0xff] }
 0x190   :  { %v1038_v52 = vsel %vm958_vm1, %v1033_v26, %v1037_v2  ;;  %v1631_v58 = vsel %vm1551_vm2, %v1626_v18, %v1630_v55  ;;  %v1041_v28 = vrot.slane %v867_v49, 1  ;;  %v1634_v47 = vrot.slane %v1460_v6, 2  ;;  %v869_v54 = vpop.f32.mrb[71].mxu1  ;;  %v1462_v62 = vpop.f32.mrb[71].mxu0  ;;  %v7297_v49 = vld [vmem:[#allocation6_spill] sm:$0xff] }
 0x191   :  { %v1161_v23 = vadd.f32 %v1038_v52, %v7293_v53  ;;  %v1040_v43 = vsel %vm958_vm1, %v1035_v50, %v1039_v46  ;;  %v1633_v40 = vsel %vm1551_vm2, %v1628_v5, %v1632_v15  ;;  %v1043_v34 = vrot.slane %v869_v54, 1  ;;  %v7298_v52 = vld [vmem:[#allocation11_spill] sm:$0xff] }
 0x192   :  { %v1162_v9 = vadd.f32 %v1040_v43, %v7294_v8  ;;  %v1042_v38 = vsel %vm958_vm1, %v1037_v2, %v1041_v28  ;;  %v1635_v0 = vsel %vm1551_vm2, %v1630_v55, %v1634_v47  ;;  %v1636_v26 = vrot.slane %v1462_v62, 2  ;;  %3224 = vmatmul.mubr.bf16.gmra.mrb[176].mxu1 %v7295_v42  ;;  %3817 = vmatmul.mubr.bf16.gmra.mrb[176].mxu0 %v7295_v42  ;;  %v7300_v2 = vld [vmem:[#allocation7_spill] sm:$0xff] }
 0x193   :  { %v6414_v18 = vadd.f32 %v1631_v58, %v1161_v23  ;;  %v1163_v6 = vadd.f32 %v1042_v38, %v7297_v49  ;;  %v1044_v50 = vsel %vm958_vm1, %v1039_v46, %v1043_v34  ;;  %4704 = vmatprep.mubr.msk.bf16.mxu1 %vm316_vm0, %v7298_v52  ;;  %4766 = vmatprep.mubr.msk.bf16.mxu0 %vm316_vm0, %v7298_v52 }
 0x194   :  { %v6422_v5 = vadd.f32 %v1633_v40, %v1162_v9  ;;  %v1164_v55 = vadd.f32 %v1044_v50, %v7300_v2  ;;  %v1637_v54 = vsel %vm1551_vm2, %v1632_v15, %v1636_v26  ;;  %v7303_v2 = vld [vmem:[#allocation8_spill] sm:$0xff] }
 0x195   :  { %7296 = vst [vmem:[#allocation5_spill] sm:$0xff] %v6414_v18  ;;  %v6426_v62 = vadd.f32 %v1635_v0, %v1163_v6  ;;  %v873_v58 = vpop.f32.mrb[72].mxu1  ;;  %v1466_v53 = vpop.f32.mrb[72].mxu0 }
 0x196   :  { %7299 = vst [vmem:[#allocation2_spill] sm:$0xff] %v6422_v5  ;;  %v6428_v23 = vadd.f32 %v1637_v54, %v1164_v55  ;;  %v1045_v43 = vrot.slane %v873_v58, 1  ;;  %v1638_v46 = vrot.slane %v1466_v53, 2  ;;  %v875_v8 = vpop.f32.mrb[73].mxu1  ;;  %v1468_v38 = vpop.f32.mrb[73].mxu0  ;;  %v7304_v53 = vld [vmem:[#allocation9_spill] sm:$0xff] }
 0x197   :  { %7301 = vst [vmem:[#allocation3_spill] sm:$0xff] %v6426_v62  ;;  %v1047_v42 = vrot.slane %v875_v8, 1  ;;  %v1640_v49 = vrot.slane %v1468_v38, 2  ;;  %v877_v18 = vpop.f32.mrb[74].mxu1  ;;  %v1470_v52 = vpop.f32.mrb[74].mxu0 }
 0x198   :  { %7302 = vst [vmem:[#allocation4_spill] sm:$0xff] %v6428_v23  ;;  %v1046_v40 = vsel %vm958_vm1, %v1041_v28, %v1045_v43  ;;  %v1639_v9 = vsel %vm1551_vm2, %v1634_v47, %v1638_v46  ;;  %v1049_v50 = vrot.slane %v877_v18, 1  ;;  %v1642_v15 = vrot.slane %v1470_v52, 2  ;;  %v879_v0 = vpop.f32.mrb[75].mxu1  ;;  %v1472_v6 = vpop.f32.mrb[75].mxu0  ;;  %v7306_v52 = vld [vmem:[#allocation12_spill] sm:$0xff] }
 0x199   :  { %v1165_v62 = vadd.f32 %v1046_v40, %v7303_v2  ;;  %v1048_v55 = vsel %vm958_vm1, %v1043_v34, %v1047_v42  ;;  %v1641_v54 = vsel %vm1551_vm2, %v1636_v26, %v1640_v49  ;;  %v1051_v58 = vrot.slane %v879_v0, 1  ;;  %v5109_v47 = vld [vmem:[%s7261_s0 + $0xa0] ss:$8 sps:$4 sm:$0xff]   ;;  %v5110_v40 = vld [vmem:[%s7261_s0 + $0xb4] ss:$8 sps:$4 sm:$0xff]  }
 0x19a   :  { %v1166_v8 = vadd.f32 %v1048_v55, %v7304_v53  ;;  %v1050_v38 = vsel %vm958_vm1, %v1045_v43, %v1049_v50  ;;  %v1643_v23 = vsel %vm1551_vm2, %v1638_v46, %v1642_v15  ;;  %v1644_v28 = vrot.slane %v1472_v6, 2  ;;  %3234 = vmatmul.mubr.bf16.gmra.mrb[180].mxu1 %v5109_v47  ;;  %3827 = vmatmul.mubr.bf16.gmra.mrb[180].mxu0 %v5109_v47  ;;  %v7308_v46 = vld [vmem:[#allocation13_spill] sm:$0xff] }
 0x19b   :  { %v6441_v18 = vadd.f32 %v1639_v9, %v1165_v62  ;;  %v1167_v34 = vadd.f32 %v1050_v38, %v7306_v52  ;;  %v1052_v26 = vsel %vm958_vm1, %v1047_v42, %v1051_v58  ;;  %4705 = vmatprep.mubr.msk.bf16.mxu1 %vm316_vm0, %v5110_v40  ;;  %4767 = vmatprep.mubr.msk.bf16.mxu0 %vm316_vm0, %v5110_v40 }
 0x19c   :  { %v6450_v43 = vadd.f32 %v1641_v54, %v1166_v8  ;;  %v1168_v0 = vadd.f32 %v1052_v26, %v7308_v46  ;;  %v1645_v6 = vsel %vm1551_vm2, %v1640_v49, %v1644_v28  ;;  %v7311_v46 = vld [vmem:[#allocation14_spill] sm:$0xff] }
 0x19d   :  { %7305 = vst [vmem:[#allocation10_spill] sm:$0xff] %v6441_v18  ;;  %v6454_v62 = vadd.f32 %v1643_v23, %v1167_v34  ;;  %v883_v9 = vpop.f32.mrb[76].mxu1  ;;  %v1476_v2 = vpop.f32.mrb[76].mxu0 }
 0x19e   :  { %7307 = vst [vmem:[#allocation6_spill] sm:$0xff] %v6450_v43  ;;  %v6456_v55 = vadd.f32 %v1645_v6, %v1168_v0  ;;  %v1053_v42 = vrot.slane %v883_v9, 1  ;;  %v1646_v53 = vrot.slane %v1476_v2, 2  ;;  %v885_v38 = vpop.f32.mrb[77].mxu1  ;;  %v1478_v47 = vpop.f32.mrb[77].mxu0  ;;  %v7312_v2 = vld [vmem:[#allocation15_spill] sm:$0xff] }
 0x19f   :  { %7309 = vst [vmem:[#allocation11_spill] sm:$0xff] %v6454_v62  ;;  %v1055_v52 = vrot.slane %v885_v38, 1  ;;  %v1648_v18 = vrot.slane %v1478_v47, 2  ;;  %v887_v5 = vpop.f32.mrb[78].mxu1  ;;  %v1480_v40 = vpop.f32.mrb[78].mxu0 }
 0x1a0   :  { %7310 = vst [vmem:[#allocation7_spill] sm:$0xff] %v6456_v55  ;;  %v1054_v54 = vsel %vm958_vm1, %v1049_v50, %v1053_v42  ;;  %v1647_v8 = vsel %vm1551_vm2, %v1642_v15, %v1646_v53  ;;  %v1057_v26 = vrot.slane %v887_v5, 1  ;;  %v1650_v49 = vrot.slane %v1480_v40, 2  ;;  %v889_v23 = vpop.f32.mrb[79].mxu1  ;;  %v1482_v34 = vpop.f32.mrb[79].mxu0  ;;  %v7314_v40 = vld [vmem:[#allocation16_spill] sm:$0xff] }
 0x1a1   :  { %v1169_v62 = vadd.f32 %v1054_v54, %v7311_v46  ;;  %v1056_v0 = vsel %vm958_vm1, %v1051_v58, %v1055_v52  ;;  %v1649_v6 = vsel %vm1551_vm2, %v1644_v28, %v1648_v18  ;;  %v1059_v9 = vrot.slane %v889_v23, 1  ;;  %v5111_v5 = vld [vmem:[%s7261_s0 + $0xb0] ss:$8 sps:$4 sm:$0xff]   ;;  %v5112_v54 = vld [vmem:[%s7261_s0 + $0xc4] ss:$8 sps:$4 sm:$0xff]  }
 0x1a2   :  { %v1170_v38 = vadd.f32 %v1056_v0, %v7312_v2  ;;  %v1058_v47 = vsel %vm958_vm1, %v1053_v42, %v1057_v26  ;;  %v1651_v55 = vsel %vm1551_vm2, %v1646_v53, %v1650_v49  ;;  %v1652_v50 = vrot.slane %v1482_v34, 2  ;;  %3244 = vmatmul.mubr.bf16.gmra.mrb[184].mxu1 %v5111_v5  ;;  %3837 = vmatmul.mubr.bf16.gmra.mrb[184].mxu0 %v5111_v5  ;;  %v7315_v53 = vld [vmem:[#allocation17_spill] sm:$0xff] }
 0x1a3   :  { %v6469_v15 = vadd.f32 %v1647_v8, %v1169_v62  ;;  %v1171_v58 = vadd.f32 %v1058_v47, %v7314_v40  ;;  %v1060_v28 = vsel %vm958_vm1, %v1055_v52, %v1059_v9  ;;  %4706 = vmatprep.mubr.msk.bf16.mxu1 %vm316_vm0, %v5112_v54  ;;  %4768 = vmatprep.mubr.msk.bf16.mxu0 %vm316_vm0, %v5112_v54 }
 0x1a4   :  { %v6478_v42 = vadd.f32 %v1649_v6, %v1170_v38  ;;  %v1172_v23 = vadd.f32 %v1060_v28, %v7315_v53  ;;  %v1653_v34 = vsel %vm1551_vm2, %v1648_v18, %v1652_v50  ;;  %v7318_v53 = vld [vmem:[#allocation18_spill] sm:$0xff] }
 0x1a5   :  { %7313 = vst [vmem:[#allocation8_spill] sm:$0xff] %v6469_v15  ;;  %v6482_v62 = vadd.f32 %v1651_v55, %v1171_v58  ;;  %v893_v8 = vpop.f32.mrb[80].mxu1  ;;  %v1486_v46 = vpop.f32.mrb[80].mxu0 }
 0x1a6   :  { %v6484_v0 = vadd.f32 %v1653_v34, %v1172_v23  ;;  %v1061_v52 = vrot.slane %v893_v8, 1  ;;  %v1654_v2 = vrot.slane %v1486_v46, 2  ;;  %v895_v47 = vpop.f32.mrb[81].mxu1  ;;  %v1488_v5 = vpop.f32.mrb[81].mxu0  ;;  %v7319_v46 = vld [vmem:[#allocation19_spill] sm:$0xff] }
 0x1a7   :  { %7316 = vst [vmem:[#allocation9_spill] sm:$0xff] %v6482_v62  ;;  %v1063_v40 = vrot.slane %v895_v47, 1  ;;  %v1656_v15 = vrot.slane %v1488_v5, 2  ;;  %v897_v43 = vpop.f32.mrb[82].mxu1  ;;  %v1490_v54 = vpop.f32.mrb[82].mxu0 }
 0x1a8   :  { %7317 = vst [vmem:[#allocation12_spill] sm:$0xff] %v6484_v0  ;;  %v1062_v6 = vsel %vm958_vm1, %v1057_v26, %v1061_v52  ;;  %v1655_v38 = vsel %vm1551_vm2, %v1650_v49, %v1654_v2  ;;  %v1065_v28 = vrot.slane %v897_v43, 1  ;;  %v1658_v18 = vrot.slane %v1490_v54, 2  ;;  %v899_v55 = vpop.f32.mrb[83].mxu1  ;;  %v1492_v58 = vpop.f32.mrb[83].mxu0  ;;  %v7320_v54 = vld [vmem:[#allocation20_spill] sm:$0xff] }
 0x1a9   :  { %v1173_v62 = vadd.f32 %v1062_v6, %v7318_v53  ;;  %v1064_v23 = vsel %vm958_vm1, %v1059_v9, %v1063_v40  ;;  %v1657_v34 = vsel %vm1551_vm2, %v1652_v50, %v1656_v15  ;;  %v1067_v8 = vrot.slane %v899_v55, 1  ;;  %v5113_v43 = vld [vmem:[%s7261_s0 + $0xc0] ss:$8 sps:$4 sm:$0xff]   ;;  %v5114_v6 = vld [vmem:[%s7261_s0 + $0xd4] ss:$8 sps:$4 sm:$0xff]  }
 0x1aa   :  { %v1174_v47 = vadd.f32 %v1064_v23, %v7319_v46  ;;  %v1066_v5 = vsel %vm958_vm1, %v1061_v52, %v1065_v28  ;;  %v1659_v0 = vsel %vm1551_vm2, %v1654_v2, %v1658_v18  ;;  %v1660_v26 = vrot.slane %v1492_v58, 2  ;;  %3254 = vmatmul.mubr.bf16.gmra.mrb[188].mxu1 %v5113_v43  ;;  %3847 = vmatmul.mubr.bf16.gmra.mrb[188].mxu0 %v5113_v43  ;;  %v7321_v2 = vld [vmem:[#allocation21_spill] sm:$0xff] }
 0x1ab   :  { %v6497_v49 = vadd.f32 %v1655_v38, %v1173_v62  ;;  %v1175_v9 = vadd.f32 %v1066_v5, %v7320_v54  ;;  %v1068_v50 = vsel %vm958_vm1, %v1063_v40, %v1067_v8  ;;  %4707 = vmatprep.mubr.msk.bf16.mxu1 %vm316_vm0, %v5114_v6  ;;  %4769 = vmatprep.mubr.msk.bf16.mxu0 %vm316_vm0, %v5114_v6 }
 0x1ac   :  { %v6506_v52 = vadd.f32 %v1657_v34, %v1174_v47  ;;  %v1176_v28 = vadd.f32 %v1068_v50, %v7321_v2  ;;  %v1661_v18 = vsel %vm1551_vm2, %v1656_v15, %v1660_v26  ;;  %v5115_v2 = vld [vmem:[%s7261_s0 + $0xd0] ss:$8 sps:$4 sm:$0xff]  }
 0x1ad   :  { %v6510_v62 = vadd.f32 %v1659_v0, %v1175_v9  ;;  %v1949_v38 = vpop.f32.mrb[84].mxu1  ;;  %v2542_v55 = vpop.f32.mrb[84].mxu0 }
 0x1ae   :  { %v6512_v58 = vadd.f32 %v1661_v18, %v1176_v28  ;;  %v2738_v40 = vrot.slane %v2542_v55, 4  ;;  %v1951_v53 = vpop.f32.mrb[85].mxu1  ;;  %v2544_v23 = vpop.f32.mrb[85].mxu0  ;;  %v2145_v34 = vrot.slane %v1949_v38, 3 }
 0x1af   :  { %7322 = vst [vmem:[#allocation13_spill] sm:$0xff] %v6510_v62  ;;  %v2741_v8 = vrot.slane %v2544_v23, 4  ;;  %v1953_v46 = vpop.f32.mrb[86].mxu1  ;;  %v2546_v5 = vpop.f32.mrb[86].mxu0  ;;  %v2148_v15 = vrot.slane %v1951_v53, 3 }
 0x1b0   :  { %7323 = vst [vmem:[#allocation14_spill] sm:$0xff] %v6512_v58  ;;  %v2146_v47 = vrot.slane %v1953_v46, 3  ;;  %v2739_v43 = vrot.slane %v2546_v5, 4  ;;  %v1955_v54 = vpop.f32.mrb[87].mxu1  ;;  %v2548_v50 = vpop.f32.mrb[87].mxu0 }
 0x1b1   :  { %v2149_v0 = vrot.slane %v1955_v54, 3  ;;  %v2742_v26 = vrot.slane %v2548_v50, 4 }
 0x1b2   :  { %v2147_v9 = vsel %vm2144_vm3, %v2145_v34, %v2146_v47  ;;  %v2740_v6 = vsel %vm2737_vm4, %v2738_v40, %v2739_v43  ;;  %3264 = vmatmul.mubr.bf16.gmra.mrb[192].mxu1 %v5115_v2  ;;  %3857 = vmatmul.mubr.bf16.gmra.mrb[192].mxu0 %v5115_v2 }
 0x1b3   :  { %v2309_v28 = vadd.f32 %v2147_v9, %v6153_v63  ;;  %v2150_v18 = vsel %vm2144_vm3, %v2148_v15, %v2149_v0  ;;  %v2743_v38 = vsel %vm2737_vm4, %v2741_v8, %v2742_v26 }
 0x1b4   :  { %v2310_v55 = vadd.f32 %v2150_v18, %v6155_v1 }
 0x1b5   :  { %v6523_v53 = vadd.f32 %v2740_v6, %v2309_v28  ;;  %v1959_v23 = vpop.f32.mrb[88].mxu1  ;;  %v2552_v46 = vpop.f32.mrb[88].mxu0 }
 0x1b6   :  { %v6525_v5 = vadd.f32 %v2743_v38, %v2310_v55  ;;  %v2151_v40 = vrot.slane %v1959_v23, 3  ;;  %v2744_v34 = vrot.slane %v2552_v46, 4  ;;  %v1961_v54 = vpop.f32.mrb[89].mxu1  ;;  %v2554_v50 = vpop.f32.mrb[89].mxu0 }
 0x1b7   :  { %v2153_v58 = vrot.slane %v1961_v54, 3  ;;  %v2746_v2 = vrot.slane %v2554_v50, 4  ;;  %v1963_v62 = vpop.f32.mrb[90].mxu1  ;;  %v2556_v63 = vpop.f32.mrb[90].mxu0 }
 0x1b8   :  { %7324 = vst [vmem:[#allocation15_spill] sm:$0xff] %v6525_v5  ;;  %v2152_v15 = vsel %vm2144_vm3, %v2146_v47, %v2151_v40  ;;  %v2745_v8 = vsel %vm2737_vm4, %v2739_v43, %v2744_v34  ;;  %v2155_v9 = vrot.slane %v1963_v62, 3  ;;  %v2748_v1 = vrot.slane %v2556_v63, 4  ;;  %v1965_v6 = vpop.f32.mrb[91].mxu1  ;;  %v2558_v28 = vpop.f32.mrb[91].mxu0 }
 0x1b9   :  { %v2311_v18 = vadd.f32 %v2152_v15, %v6168_v20  ;;  %v2154_v38 = vsel %vm2144_vm3, %v2149_v0, %v2153_v58  ;;  %v2747_v55 = vsel %vm2737_vm4, %v2742_v26, %v2746_v2  ;;  %v2157_v23 = vrot.slane %v1965_v6, 3 }
 0x1ba   :  { %v2312_v46 = vadd.f32 %v2154_v38, %v6177_v16  ;;  %v2156_v54 = vsel %vm2144_vm3, %v2151_v40, %v2155_v9  ;;  %v2749_v50 = vsel %vm2737_vm4, %v2744_v34, %v2748_v1  ;;  %v2750_v47 = vrot.slane %v2558_v28, 4 }
 0x1bb   :  { %v6535_v5 = vadd.f32 %v2745_v8, %v2311_v18  ;;  %v2313_v62 = vadd.f32 %v2156_v54, %v6181_v11  ;;  %v2158_v43 = vsel %vm2144_vm3, %v2153_v58, %v2157_v23 }
 0x1bc   :  { %v6539_v63 = vadd.f32 %v2747_v55, %v2312_v46  ;;  %v2314_v20 = vadd.f32 %v2158_v43, %v6183_v12  ;;  %v2751_v0 = vsel %vm2737_vm4, %v2746_v2, %v2750_v47 }
 0x1bd   :  { %v6543_v26 = vadd.f32 %v2749_v50, %v2313_v62  ;;  %v1969_v16 = vpop.f32.mrb[92].mxu1  ;;  %v2562_v15 = vpop.f32.mrb[92].mxu0 }
 0x1be   :  { %v6545_v40 = vadd.f32 %v2751_v0, %v2314_v20  ;;  %v2159_v34 = vrot.slane %v1969_v16, 3  ;;  %v2752_v6 = vrot.slane %v2562_v15, 4  ;;  %v1971_v8 = vpop.f32.mrb[93].mxu1  ;;  %v2564_v28 = vpop.f32.mrb[93].mxu0 }
 0x1bf   :  { %v2161_v18 = vrot.slane %v1971_v8, 3  ;;  %v2754_v11 = vrot.slane %v2564_v28, 4  ;;  %v1973_v38 = vpop.f32.mrb[94].mxu1  ;;  %v2566_v58 = vpop.f32.mrb[94].mxu0 }
 0x1c0   :  { %v2160_v55 = vsel %vm2144_vm3, %v2155_v9, %v2159_v34  ;;  %v2753_v12 = vsel %vm2737_vm4, %v2748_v1, %v2752_v6  ;;  %v2163_v46 = vrot.slane %v1973_v38, 3  ;;  %v2756_v2 = vrot.slane %v2566_v58, 4  ;;  %v1975_v54 = vpop.f32.mrb[95].mxu1  ;;  %v2568_v50 = vpop.f32.mrb[95].mxu0 }
 0x1c1   :  { %v2315_v62 = vadd.f32 %v2160_v55, %v6196_v39  ;;  %v2162_v43 = vsel %vm2144_vm3, %v2157_v23, %v2161_v18  ;;  %v2755_v20 = vsel %vm2737_vm4, %v2750_v47, %v2754_v11  ;;  %v2165_v0 = vrot.slane %v1975_v54, 3 }
 0x1c2   :  { %v2316_v16 = vadd.f32 %v2162_v43, %v6205_v22  ;;  %v2164_v15 = vsel %vm2144_vm3, %v2159_v34, %v2163_v46  ;;  %v2757_v8 = vsel %vm2737_vm4, %v2752_v6, %v2756_v2  ;;  %v2758_v9 = vrot.slane %v2568_v50, 4 }
 0x1c3   :  { %v6555_v28 = vadd.f32 %v2753_v12, %v2315_v62  ;;  %v2317_v1 = vadd.f32 %v2164_v15, %v6209_v59  ;;  %v2166_v38 = vsel %vm2144_vm3, %v2161_v18, %v2165_v0 }
 0x1c4   :  { %v6559_v58 = vadd.f32 %v2755_v20, %v2316_v16  ;;  %v2318_v39 = vadd.f32 %v2166_v38, %v6211_v41  ;;  %v2759_v23 = vsel %vm2737_vm4, %v2754_v11, %v2758_v9 }
 0x1c5   :  { %v6563_v47 = vadd.f32 %v2757_v8, %v2317_v1  ;;  %v1979_v22 = vpop.f32.mrb[96].mxu1  ;;  %v2572_v55 = vpop.f32.mrb[96].mxu0 }
 0x1c6   :  { %v6565_v34 = vadd.f32 %v2759_v23, %v2318_v39  ;;  %v2167_v6 = vrot.slane %v1979_v22, 3  ;;  %v2760_v54 = vrot.slane %v2572_v55, 4  ;;  %v1981_v12 = vpop.f32.mrb[97].mxu1  ;;  %v2574_v50 = vpop.f32.mrb[97].mxu0 }
 0x1c7   :  { %v2169_v62 = vrot.slane %v1981_v12, 3  ;;  %v2762_v59 = vrot.slane %v2574_v50, 4  ;;  %v1983_v43 = vpop.f32.mrb[98].mxu1  ;;  %v2576_v18 = vpop.f32.mrb[98].mxu0 }
 0x1c8   :  { %v2168_v20 = vsel %vm2144_vm3, %v2163_v46, %v2167_v6  ;;  %v2761_v41 = vsel %vm2737_vm4, %v2756_v2, %v2760_v54  ;;  %v2171_v16 = vrot.slane %v1983_v43, 3  ;;  %v2764_v11 = vrot.slane %v2576_v18, 4  ;;  %v1985_v15 = vpop.f32.mrb[99].mxu1  ;;  %v2578_v8 = vpop.f32.mrb[99].mxu0 }
 0x1c9   :  { %v2319_v1 = vadd.f32 %v2168_v20, %v6224_v24  ;;  %v2170_v38 = vsel %vm2144_vm3, %v2165_v0, %v2169_v62  ;;  %v2763_v39 = vsel %vm2737_vm4, %v2758_v9, %v2762_v59  ;;  %v2173_v23 = vrot.slane %v1985_v15, 3 }
 0x1ca   :  { %v2320_v22 = vadd.f32 %v2170_v38, %v6233_v14  ;;  %v2172_v55 = vsel %vm2144_vm3, %v2167_v6, %v2171_v16  ;;  %v2765_v12 = vsel %vm2737_vm4, %v2760_v54, %v2764_v11  ;;  %v2766_v46 = vrot.slane %v2578_v8, 4 }
 0x1cb   :  { %v6575_v50 = vadd.f32 %v2761_v41, %v2319_v1  ;;  %v2321_v2 = vadd.f32 %v2172_v55, %v6237_v57  ;;  %v2174_v43 = vsel %vm2144_vm3, %v2169_v62, %v2173_v23 }
 0x1cc   :  { %v6579_v18 = vadd.f32 %v2763_v39, %v2320_v22  ;;  %v2322_v24 = vadd.f32 %v2174_v43, %v6239_v3  ;;  %v2767_v0 = vsel %vm2737_vm4, %v2762_v59, %v2766_v46 }
 0x1cd   :  { %v6583_v9 = vadd.f32 %v2765_v12, %v2321_v2  ;;  %v1989_v14 = vpop.f32.mrb[100].mxu1  ;;  %v2582_v20 = vpop.f32.mrb[100].mxu0 }
 0x1ce   :  { %v6585_v6 = vadd.f32 %v2767_v0, %v2322_v24  ;;  %v2175_v54 = vrot.slane %v1989_v14, 3  ;;  %v2768_v15 = vrot.slane %v2582_v20, 4  ;;  %v1991_v41 = vpop.f32.mrb[101].mxu1  ;;  %v2584_v8 = vpop.f32.mrb[101].mxu0 }
 0x1cf   :  { %v2177_v1 = vrot.slane %v1991_v41, 3  ;;  %v2770_v57 = vrot.slane %v2584_v8, 4  ;;  %v1993_v38 = vpop.f32.mrb[102].mxu1  ;;  %v2586_v62 = vpop.f32.mrb[102].mxu0 }
 0x1d0   :  { %v2176_v39 = vsel %vm2144_vm3, %v2171_v16, %v2175_v54  ;;  %v2769_v3 = vsel %vm2737_vm4, %v2764_v11, %v2768_v15  ;;  %v2179_v22 = vrot.slane %v1993_v38, 3  ;;  %v2772_v59 = vrot.slane %v2586_v62, 4  ;;  %v1995_v55 = vpop.f32.mrb[103].mxu1  ;;  %v2588_v12 = vpop.f32.mrb[103].mxu0 }
 0x1d1   :  { %v2323_v2 = vadd.f32 %v2176_v39, %v6252_v32  ;;  %v2178_v43 = vsel %vm2144_vm3, %v2173_v23, %v2177_v1  ;;  %v2771_v24 = vsel %vm2737_vm4, %v2766_v46, %v2770_v57  ;;  %v2181_v0 = vrot.slane %v1995_v55, 3 }
 0x1d2   :  { %v2324_v14 = vadd.f32 %v2178_v43, %v6261_v48  ;;  %v2180_v20 = vsel %vm2144_vm3, %v2175_v54, %v2179_v22  ;;  %v2773_v41 = vsel %vm2737_vm4, %v2768_v15, %v2772_v59  ;;  %v2774_v16 = vrot.slane %v2588_v12, 4 }
 0x1d3   :  { %v6595_v8 = vadd.f32 %v2769_v3, %v2323_v2  ;;  %v2325_v11 = vadd.f32 %v2180_v20, %v6265_v45  ;;  %v2182_v38 = vsel %vm2144_vm3, %v2177_v1, %v2181_v0 }
 0x1d4   :  { %v6599_v62 = vadd.f32 %v2771_v24, %v2324_v14  ;;  %v2326_v32 = vadd.f32 %v2182_v38, %v6267_v19  ;;  %v2775_v23 = vsel %vm2737_vm4, %v2770_v57, %v2774_v16 }
 0x1d5   :  { %v6603_v46 = vadd.f32 %v2773_v41, %v2325_v11  ;;  %v1999_v48 = vpop.f32.mrb[104].mxu1  ;;  %v2592_v39 = vpop.f32.mrb[104].mxu0 }
 0x1d6   :  { %v6605_v54 = vadd.f32 %v2775_v23, %v2326_v32  ;;  %v2183_v15 = vrot.slane %v1999_v48, 3  ;;  %v2776_v55 = vrot.slane %v2592_v39, 4  ;;  %v2001_v3 = vpop.f32.mrb[105].mxu1  ;;  %v2594_v12 = vpop.f32.mrb[105].mxu0 }
 0x1d7   :  { %v2185_v2 = vrot.slane %v2001_v3, 3  ;;  %v2778_v45 = vrot.slane %v2594_v12, 4  ;;  %v2003_v43 = vpop.f32.mrb[106].mxu1  ;;  %v2596_v1 = vpop.f32.mrb[106].mxu0 }
 0x1d8   :  { %v2184_v24 = vsel %vm2144_vm3, %v2179_v22, %v2183_v15  ;;  %v2777_v19 = vsel %vm2737_vm4, %v2772_v59, %v2776_v55  ;;  %v2187_v14 = vrot.slane %v2003_v43, 3  ;;  %v2780_v57 = vrot.slane %v2596_v1, 4  ;;  %v2005_v20 = vpop.f32.mrb[107].mxu1  ;;  %v2598_v41 = vpop.f32.mrb[107].mxu0 }
 0x1d9   :  { %v2327_v11 = vadd.f32 %v2184_v24, %v6280_v13  ;;  %v2186_v38 = vsel %vm2144_vm3, %v2181_v0, %v2185_v2  ;;  %v2779_v32 = vsel %vm2737_vm4, %v2774_v16, %v2778_v45  ;;  %v2189_v23 = vrot.slane %v2005_v20, 3 }
 0x1da   :  { %v2328_v48 = vadd.f32 %v2186_v38, %v6289_v29  ;;  %v2188_v39 = vsel %vm2144_vm3, %v2183_v15, %v2187_v14  ;;  %v2781_v3 = vsel %vm2737_vm4, %v2776_v55, %v2780_v57  ;;  %v2782_v22 = vrot.slane %v2598_v41, 4 }
 0x1db   :  { %v6615_v12 = vadd.f32 %v2777_v19, %v2327_v11  ;;  %v2329_v59 = vadd.f32 %v2188_v39, %v6293_v21  ;;  %v2190_v43 = vsel %vm2144_vm3, %v2185_v2, %v2189_v23 }
 0x1dc   :  { %v6619_v1 = vadd.f32 %v2779_v32, %v2328_v48  ;;  %v2330_v13 = vadd.f32 %v2190_v43, %v6295_v4  ;;  %v2783_v0 = vsel %vm2737_vm4, %v2778_v45, %v2782_v22 }
 0x1dd   :  { %v6623_v16 = vadd.f32 %v2781_v3, %v2329_v59  ;;  %v2009_v29 = vpop.f32.mrb[108].mxu1  ;;  %v2602_v24 = vpop.f32.mrb[108].mxu0 }
 0x1de   :  { %v6625_v15 = vadd.f32 %v2783_v0, %v2330_v13  ;;  %v2191_v55 = vrot.slane %v2009_v29, 3  ;;  %v2784_v20 = vrot.slane %v2602_v24, 4  ;;  %v2011_v19 = vpop.f32.mrb[109].mxu1  ;;  %v2604_v41 = vpop.f32.mrb[109].mxu0 }
 0x1df   :  { %v2193_v11 = vrot.slane %v2011_v19, 3  ;;  %v2786_v21 = vrot.slane %v2604_v41, 4  ;;  %v2013_v38 = vpop.f32.mrb[110].mxu1  ;;  %v2606_v2 = vpop.f32.mrb[110].mxu0 }
 0x1e0   :  { %v2192_v32 = vsel %vm2144_vm3, %v2187_v14, %v2191_v55  ;;  %v2785_v4 = vsel %vm2737_vm4, %v2780_v57, %v2784_v20  ;;  %v2195_v48 = vrot.slane %v2013_v38, 3  ;;  %v2788_v45 = vrot.slane %v2606_v2, 4  ;;  %v2015_v39 = vpop.f32.mrb[111].mxu1  ;;  %v2608_v3 = vpop.f32.mrb[111].mxu0 }
 0x1e1   :  { %v2331_v59 = vadd.f32 %v2192_v32, %v6308_v36  ;;  %v2194_v43 = vsel %vm2144_vm3, %v2189_v23, %v2193_v11  ;;  %v2787_v13 = vsel %vm2737_vm4, %v2782_v22, %v2786_v21  ;;  %v2197_v0 = vrot.slane %v2015_v39, 3 }
 0x1e2   :  { %v2332_v29 = vadd.f32 %v2194_v43, %v6317_v33  ;;  %v2196_v24 = vsel %vm2144_vm3, %v2191_v55, %v2195_v48  ;;  %v2789_v19 = vsel %vm2737_vm4, %v2784_v20, %v2788_v45  ;;  %v2790_v14 = vrot.slane %v2608_v3, 4 }
 0x1e3   :  { %v6635_v41 = vadd.f32 %v2785_v4, %v2331_v59  ;;  %v2333_v57 = vadd.f32 %v2196_v24, %v6321_v37  ;;  %v2198_v38 = vsel %vm2144_vm3, %v2193_v11, %v2197_v0 }
 0x1e4   :  { %v6639_v2 = vadd.f32 %v2787_v13, %v2332_v29  ;;  %v2334_v36 = vadd.f32 %v2198_v38, %v6323_v17  ;;  %v2791_v23 = vsel %vm2737_vm4, %v2786_v21, %v2790_v14 }
 0x1e5   :  { %v6643_v22 = vadd.f32 %v2789_v19, %v2333_v57  ;;  %v2019_v33 = vpop.f32.mrb[112].mxu1  ;;  %v2612_v32 = vpop.f32.mrb[112].mxu0 }
 0x1e6   :  { %v6645_v55 = vadd.f32 %v2791_v23, %v2334_v36  ;;  %v2199_v20 = vrot.slane %v2019_v33, 3  ;;  %v2792_v39 = vrot.slane %v2612_v32, 4  ;;  %v2021_v4 = vpop.f32.mrb[113].mxu1  ;;  %v2614_v3 = vpop.f32.mrb[113].mxu0 }
 0x1e7   :  { %v2201_v59 = vrot.slane %v2021_v4, 3  ;;  %v2794_v37 = vrot.slane %v2614_v3, 4  ;;  %v2023_v43 = vpop.f32.mrb[114].mxu1  ;;  %v2616_v11 = vpop.f32.mrb[114].mxu0 }
 0x1e8   :  { %v2200_v13 = vsel %vm2144_vm3, %v2195_v48, %v2199_v20  ;;  %v2793_v17 = vsel %vm2737_vm4, %v2788_v45, %v2792_v39  ;;  %v2203_v29 = vrot.slane %v2023_v43, 3  ;;  %v2796_v21 = vrot.slane %v2616_v11, 4  ;;  %v2025_v24 = vpop.f32.mrb[115].mxu1  ;;  %v2618_v19 = vpop.f32.mrb[115].mxu0 }
 0x1e9   :  { %v2335_v57 = vadd.f32 %v2200_v13, %v6336_v30  ;;  %v2202_v38 = vsel %vm2144_vm3, %v2197_v0, %v2201_v59  ;;  %v2795_v36 = vsel %vm2737_vm4, %v2790_v14, %v2794_v37  ;;  %v2205_v23 = vrot.slane %v2025_v24, 3 }
 0x1ea   :  { %v2336_v33 = vadd.f32 %v2202_v38, %v6344_v10  ;;  %v2204_v32 = vsel %vm2144_vm3, %v2199_v20, %v2203_v29  ;;  %v2797_v4 = vsel %vm2737_vm4, %v2792_v39, %v2796_v21  ;;  %v2798_v48 = vrot.slane %v2618_v19, 4 }
 0x1eb   :  { %v6655_v3 = vadd.f32 %v2793_v17, %v2335_v57  ;;  %v2337_v45 = vadd.f32 %v2204_v32, %v6348_v31  ;;  %v2206_v43 = vsel %vm2144_vm3, %v2201_v59, %v2205_v23 }
 0x1ec   :  { %v6659_v11 = vadd.f32 %v2795_v36, %v2336_v33  ;;  %v2338_v30 = vadd.f32 %v2206_v43, %v6350_v51  ;;  %v2799_v0 = vsel %vm2737_vm4, %v2794_v37, %v2798_v48 }
 0x1ed   :  { %v6663_v14 = vadd.f32 %v2797_v4, %v2337_v45  ;;  %v2029_v10 = vpop.f32.mrb[116].mxu1  ;;  %v2622_v13 = vpop.f32.mrb[116].mxu0 }
 0x1ee   :  { %v6665_v20 = vadd.f32 %v2799_v0, %v2338_v30  ;;  %v2207_v39 = vrot.slane %v2029_v10, 3  ;;  %v2800_v24 = vrot.slane %v2622_v13, 4  ;;  %v2031_v17 = vpop.f32.mrb[117].mxu1  ;;  %v2624_v19 = vpop.f32.mrb[117].mxu0 }
 0x1ef   :  { %v2209_v57 = vrot.slane %v2031_v17, 3  ;;  %v2802_v31 = vrot.slane %v2624_v19, 4  ;;  %v2033_v38 = vpop.f32.mrb[118].mxu1  ;;  %v2626_v59 = vpop.f32.mrb[118].mxu0 }
 0x1f0   :  { %v2208_v36 = vsel %vm2144_vm3, %v2203_v29, %v2207_v39  ;;  %v2801_v51 = vsel %vm2737_vm4, %v2796_v21, %v2800_v24  ;;  %v2211_v33 = vrot.slane %v2033_v38, 3  ;;  %v2804_v37 = vrot.slane %v2626_v59, 4  ;;  %v2035_v32 = vpop.f32.mrb[119].mxu1  ;;  %v2628_v4 = vpop.f32.mrb[119].mxu0 }
 0x1f1   :  { %v2339_v45 = vadd.f32 %v2208_v36, %v6362_v7  ;;  %v2210_v43 = vsel %vm2144_vm3, %v2205_v23, %v2209_v57  ;;  %v2803_v30 = vsel %vm2737_vm4, %v2798_v48, %v2802_v31  ;;  %v2213_v0 = vrot.slane %v2035_v32, 3 }
 0x1f2   :  { %v2340_v10 = vadd.f32 %v2210_v43, %v6370_v60  ;;  %v2212_v13 = vsel %vm2144_vm3, %v2207_v39, %v2211_v33  ;;  %v2805_v17 = vsel %vm2737_vm4, %v2800_v24, %v2804_v37  ;;  %v2806_v29 = vrot.slane %v2628_v4, 4 }
 0x1f3   :  { %v6675_v19 = vadd.f32 %v2801_v51, %v2339_v45  ;;  %v2341_v21 = vadd.f32 %v2212_v13, %v6374_v25  ;;  %v2214_v38 = vsel %vm2144_vm3, %v2209_v57, %v2213_v0 }
 0x1f4   :  { %v6679_v59 = vadd.f32 %v2803_v30, %v2340_v10  ;;  %v2342_v7 = vadd.f32 %v2214_v38, %v6376_v35  ;;  %v2807_v23 = vsel %vm2737_vm4, %v2802_v31, %v2806_v29 }
 0x1f5   :  { %v6683_v48 = vadd.f32 %v2805_v17, %v2341_v21  ;;  %v2039_v60 = vpop.f32.mrb[120].mxu1  ;;  %v2632_v36 = vpop.f32.mrb[120].mxu0 }
 0x1f6   :  { %v6685_v39 = vadd.f32 %v2807_v23, %v2342_v7  ;;  %v2215_v24 = vrot.slane %v2039_v60, 3  ;;  %v2808_v32 = vrot.slane %v2632_v36, 4  ;;  %v2041_v51 = vpop.f32.mrb[121].mxu1  ;;  %v2634_v4 = vpop.f32.mrb[121].mxu0 }
 0x1f7   :  { %v2217_v45 = vrot.slane %v2041_v51, 3  ;;  %v2810_v25 = vrot.slane %v2634_v4, 4  ;;  %v2043_v43 = vpop.f32.mrb[122].mxu1  ;;  %v2636_v57 = vpop.f32.mrb[122].mxu0 }
 0x1f8   :  { %v2216_v30 = vsel %vm2144_vm3, %v2211_v33, %v2215_v24  ;;  %v2809_v35 = vsel %vm2737_vm4, %v2804_v37, %v2808_v32  ;;  %v2219_v10 = vrot.slane %v2043_v43, 3  ;;  %v2812_v31 = vrot.slane %v2636_v57, 4  ;;  %v2045_v13 = vpop.f32.mrb[123].mxu1  ;;  %v2638_v17 = vpop.f32.mrb[123].mxu0 }
 0x1f9   :  { %v2343_v21 = vadd.f32 %v2216_v30, %v6388_v56  ;;  %v2218_v38 = vsel %vm2144_vm3, %v2213_v0, %v2217_v45  ;;  %v2811_v7 = vsel %vm2737_vm4, %v2806_v29, %v2810_v25  ;;  %v2221_v23 = vrot.slane %v2045_v13, 3 }
 0x1fa   :  { %v2344_v60 = vadd.f32 %v2218_v38, %v6396_v27  ;;  %v2220_v36 = vsel %vm2144_vm3, %v2215_v24, %v2219_v10  ;;  %v2813_v51 = vsel %vm2737_vm4, %v2808_v32, %v2812_v31  ;;  %v2814_v33 = vrot.slane %v2638_v17, 4 }
 0x1fb   :  { %v6695_v4 = vadd.f32 %v2809_v35, %v2343_v21  ;;  %v2345_v37 = vadd.f32 %v2220_v36, %v6400_v61  ;;  %v2222_v43 = vsel %vm2144_vm3, %v2217_v45, %v2221_v23 }
 0x1fc   :  { %v6699_v57 = vadd.f32 %v2811_v7, %v2344_v60  ;;  %v2346_v56 = vadd.f32 %v2222_v43, %v6402_v44  ;;  %v2815_v0 = vsel %vm2737_vm4, %v2810_v25, %v2814_v33 }
 0x1fd   :  { %v6703_v29 = vadd.f32 %v2813_v51, %v2345_v37  ;;  %v2049_v27 = vpop.f32.mrb[124].mxu1  ;;  %v2642_v30 = vpop.f32.mrb[124].mxu0  ;;  %v7328_v37 = vld [vmem:[#allocation5_spill] sm:$0xff] }
 0x1fe   :  { %7325 = vst [vmem:[#allocation16_spill] sm:$0xff] %v6699_v57  ;;  %v6705_v24 = vadd.f32 %v2815_v0, %v2346_v56  ;;  %v2223_v32 = vrot.slane %v2049_v27, 3  ;;  %v2816_v13 = vrot.slane %v2642_v30, 4  ;;  %v2051_v35 = vpop.f32.mrb[125].mxu1  ;;  %v2644_v17 = vpop.f32.mrb[125].mxu0  ;;  %v7329_v30 = vld [vmem:[#allocation2_spill] sm:$0xff] }
 0x1ff   :  { %7326 = vst [vmem:[#allocation17_spill] sm:$0xff] %v6703_v29  ;;  %v2225_v21 = vrot.slane %v2051_v35, 3  ;;  %v2818_v61 = vrot.slane %v2644_v17, 4  ;;  %v2053_v38 = vpop.f32.mrb[126].mxu1  ;;  %v2646_v45 = vpop.f32.mrb[126].mxu0 }
 0x200   :  { %7327 = vst [vmem:[#allocation18_spill] sm:$0xff] %v6705_v24  ;;  %v2224_v7 = vsel %vm2144_vm3, %v2219_v10, %v2223_v32  ;;  %v2817_v44 = vsel %vm2737_vm4, %v2812_v31, %v2816_v13  ;;  %v2227_v60 = vrot.slane %v2053_v38, 3  ;;  %v2820_v25 = vrot.slane %v2646_v45, 4  ;;  %v2055_v36 = vpop.f32.mrb[127].mxu1  ;;  %v2648_v51 = vpop.f32.mrb[127].mxu0  ;;  %v7331_v31 = vld [vmem:[#allocation3_spill] sm:$0xff] }
 0x201   :  { %v2347_v43 = vadd.f32 %v2224_v7, %v7328_v37  ;;  %v2226_v56 = vsel %vm2144_vm3, %v2221_v23, %v2225_v21  ;;  %v2819_v0 = vsel %vm2737_vm4, %v2814_v33, %v2818_v61  ;;  %v2229_v27 = vrot.slane %v2055_v36, 3  ;;  %v7333_v7 = vld [vmem:[#allocation4_spill] sm:$0xff] }
 0x202   :  { %v2348_v35 = vadd.f32 %v2226_v56, %v7329_v30  ;;  %v2228_v17 = vsel %vm2144_vm3, %v2223_v32, %v2227_v60  ;;  %v2821_v24 = vsel %vm2737_vm4, %v2816_v13, %v2820_v25  ;;  %v2822_v10 = vrot.slane %v2648_v51, 4 }
 0x203   :  { %v6715_v29 = vadd.f32 %v2817_v44, %v2347_v43  ;;  %v2349_v38 = vadd.f32 %v2228_v17, %v7331_v31  ;;  %v2230_v45 = vsel %vm2144_vm3, %v2225_v21, %v2229_v27 }
 0x204   :  { %v6719_v57 = vadd.f32 %v2819_v0, %v2348_v35  ;;  %v2350_v23 = vadd.f32 %v2230_v45, %v7333_v7  ;;  %v2823_v33 = vsel %vm2737_vm4, %v2818_v61, %v2822_v10  ;;  %v7336_v7 = vld [vmem:[#allocation10_spill] sm:$0xff] }
 0x205   :  { %7330 = vst [vmem:[#allocation19_spill] sm:$0xff] %v6715_v29  ;;  %v6723_v36 = vadd.f32 %v2821_v24, %v2349_v38  ;;  %v2059_v37 = vpop.f32.mrb[128].mxu1  ;;  %v2652_v56 = vpop.f32.mrb[128].mxu0 }
 0x206   :  { %7332 = vst [vmem:[#allocation20_spill] sm:$0xff] %v6719_v57  ;;  %v6725_v32 = vadd.f32 %v2823_v33, %v2350_v23  ;;  %v2231_v13 = vrot.slane %v2059_v37, 3  ;;  %v2824_v51 = vrot.slane %v2652_v56, 4  ;;  %v2061_v44 = vpop.f32.mrb[129].mxu1  ;;  %v2654_v43 = vpop.f32.mrb[129].mxu0  ;;  %v7337_v56 = vld [vmem:[#allocation6_spill] sm:$0xff] }
 0x207   :  { %7334 = vst [vmem:[#allocation21_spill] sm:$0xff] %v6723_v36  ;;  %v2233_v30 = vrot.slane %v2061_v44, 3  ;;  %v2826_v17 = vrot.slane %v2654_v43, 4  ;;  %v2063_v31 = vpop.f32.mrb[130].mxu1  ;;  %v2656_v21 = vpop.f32.mrb[130].mxu0 }
 0x208   :  { %7335 = vst [vmem:[#allocation5_spill] sm:$0xff] %v6725_v32  ;;  %v2232_v0 = vsel %vm2144_vm3, %v2227_v60, %v2231_v13  ;;  %v2825_v35 = vsel %vm2737_vm4, %v2820_v25, %v2824_v51  ;;  %v2235_v45 = vrot.slane %v2063_v31, 3  ;;  %v2828_v61 = vrot.slane %v2656_v21, 4  ;;  %v2065_v24 = vpop.f32.mrb[131].mxu1  ;;  %v2658_v38 = vpop.f32.mrb[131].mxu0  ;;  %v7338_v25 = vld [vmem:[#allocation11_spill] sm:$0xff] }
 0x209   :  { %v2351_v36 = vadd.f32 %v2232_v0, %v7336_v7  ;;  %v2234_v23 = vsel %vm2144_vm3, %v2229_v27, %v2233_v30  ;;  %v2827_v33 = vsel %vm2737_vm4, %v2822_v10, %v2826_v17  ;;  %v2237_v37 = vrot.slane %v2065_v24, 3  ;;  %v7340_v0 = vld [vmem:[#allocation7_spill] sm:$0xff] }
 0x20a   :  { %v2352_v44 = vadd.f32 %v2234_v23, %v7337_v56  ;;  %v2236_v43 = vsel %vm2144_vm3, %v2231_v13, %v2235_v45  ;;  %v2829_v32 = vsel %vm2737_vm4, %v2824_v51, %v2828_v61  ;;  %v2830_v60 = vrot.slane %v2658_v38, 4 }
 0x20b   :  { %v6735_v57 = vadd.f32 %v2825_v35, %v2351_v36  ;;  %v2353_v31 = vadd.f32 %v2236_v43, %v7338_v25  ;;  %v2238_v21 = vsel %vm2144_vm3, %v2233_v30, %v2237_v37 }
 0x20c   :  { %v6739_v29 = vadd.f32 %v2827_v33, %v2352_v44  ;;  %v2354_v27 = vadd.f32 %v2238_v21, %v7340_v0  ;;  %v2831_v10 = vsel %vm2737_vm4, %v2826_v17, %v2830_v60  ;;  %v7343_v0 = vld [vmem:[#allocation8_spill] sm:$0xff] }
 0x20d   :  { %v6743_v24 = vadd.f32 %v2829_v32, %v2353_v31  ;;  %v2069_v7 = vpop.f32.mrb[132].mxu1  ;;  %v2662_v23 = vpop.f32.mrb[132].mxu0 }
 0x20e   :  { %7339 = vst [vmem:[#allocation2_spill] sm:$0xff] %v6739_v29  ;;  %v6745_v13 = vadd.f32 %v2831_v10, %v2354_v27  ;;  %v2239_v51 = vrot.slane %v2069_v7, 3  ;;  %v2832_v38 = vrot.slane %v2662_v23, 4  ;;  %v2071_v36 = vpop.f32.mrb[133].mxu1  ;;  %v2664_v35 = vpop.f32.mrb[133].mxu0 }
 0x20f   :  { %7341 = vst [vmem:[#allocation3_spill] sm:$0xff] %v6743_v24  ;;  %v2241_v56 = vrot.slane %v2071_v36, 3  ;;  %v2834_v43 = vrot.slane %v2664_v35, 4  ;;  %v2073_v25 = vpop.f32.mrb[134].mxu1  ;;  %v2666_v30 = vpop.f32.mrb[134].mxu0 }
 0x210   :  { %7342 = vst [vmem:[#allocation4_spill] sm:$0xff] %v6745_v13  ;;  %v2240_v33 = vsel %vm2144_vm3, %v2235_v45, %v2239_v51  ;;  %v2833_v44 = vsel %vm2737_vm4, %v2828_v61, %v2832_v38  ;;  %v2243_v21 = vrot.slane %v2073_v25, 3  ;;  %v2836_v17 = vrot.slane %v2666_v30, 4  ;;  %v2075_v32 = vpop.f32.mrb[135].mxu1  ;;  %v2668_v31 = vpop.f32.mrb[135].mxu0  ;;  %v7345_v61 = vld [vmem:[#allocation9_spill] sm:$0xff] }
 0x211   :  { %v2355_v24 = vadd.f32 %v2240_v33, %v7343_v0  ;;  %v2242_v27 = vsel %vm2144_vm3, %v2237_v37, %v2241_v56  ;;  %v2835_v10 = vsel %vm2737_vm4, %v2830_v60, %v2834_v43  ;;  %v2245_v7 = vrot.slane %v2075_v32, 3  ;;  %v7347_v33 = vld [vmem:[#allocation12_spill] sm:$0xff] }
 0x212   :  { %v2356_v23 = vadd.f32 %v2242_v27, %v6478_v42  ;;  %v2244_v36 = vsel %vm2144_vm3, %v2239_v51, %v2243_v21  ;;  %v2837_v35 = vsel %vm2737_vm4, %v2832_v38, %v2836_v17  ;;  %v2838_v45 = vrot.slane %v2668_v31, 4 }
 0x213   :  { %v6755_v13 = vadd.f32 %v2833_v44, %v2355_v24  ;;  %v2357_v25 = vadd.f32 %v2244_v36, %v7345_v61  ;;  %v2246_v30 = vsel %vm2144_vm3, %v2241_v56, %v2245_v7 }
 0x214   :  { %v6759_v29 = vadd.f32 %v2835_v10, %v2356_v23  ;;  %v2358_v37 = vadd.f32 %v2246_v30, %v7347_v33  ;;  %v2839_v60 = vsel %vm2737_vm4, %v2834_v43, %v2838_v45  ;;  %v4144_v10 = vlaneseq }
 0x215   :  { %7344 = vst [vmem:[#allocation10_spill] sm:$0xff] %v6755_v13  ;;  %v6763_v32 = vadd.f32 %v2837_v35, %v2357_v25  ;;  %v2079_v42 = vpop.f32.mrb[136].mxu1  ;;  %v2672_v0 = vpop.f32.mrb[136].mxu0 }
 0x216   :  { %7346 = vst [vmem:[#allocation6_spill] sm:$0xff] %v6759_v29  ;;  %v6765_v51 = vadd.f32 %v2839_v60, %v2358_v37  ;;  %v2247_v38 = vrot.slane %v2079_v42, 3  ;;  %v2840_v31 = vrot.slane %v2672_v0, 4  ;;  %v2081_v24 = vpop.f32.mrb[137].mxu1  ;;  %v2674_v44 = vpop.f32.mrb[137].mxu0  ;;  %v4145_v29 = vshrl.u32 %v4144_v10, 7 }
 0x217   :  { %7348 = vst [vmem:[#allocation11_spill] sm:$0xff] %v6763_v32  ;;  %v2249_v27 = vrot.slane %v2081_v24, 3  ;;  %v2842_v36 = vrot.slane %v2674_v44, 4  ;;  %v2083_v61 = vpop.f32.mrb[138].mxu1  ;;  %v2676_v56 = vpop.f32.mrb[138].mxu0 }
 0x218   :  { %7349 = vst [vmem:[#allocation7_spill] sm:$0xff] %v6765_v51  ;;  %v2248_v23 = vsel %vm2144_vm3, %v2243_v21, %v2247_v38  ;;  %v2841_v30 = vsel %vm2737_vm4, %v2836_v17, %v2840_v31  ;;  %v2251_v43 = vrot.slane %v2083_v61, 3  ;;  %v2844_v35 = vrot.slane %v2676_v56, 4  ;;  %v2085_v25 = vpop.f32.mrb[139].mxu1  ;;  %v2678_v33 = vpop.f32.mrb[139].mxu0  ;;  %v7351_v17 = vld [vmem:[#allocation13_spill] sm:$0xff] }
 0x219   :  { %v2359_v37 = vadd.f32 %v2248_v23, %v6497_v49  ;;  %v2250_v60 = vsel %vm2144_vm3, %v2245_v7, %v2249_v27  ;;  %v2843_v42 = vsel %vm2737_vm4, %v2838_v45, %v2842_v36  ;;  %v2253_v0 = vrot.slane %v2085_v25, 3  ;;  %v7353_v7 = vld [vmem:[#allocation14_spill] sm:$0xff] }
 0x21a   :  { %v2360_v24 = vadd.f32 %v2250_v60, %v6506_v52  ;;  %v2252_v44 = vsel %vm2144_vm3, %v2247_v38, %v2251_v43  ;;  %v2845_v51 = vsel %vm2737_vm4, %v2840_v31, %v2844_v35  ;;  %v2846_v21 = vrot.slane %v2678_v33, 4 }
 0x21b   :  { %v6775_v32 = vadd.f32 %v2841_v30, %v2359_v37  ;;  %v2361_v61 = vadd.f32 %v2252_v44, %v7351_v17  ;;  %v2254_v56 = vsel %vm2144_vm3, %v2249_v27, %v2253_v0  ;;  %v4142_v37 = vld [vmem:[%s7262_s2] sm:$0x3]  ;;  %v4146_v60 = vsub.s32 0, %v4145_v29 }
 0x21c   :  { %v6779_v49 = vadd.f32 %v2843_v42, %v2360_v24  ;;  %v2362_v23 = vadd.f32 %v2254_v56, %v7353_v7  ;;  %v2847_v45 = vsel %vm2737_vm4, %v2842_v36, %v2846_v21  ;;  %v4150_v44 = vsub.s32 1, %v4145_v29  ;;  %v7356_v29 = vld [vmem:[#allocation15_spill] sm:$0xff] }
 0x21d   :  { %7350 = vst [vmem:[#allocation8_spill] sm:$0xff] %v6775_v32  ;;  %v6783_v25 = vadd.f32 %v2845_v51, %v2361_v61  ;;  %v3135_v52 = vpop.f32.mrb[140].mxu1  ;;  %v3728_v38 = vpop.f32.mrb[140].mxu0 }
 0x21e   :  { %7352 = vst [vmem:[#allocation9_spill] sm:$0xff] %v6779_v49  ;;  %v6785_v43 = vadd.f32 %v2847_v45, %v2362_v23  ;;  %v3924_v31 = vrot.slane %v3728_v38, 6  ;;  %v3137_v30 = vpop.f32.mrb[141].mxu1  ;;  %v3730_v35 = vpop.f32.mrb[141].mxu0  ;;  %v3331_v36 = vrot.slane %v3135_v52, 5  ;;  %v6796_v38 = vrot.slane %v4142_v37, %v4146_v60 }
 0x21f   :  { %7354 = vst [vmem:[#allocation12_spill] sm:$0xff] %v6783_v25  ;;  %v3927_v33 = vrot.slane %v3730_v35, 6  ;;  %v3139_v27 = vpop.f32.mrb[142].mxu1  ;;  %v3732_v10 = vpop.f32.mrb[142].mxu0  ;;  %v3334_v21 = vrot.slane %v3137_v30, 5 }
 0x220   :  { %7355 = vst [vmem:[#allocation13_spill] sm:$0xff] %v6785_v43  ;;  %v3332_v51 = vrot.slane %v3139_v27, 5  ;;  %v3925_v42 = vrot.slane %v3732_v10, 6  ;;  %v3141_v0 = vpop.f32.mrb[143].mxu1  ;;  %v3734_v24 = vpop.f32.mrb[143].mxu0  ;;  %v6801_v27 = vrot.slane %v4142_v37, %v4150_v44 }
 0x221   :  { %v3335_v17 = vrot.slane %v3141_v0, 5  ;;  %v3928_v61 = vrot.slane %v3734_v24, 6  ;;  %v4208_v23 = vld [vmem:[%s7263_s3] sm:$0x3] }
 0x222   :  { %v3333_v56 = vsel %vm3330_vm5, %v3331_v36, %v3332_v51  ;;  %v3926_v7 = vsel %vm3923_vm6, %v3924_v31, %v3925_v42  ;;  %v6803_v36 = vrot.slane %v4208_v23, %v4146_v60  ;;  %v6805_v43 = vrot.slane %v4208_v23, %v4150_v44 }
 0x223   :  { %v3495_v45 = vadd.f32 %v3333_v56, %v6523_v53  ;;  %v3336_v52 = vsel %vm3330_vm5, %v3334_v21, %v3335_v17  ;;  %v3929_v35 = vsel %vm3923_vm6, %v3927_v33, %v3928_v61 }
 0x224   :  { %v3496_v30 = vadd.f32 %v3336_v52, %v7356_v29 }
 0x225   :  { %v4088_v10 = vadd.f32 %v3926_v7, %v3495_v45  ;;  %v3145_v31 = vpop.f32.mrb[144].mxu1  ;;  %v3738_v0 = vpop.f32.mrb[144].mxu0 }
 0x226   :  { %v4089_v24 = vadd.f32 %v3929_v35, %v3496_v30  ;;  %v3337_v25 = vrot.slane %v3145_v31, 5  ;;  %v3930_v53 = vrot.slane %v3738_v0, 6  ;;  %v3147_v56 = vpop.f32.mrb[145].mxu1  ;;  %v3740_v49 = vpop.f32.mrb[145].mxu0 }
 0x227   :  { %v4154_v21 = vmul.f32 %v6796_v38, %v4088_v10  ;;  %v3339_v32 = vrot.slane %v3147_v56, 5  ;;  %v3932_v33 = vrot.slane %v3740_v49, 6  ;;  %v3149_v13 = vpop.f32.mrb[146].mxu1  ;;  %v3742_v52 = vpop.f32.mrb[146].mxu0 }
 0x228   :  { %v4155_v37 = vmul.f32 %v6801_v27, %v4089_v24  ;;  %v3338_v60 = vsel %vm3330_vm5, %v3332_v51, %v3337_v25  ;;  %v3931_v7 = vsel %vm3923_vm6, %v3925_v42, %v3930_v53  ;;  %v3341_v45 = vrot.slane %v3149_v13, 5  ;;  %v3151_v35 = vpop.f32.mrb[147].mxu1  ;;  %v3744_v44 = vpop.f32.mrb[147].mxu0 }
 0x229   :  { %v4220_v23 = vadd.f32 %v6803_v36, %v4154_v21  ;;  %v3497_v29 = vadd.f32 %v3338_v60, %v6535_v5  ;;  %v3340_v30 = vsel %vm3330_vm5, %v3335_v17, %v3339_v32  ;;  %v3933_v10 = vsel %vm3923_vm6, %v3928_v61, %v3932_v33 }
 0x22a   :  { %v4221_v49 = vadd.f32 %v6805_v43, %v4155_v37  ;;  %v3498_v31 = vadd.f32 %v3340_v30, %v6539_v63  ;;  %v3342_v0 = vsel %vm3330_vm5, %v3337_v25, %v3341_v45  ;;  %v3934_v51 = vrot.slane %v3742_v52, 6 }
 0x22b   :  { %4274 = vst [vmem:[%s7264_s4] sm:$0xff] %v4220_v23  ;;  %v4090_v13 = vadd.f32 %v3931_v7, %v3497_v29  ;;  %v3499_v42 = vadd.f32 %v3342_v0, %v6543_v26  ;;  %v3343_v24 = vrot.slane %v3151_v35, 5  ;;  %v3936_v5 = vrot.slane %v3744_v44, 6 }
 0x22c   :  { %4275 = vst.msk [vmem:[%s7264_s4 + $0x8] sm:$0xff] %vm316_vm0, %v4221_v49  ;;  %v4091_v17 = vadd.f32 %v3933_v10, %v3498_v31  ;;  %v3935_v63 = vsel %vm3923_vm6, %v3930_v53, %v3934_v51 }
 0x22d   :  { %v4156_v25 = vmul.f32 %v6796_v38, %v4090_v13  ;;  %v4092_v61 = vadd.f32 %v3935_v63, %v3499_v42  ;;  %v3344_v56 = vsel %vm3330_vm5, %v3339_v32, %v3343_v24  ;;  %v3937_v21 = vsel %vm3923_vm6, %v3932_v33, %v3936_v5  ;;  %v3155_v52 = vpop.f32.mrb[148].mxu1  ;;  %v3748_v37 = vpop.f32.mrb[148].mxu0 }
 0x22e   :  { %v4157_v26 = vmul.f32 %v6801_v27, %v4091_v17  ;;  %v3500_v60 = vadd.f32 %v3344_v56, %v6545_v40  ;;  %v3345_v7 = vrot.slane %v3155_v52, 5  ;;  %v3938_v35 = vrot.slane %v3748_v37, 6  ;;  %v3157_v44 = vpop.f32.mrb[149].mxu1  ;;  %v3750_v23 = vpop.f32.mrb[149].mxu0 }
 0x22f   :  { %v4222_v29 = vadd.f32 %v6803_v36, %v4156_v25  ;;  %v4158_v53 = vmul.f32 %v6796_v38, %v4092_v61  ;;  %v3347_v30 = vrot.slane %v3157_v44, 5  ;;  %v3940_v10 = vrot.slane %v3750_v23, 6  ;;  %v3159_v49 = vpop.f32.mrb[150].mxu1  ;;  %v3752_v32 = vpop.f32.mrb[150].mxu0 }
 0x230   :  { %v4223_v33 = vadd.f32 %v6805_v43, %v4157_v26  ;;  %v4093_v31 = vadd.f32 %v3937_v21, %v3500_v60  ;;  %v3346_v0 = vsel %vm3330_vm5, %v3341_v45, %v3345_v7  ;;  %v3939_v13 = vsel %vm3923_vm6, %v3934_v51, %v3938_v35  ;;  %v3161_v40 = vpop.f32.mrb[151].mxu1  ;;  %v3754_v42 = vpop.f32.mrb[151].mxu0 }
 0x231   :  { %4276 = vst [vmem:[%s7264_s4 + $0x10] sm:$0xff] %v4222_v29  ;;  %v4224_v17 = vadd.f32 %v6803_v36, %v4158_v53  ;;  %v3501_v63 = vadd.f32 %v3346_v0, %v6555_v28  ;;  %v3348_v25 = vsel %vm3330_vm5, %v3343_v24, %v3347_v30  ;;  %v3941_v61 = vsel %vm3923_vm6, %v3936_v5, %v3940_v10 }
 0x232   :  { %4277 = vst.msk [vmem:[%s7264_s4 + $0x18] sm:$0xff] %vm316_vm0, %v4223_v33  ;;  %v4159_v45 = vmul.f32 %v6801_v27, %v4093_v31  ;;  %v3502_v51 = vadd.f32 %v3348_v25, %v6559_v58  ;;  %v3349_v56 = vrot.slane %v3159_v49, 5  ;;  %v3942_v21 = vrot.slane %v3752_v32, 6 }
 0x233   :  { %4278 = vst [vmem:[%s7264_s4 + $0x20] sm:$0xff] %v4224_v17  ;;  %v4094_v28 = vadd.f32 %v3939_v13, %v3501_v63  ;;  %v3351_v52 = vrot.slane %v3161_v40, 5  ;;  %v3944_v24 = vrot.slane %v3754_v42, 6 }
 0x234   :  { %v4225_v5 = vadd.f32 %v6805_v43, %v4159_v45  ;;  %v4095_v37 = vadd.f32 %v3941_v61, %v3502_v51  ;;  %v3350_v26 = vsel %vm3330_vm5, %v3345_v7, %v3349_v56  ;;  %v3943_v60 = vsel %vm3923_vm6, %v3938_v35, %v3942_v21 }
 0x235   :  { %v4160_v44 = vmul.f32 %v6796_v38, %v4094_v28  ;;  %v3503_v58 = vadd.f32 %v3350_v26, %v6563_v47  ;;  %v3352_v23 = vsel %vm3330_vm5, %v3347_v30, %v3351_v52  ;;  %v3945_v29 = vsel %vm3923_vm6, %v3940_v10, %v3944_v24  ;;  %v3165_v53 = vpop.f32.mrb[152].mxu1  ;;  %v3758_v49 = vpop.f32.mrb[152].mxu0 }
 0x236   :  { %4279 = vst.msk [vmem:[%s7264_s4 + $0x28] sm:$0xff] %vm316_vm0, %v4225_v5  ;;  %v4161_v32 = vmul.f32 %v6801_v27, %v4095_v37  ;;  %v3504_v7 = vadd.f32 %v3352_v23, %v6565_v34  ;;  %v3353_v35 = vrot.slane %v3165_v53, 5  ;;  %v3946_v33 = vrot.slane %v3758_v49, 6  ;;  %v3167_v31 = vpop.f32.mrb[153].mxu1  ;;  %v3760_v0 = vpop.f32.mrb[153].mxu0 }
 0x237   :  { %v4226_v47 = vadd.f32 %v6803_v36, %v4160_v44  ;;  %v4096_v30 = vadd.f32 %v3943_v60, %v3503_v58  ;;  %v3355_v13 = vrot.slane %v3167_v31, 5  ;;  %v3948_v10 = vrot.slane %v3760_v0, 6  ;;  %v3169_v40 = vpop.f32.mrb[154].mxu1  ;;  %v3762_v42 = vpop.f32.mrb[154].mxu0 }
 0x238   :  { %v4227_v17 = vadd.f32 %v6805_v43, %v4161_v32  ;;  %v4097_v63 = vadd.f32 %v3945_v29, %v3504_v7  ;;  %v3354_v25 = vsel %vm3330_vm5, %v3349_v56, %v3353_v35  ;;  %v3947_v61 = vsel %vm3923_vm6, %v3942_v21, %v3946_v33  ;;  %v3171_v45 = vpop.f32.mrb[155].mxu1  ;;  %v3764_v34 = vpop.f32.mrb[155].mxu0 }
 0x239   :  { %4280 = vst [vmem:[%s7264_s4 + $0x30] sm:$0xff] %v4226_v47  ;;  %v4162_v51 = vmul.f32 %v6796_v38, %v4096_v30  ;;  %v3505_v28 = vadd.f32 %v3354_v25, %v6575_v50  ;;  %v3356_v5 = vsel %vm3330_vm5, %v3351_v52, %v3355_v13  ;;  %v3949_v37 = vsel %vm3923_vm6, %v3944_v24, %v3948_v10 }
 0x23a   :  { %4281 = vst.msk [vmem:[%s7264_s4 + $0x38] sm:$0xff] %vm316_vm0, %v4227_v17  ;;  %v4163_v56 = vmul.f32 %v6801_v27, %v4097_v63  ;;  %v3506_v21 = vadd.f32 %v3356_v5, %v6579_v18  ;;  %v3357_v26 = vrot.slane %v3169_v40, 5  ;;  %v3950_v60 = vrot.slane %v3762_v42, 6 }
 0x23b   :  { %v4228_v44 = vadd.f32 %v6803_v36, %v4162_v51  ;;  %v4098_v58 = vadd.f32 %v3947_v61, %v3505_v28  ;;  %v3359_v23 = vrot.slane %v3171_v45, 5  ;;  %v3952_v50 = vrot.slane %v3764_v34, 6 }
 0x23c   :  { %v4229_v52 = vadd.f32 %v6805_v43, %v4163_v56  ;;  %v4099_v29 = vadd.f32 %v3949_v37, %v3506_v21  ;;  %v3358_v24 = vsel %vm3330_vm5, %v3353_v35, %v3357_v26  ;;  %v3951_v53 = vsel %vm3923_vm6, %v3946_v33, %v3950_v60 }
 0x23d   :  { %4282 = vst [vmem:[%s7264_s4 + $0x40] sm:$0xff] %v4228_v44  ;;  %v4164_v18 = vmul.f32 %v6796_v38, %v4098_v58  ;;  %v3507_v49 = vadd.f32 %v3358_v24, %v6583_v9  ;;  %v3360_v32 = vsel %vm3330_vm5, %v3355_v13, %v3359_v23  ;;  %v3953_v7 = vsel %vm3923_vm6, %v3948_v10, %v3952_v50  ;;  %v3175_v31 = vpop.f32.mrb[156].mxu1  ;;  %v3768_v0 = vpop.f32.mrb[156].mxu0 }
 0x23e   :  { %4283 = vst.msk [vmem:[%s7264_s4 + $0x48] sm:$0xff] %vm316_vm0, %v4229_v52  ;;  %v4165_v35 = vmul.f32 %v6801_v27, %v4099_v29  ;;  %v3508_v33 = vadd.f32 %v3360_v32, %v6585_v6  ;;  %v3361_v47 = vrot.slane %v3175_v31, 5  ;;  %v3954_v30 = vrot.slane %v3768_v0, 6  ;;  %v3177_v40 = vpop.f32.mrb[157].mxu1  ;;  %v3770_v42 = vpop.f32.mrb[157].mxu0 }
 0x23f   :  { %v4230_v9 = vadd.f32 %v6803_v36, %v4164_v18  ;;  %v4100_v13 = vadd.f32 %v3951_v53, %v3507_v49  ;;  %v3363_v17 = vrot.slane %v3177_v40, 5  ;;  %v3956_v10 = vrot.slane %v3770_v42, 6  ;;  %v3179_v63 = vpop.f32.mrb[158].mxu1  ;;  %v3772_v25 = vpop.f32.mrb[158].mxu0 }
 0x240   :  { %v4231_v61 = vadd.f32 %v6805_v43, %v4165_v35  ;;  %v4101_v45 = vadd.f32 %v3953_v7, %v3508_v33  ;;  %v3362_v34 = vsel %vm3330_vm5, %v3357_v26, %v3361_v47  ;;  %v3955_v51 = vsel %vm3923_vm6, %v3950_v60, %v3954_v30  ;;  %v3181_v28 = vpop.f32.mrb[159].mxu1  ;;  %v3774_v6 = vpop.f32.mrb[159].mxu0 }
 0x241   :  { %4284 = vst [vmem:[%s7264_s4 + $0x50] sm:$0xff] %v4230_v9  ;;  %v4166_v5 = vmul.f32 %v6796_v38, %v4100_v13  ;;  %v3509_v37 = vadd.f32 %v3362_v34, %v6595_v8  ;;  %v3364_v56 = vsel %vm3330_vm5, %v3359_v23, %v3363_v17  ;;  %v3957_v21 = vsel %vm3923_vm6, %v3952_v50, %v3956_v10 }
 0x242   :  { %4285 = vst.msk [vmem:[%s7264_s4 + $0x58] sm:$0xff] %vm316_vm0, %v4231_v61  ;;  %v4167_v26 = vmul.f32 %v6801_v27, %v4101_v45  ;;  %v3510_v60 = vadd.f32 %v3364_v56, %v6599_v62  ;;  %v3365_v44 = vrot.slane %v3179_v63, 5  ;;  %v3958_v58 = vrot.slane %v3772_v25, 6 }
 0x243   :  { %v4232_v52 = vadd.f32 %v6803_v36, %v4166_v5  ;;  %v4102_v29 = vadd.f32 %v3955_v51, %v3509_v37  ;;  %v3367_v24 = vrot.slane %v3181_v28, 5  ;;  %v3960_v8 = vrot.slane %v3774_v6, 6 }
 0x244   :  { %v4233_v23 = vadd.f32 %v6805_v43, %v4167_v26  ;;  %v4103_v53 = vadd.f32 %v3957_v21, %v3510_v60  ;;  %v3366_v50 = vsel %vm3330_vm5, %v3361_v47, %v3365_v44  ;;  %v3959_v18 = vsel %vm3923_vm6, %v3954_v30, %v3958_v58 }
 0x245   :  { %4286 = vst [vmem:[%s7264_s4 + $0x60] sm:$0xff] %v4232_v52  ;;  %v4168_v62 = vmul.f32 %v6796_v38, %v4102_v29  ;;  %v3511_v49 = vadd.f32 %v3366_v50, %v6603_v46  ;;  %v3368_v32 = vsel %vm3330_vm5, %v3363_v17, %v3367_v24  ;;  %v3961_v7 = vsel %vm3923_vm6, %v3956_v10, %v3960_v8  ;;  %v3185_v31 = vpop.f32.mrb[160].mxu1  ;;  %v3778_v0 = vpop.f32.mrb[160].mxu0 }
 0x246   :  { %4287 = vst.msk [vmem:[%s7264_s4 + $0x68] sm:$0xff] %vm316_vm0, %v4233_v23  ;;  %v4169_v35 = vmul.f32 %v6801_v27, %v4103_v53  ;;  %v3512_v33 = vadd.f32 %v3368_v32, %v6605_v54  ;;  %v3369_v47 = vrot.slane %v3185_v31, 5  ;;  %v3962_v30 = vrot.slane %v3778_v0, 6  ;;  %v3187_v40 = vpop.f32.mrb[161].mxu1  ;;  %v3780_v42 = vpop.f32.mrb[161].mxu0 }
 0x247   :  { %v4234_v46 = vadd.f32 %v6803_v36, %v4168_v62  ;;  %v4104_v9 = vadd.f32 %v3959_v18, %v3511_v49  ;;  %v3371_v13 = vrot.slane %v3187_v40, 5  ;;  %v3964_v17 = vrot.slane %v3780_v42, 6  ;;  %v3189_v10 = vpop.f32.mrb[162].mxu1  ;;  %v3782_v63 = vpop.f32.mrb[162].mxu0 }
 0x248   :  { %v4235_v25 = vadd.f32 %v6805_v43, %v4169_v35  ;;  %v4105_v61 = vadd.f32 %v3961_v7, %v3512_v33  ;;  %v3370_v45 = vsel %vm3330_vm5, %v3365_v44, %v3369_v47  ;;  %v3963_v34 = vsel %vm3923_vm6, %v3958_v58, %v3962_v30  ;;  %v3191_v51 = vpop.f32.mrb[163].mxu1  ;;  %v3784_v54 = vpop.f32.mrb[163].mxu0 }
 0x249   :  { %4288 = vst [vmem:[%s7264_s4 + $0x70] sm:$0xff] %v4234_v46  ;;  %v4170_v28 = vmul.f32 %v6796_v38, %v4104_v9  ;;  %v3513_v6 = vadd.f32 %v3370_v45, %v6615_v12  ;;  %v3372_v5 = vsel %vm3330_vm5, %v3367_v24, %v3371_v13  ;;  %v3965_v37 = vsel %vm3923_vm6, %v3960_v8, %v3964_v17 }
 0x24a   :  { %4289 = vst.msk [vmem:[%s7264_s4 + $0x78] sm:$0xff] %vm316_vm0, %v4235_v25  ;;  %v4171_v56 = vmul.f32 %v6801_v27, %v4105_v61  ;;  %v3514_v21 = vadd.f32 %v3372_v5, %v6619_v1  ;;  %v3373_v26 = vrot.slane %v3189_v10, 5  ;;  %v3966_v60 = vrot.slane %v3782_v63, 6 }
 0x24b   :  { %v4236_v44 = vadd.f32 %v6803_v36, %v4170_v28  ;;  %v4106_v58 = vadd.f32 %v3963_v34, %v3513_v6  ;;  %v3375_v52 = vrot.slane %v3191_v51, 5  ;;  %v3968_v12 = vrot.slane %v3784_v54, 6 }
 0x24c   :  { %v4237_v29 = vadd.f32 %v6805_v43, %v4171_v56  ;;  %v4107_v24 = vadd.f32 %v3965_v37, %v3514_v21  ;;  %v3374_v8 = vsel %vm3330_vm5, %v3369_v47, %v3373_v26  ;;  %v3967_v23 = vsel %vm3923_vm6, %v3962_v30, %v3966_v60 }
 0x24d   :  { %4290 = vst [vmem:[%s7264_s4 + $0x80] sm:$0xff] %v4236_v44  ;;  %v4172_v1 = vmul.f32 %v6796_v38, %v4106_v58  ;;  %v3515_v53 = vadd.f32 %v3374_v8, %v6623_v16  ;;  %v3376_v50 = vsel %vm3330_vm5, %v3371_v13, %v3375_v52  ;;  %v3969_v18 = vsel %vm3923_vm6, %v3964_v17, %v3968_v12  ;;  %v3195_v62 = vpop.f32.mrb[164].mxu1  ;;  %v3788_v49 = vpop.f32.mrb[164].mxu0 }
 0x24e   :  { %4291 = vst.msk [vmem:[%s7264_s4 + $0x88] sm:$0xff] %vm316_vm0, %v4237_v29  ;;  %v4173_v32 = vmul.f32 %v6801_v27, %v4107_v24  ;;  %v3516_v7 = vadd.f32 %v3376_v50, %v6625_v15  ;;  %v3377_v31 = vrot.slane %v3195_v62, 5  ;;  %v3970_v0 = vrot.slane %v3788_v49, 6  ;;  %v3197_v35 = vpop.f32.mrb[165].mxu1  ;;  %v3790_v33 = vpop.f32.mrb[165].mxu0 }
 0x24f   :  { %v4238_v16 = vadd.f32 %v6803_v36, %v4172_v1  ;;  %v4108_v47 = vadd.f32 %v3967_v23, %v3515_v53  ;;  %v3379_v30 = vrot.slane %v3197_v35, 5  ;;  %v3972_v40 = vrot.slane %v3790_v33, 6  ;;  %v3199_v42 = vpop.f32.mrb[166].mxu1  ;;  %v3792_v46 = vpop.f32.mrb[166].mxu0 }
 0x250   :  { %v4239_v9 = vadd.f32 %v6805_v43, %v4173_v32  ;;  %v4109_v13 = vadd.f32 %v3969_v18, %v3516_v7  ;;  %v3378_v17 = vsel %vm3330_vm5, %v3373_v26, %v3377_v31  ;;  %v3971_v10 = vsel %vm3923_vm6, %v3966_v60, %v3970_v0  ;;  %v3201_v63 = vpop.f32.mrb[167].mxu1  ;;  %v3794_v15 = vpop.f32.mrb[167].mxu0 }
 0x251   :  { %4292 = vst [vmem:[%s7264_s4 + $0x90] sm:$0xff] %v4238_v16  ;;  %v4174_v25 = vmul.f32 %v6796_v38, %v4108_v47  ;;  %v3517_v61 = vadd.f32 %v3378_v17, %v6635_v41  ;;  %v3380_v45 = vsel %vm3330_vm5, %v3375_v52, %v3379_v30  ;;  %v3973_v34 = vsel %vm3923_vm6, %v3968_v12, %v3972_v40 }
 0x252   :  { %4293 = vst.msk [vmem:[%s7264_s4 + $0x98] sm:$0xff] %vm316_vm0, %v4239_v9  ;;  %v4175_v51 = vmul.f32 %v6801_v27, %v4109_v13  ;;  %v3518_v54 = vadd.f32 %v3380_v45, %v6639_v2  ;;  %v3381_v28 = vrot.slane %v3199_v42, 5  ;;  %v3974_v6 = vrot.slane %v3792_v46, 6 }
 0x253   :  { %v4240_v5 = vadd.f32 %v6803_v36, %v4174_v25  ;;  %v4110_v37 = vadd.f32 %v3971_v10, %v3517_v61  ;;  %v3383_v56 = vrot.slane %v3201_v63, 5  ;;  %v3976_v41 = vrot.slane %v3794_v15, 6 }
 0x254   :  { %v4241_v21 = vadd.f32 %v6805_v43, %v4175_v51  ;;  %v4111_v26 = vadd.f32 %v3973_v34, %v3518_v54  ;;  %v3382_v60 = vsel %vm3330_vm5, %v3377_v31, %v3381_v28  ;;  %v3975_v44 = vsel %vm3923_vm6, %v3970_v0, %v3974_v6 }
 0x255   :  { %4294 = vst [vmem:[%s7264_s4 + $0xa0] sm:$0xff] %v4240_v5  ;;  %v4176_v2 = vmul.f32 %v6796_v38, %v4110_v37  ;;  %v3519_v58 = vadd.f32 %v3382_v60, %v6643_v22  ;;  %v3384_v52 = vsel %vm3330_vm5, %v3379_v30, %v3383_v56  ;;  %v3977_v12 = vsel %vm3923_vm6, %v3972_v40, %v3976_v41  ;;  %v3205_v29 = vpop.f32.mrb[168].mxu1  ;;  %v3798_v24 = vpop.f32.mrb[168].mxu0 }
 0x256   :  { %4295 = vst.msk [vmem:[%s7264_s4 + $0xa8] sm:$0xff] %vm316_vm0, %v4241_v21  ;;  %v4177_v8 = vmul.f32 %v6801_v27, %v4111_v26  ;;  %v3520_v23 = vadd.f32 %v3384_v52, %v6645_v55  ;;  %v3385_v1 = vrot.slane %v3205_v29, 5  ;;  %v3978_v53 = vrot.slane %v3798_v24, 6  ;;  %v3207_v50 = vpop.f32.mrb[169].mxu1  ;;  %v3800_v18 = vpop.f32.mrb[169].mxu0 }
 0x257   :  { %v4242_v22 = vadd.f32 %v6803_v36, %v4176_v2  ;;  %v4112_v62 = vadd.f32 %v3975_v44, %v3519_v58  ;;  %v3387_v49 = vrot.slane %v3207_v50, 5  ;;  %v3980_v32 = vrot.slane %v3800_v18, 6  ;;  %v3209_v7 = vpop.f32.mrb[170].mxu1  ;;  %v3802_v31 = vpop.f32.mrb[170].mxu0 }
 0x258   :  { %v4243_v0 = vadd.f32 %v6805_v43, %v4177_v8  ;;  %v4113_v35 = vadd.f32 %v3977_v12, %v3520_v23  ;;  %v3386_v33 = vsel %vm3330_vm5, %v3381_v28, %v3385_v1  ;;  %v3979_v16 = vsel %vm3923_vm6, %v3974_v6, %v3978_v53  ;;  %v3211_v47 = vpop.f32.mrb[171].mxu1  ;;  %v3804_v55 = vpop.f32.mrb[171].mxu0 }
 0x259   :  { %4296 = vst [vmem:[%s7264_s4 + $0xb0] sm:$0xff] %v4242_v22  ;;  %v4178_v30 = vmul.f32 %v6796_v38, %v4112_v62  ;;  %v3521_v40 = vadd.f32 %v3386_v33, %v6655_v3  ;;  %v3388_v42 = vsel %vm3330_vm5, %v3383_v56, %v3387_v49  ;;  %v3981_v46 = vsel %vm3923_vm6, %v3976_v41, %v3980_v32 }
 0x25a   :  { %4297 = vst.msk [vmem:[%s7264_s4 + $0xb8] sm:$0xff] %vm316_vm0, %v4243_v0  ;;  %v4179_v9 = vmul.f32 %v6801_v27, %v4113_v35  ;;  %v3522_v13 = vadd.f32 %v3388_v42, %v6659_v11  ;;  %v3389_v17 = vrot.slane %v3209_v7, 5  ;;  %v3982_v10 = vrot.slane %v3802_v31, 6 }
 0x25b   :  { %v4244_v63 = vadd.f32 %v6803_v36, %v4178_v30  ;;  %v4114_v15 = vadd.f32 %v3979_v16, %v3521_v40  ;;  %v3391_v25 = vrot.slane %v3211_v47, 5  ;;  %v3984_v3 = vrot.slane %v3804_v55, 6 }
 0x25c   :  { %v4245_v61 = vadd.f32 %v6805_v43, %v4179_v9  ;;  %v4115_v45 = vadd.f32 %v3981_v46, %v3522_v13  ;;  %v3390_v34 = vsel %vm3330_vm5, %v3385_v1, %v3389_v17  ;;  %v3983_v51 = vsel %vm3923_vm6, %v3978_v53, %v3982_v10 }
 0x25d   :  { %4298 = vst [vmem:[%s7264_s4 + $0xc0] sm:$0xff] %v4244_v63  ;;  %v4180_v11 = vmul.f32 %v6796_v38, %v4114_v15  ;;  %v3523_v54 = vadd.f32 %v3390_v34, %v6663_v14  ;;  %v3392_v28 = vsel %vm3330_vm5, %v3387_v49, %v3391_v25  ;;  %v3985_v6 = vsel %vm3923_vm6, %v3980_v32, %v3984_v3  ;;  %v3215_v5 = vpop.f32.mrb[172].mxu1  ;;  %v3808_v37 = vpop.f32.mrb[172].mxu0 }
 0x25e   :  { %4299 = vst.msk [vmem:[%s7264_s4 + $0xc8] sm:$0xff] %vm316_vm0, %v4245_v61  ;;  %v4181_v56 = vmul.f32 %v6801_v27, %v4115_v45  ;;  %v3524_v41 = vadd.f32 %v3392_v28, %v6665_v20  ;;  %v3393_v21 = vrot.slane %v3215_v5, 5  ;;  %v3986_v26 = vrot.slane %v3808_v37, 6  ;;  %v3217_v60 = vpop.f32.mrb[173].mxu1  ;;  %v3810_v44 = vpop.f32.mrb[173].mxu0 }
 0x25f   :  { %v4246_v14 = vadd.f32 %v6803_v36, %v4180_v11  ;;  %v4116_v2 = vadd.f32 %v3983_v51, %v3523_v54  ;;  %v3395_v58 = vrot.slane %v3217_v60, 5  ;;  %v3988_v52 = vrot.slane %v3810_v44, 6  ;;  %v3219_v12 = vpop.f32.mrb[174].mxu1  ;;  %v3812_v29 = vpop.f32.mrb[174].mxu0  ;;  %v7357_v44 = vld [vmem:[#allocation16_spill] sm:$0xff] }
 0x260   :  { %v4247_v24 = vadd.f32 %v6805_v43, %v4181_v56  ;;  %v4117_v8 = vadd.f32 %v3985_v6, %v3524_v41  ;;  %v3394_v23 = vsel %vm3330_vm5, %v3389_v17, %v3393_v21  ;;  %v3987_v1 = vsel %vm3923_vm6, %v3982_v10, %v3986_v26  ;;  %v3221_v53 = vpop.f32.mrb[175].mxu1  ;;  %v3814_v20 = vpop.f32.mrb[175].mxu0 }
 0x261   :  { %4300 = vst [vmem:[%s7264_s4 + $0xd0] sm:$0xff] %v4246_v14  ;;  %v4182_v50 = vmul.f32 %v6796_v38, %v4116_v2  ;;  %v3525_v18 = vadd.f32 %v3394_v23, %v6675_v19  ;;  %v3396_v22 = vsel %vm3330_vm5, %v3391_v25, %v3395_v58  ;;  %v3989_v62 = vsel %vm3923_vm6, %v3984_v3, %v3988_v52 }
 0x262   :  { %4301 = vst.msk [vmem:[%s7264_s4 + $0xd8] sm:$0xff] %vm316_vm0, %v4247_v24  ;;  %v4183_v49 = vmul.f32 %v6801_v27, %v4117_v8  ;;  %v3526_v32 = vadd.f32 %v3396_v22, %v6679_v59  ;;  %v3397_v7 = vrot.slane %v3219_v12, 5  ;;  %v3990_v31 = vrot.slane %v3812_v29, 6 }
 0x263   :  { %v4248_v0 = vadd.f32 %v6803_v36, %v4182_v50  ;;  %v4118_v35 = vadd.f32 %v3987_v1, %v3525_v18  ;;  %v3399_v33 = vrot.slane %v3221_v53, 5  ;;  %v3992_v19 = vrot.slane %v3814_v20, 6  ;;  %v7358_v20 = vld [vmem:[#allocation17_spill] sm:$0xff] }
 0x264   :  { %v4249_v16 = vadd.f32 %v6805_v43, %v4183_v49  ;;  %v4119_v47 = vadd.f32 %v3989_v62, %v3526_v32  ;;  %v3398_v55 = vsel %vm3330_vm5, %v3393_v21, %v3397_v7  ;;  %v3991_v30 = vsel %vm3923_vm6, %v3986_v26, %v3990_v31 }
 0x265   :  { %4302 = vst [vmem:[%s7264_s4 + $0xe0] sm:$0xff] %v4248_v0  ;;  %v4184_v59 = vmul.f32 %v6796_v38, %v4118_v35  ;;  %v3527_v40 = vadd.f32 %v3398_v55, %v6683_v48  ;;  %v3400_v42 = vsel %vm3330_vm5, %v3395_v58, %v3399_v33  ;;  %v3993_v46 = vsel %vm3923_vm6, %v3988_v52, %v3992_v19  ;;  %v3225_v9 = vpop.f32.mrb[176].mxu1  ;;  %v3818_v13 = vpop.f32.mrb[176].mxu0 }
 0x266   :  { %4303 = vst.msk [vmem:[%s7264_s4 + $0xe8] sm:$0xff] %vm316_vm0, %v4249_v16  ;;  %v4185_v17 = vmul.f32 %v6801_v27, %v4119_v47  ;;  %v3528_v10 = vadd.f32 %v3400_v42, %v6685_v39  ;;  %v3401_v63 = vrot.slane %v3225_v9, 5  ;;  %v3994_v15 = vrot.slane %v3818_v13, 6  ;;  %v3227_v25 = vpop.f32.mrb[177].mxu1  ;;  %v3820_v3 = vpop.f32.mrb[177].mxu0 }
 0x267   :  { %v4250_v48 = vadd.f32 %v6803_v36, %v4184_v59  ;;  %v4120_v61 = vadd.f32 %v3991_v30, %v3527_v40  ;;  %v3403_v45 = vrot.slane %v3227_v25, 5  ;;  %v3996_v34 = vrot.slane %v3820_v3, 6  ;;  %v3229_v51 = vpop.f32.mrb[178].mxu1  ;;  %v3822_v11 = vpop.f32.mrb[178].mxu0 }
 0x268   :  { %v4251_v54 = vadd.f32 %v6805_v43, %v4185_v17  ;;  %v4121_v28 = vadd.f32 %v3993_v46, %v3528_v10  ;;  %v3402_v6 = vsel %vm3330_vm5, %v3397_v7, %v3401_v63  ;;  %v3995_v5 = vsel %vm3923_vm6, %v3990_v31, %v3994_v15  ;;  %v3231_v37 = vpop.f32.mrb[179].mxu1  ;;  %v3824_v39 = vpop.f32.mrb[179].mxu0  ;;  %v7359_v7 = vld [vmem:[#allocation18_spill] sm:$0xff] }
 0x269   :  { %4304 = vst [vmem:[%s7264_s4 + $0xf0] sm:$0xff] %v4250_v48  ;;  %v4186_v56 = vmul.f32 %v6796_v38, %v4120_v61  ;;  %v3529_v41 = vadd.f32 %v3402_v6, %v6695_v4  ;;  %v3404_v21 = vsel %vm3330_vm5, %v3399_v33, %v3403_v45  ;;  %v3997_v26 = vsel %vm3923_vm6, %v3992_v19, %v3996_v34 }
 0x26a   :  { %4305 = vst.msk [vmem:[%s7264_s4 + $0xf8] sm:$0xff] %vm316_vm0, %v4251_v54  ;;  %v4187_v60 = vmul.f32 %v6801_v27, %v4121_v28  ;;  %v3530_v14 = vadd.f32 %v3404_v21, %v7357_v44  ;;  %v3405_v2 = vrot.slane %v3229_v51, 5  ;;  %v3998_v58 = vrot.slane %v3822_v11, 6 }
 0x26b   :  { %v4252_v52 = vadd.f32 %v6803_v36, %v4186_v56  ;;  %v4122_v12 = vadd.f32 %v3995_v5, %v3529_v41  ;;  %v3407_v29 = vrot.slane %v3231_v37, 5  ;;  %v4000_v4 = vrot.slane %v3824_v39, 6 }
 0x26c   :  { %v4253_v24 = vadd.f32 %v6805_v43, %v4187_v60  ;;  %v4123_v8 = vadd.f32 %v3997_v26, %v3530_v14  ;;  %v3406_v23 = vsel %vm3330_vm5, %v3401_v63, %v3405_v2  ;;  %v3999_v1 = vsel %vm3923_vm6, %v3994_v15, %v3998_v58  ;;  %v7360_v15 = vld [vmem:[#allocation19_spill] sm:$0xff]  ;;  %v7362_v26 = vld [vmem:[#allocation21_spill] sm:$0xff] }
 0x26d   :  { %4306 = vst [vmem:[%s7264_s4 + $0x100] sm:$0xff] %v4252_v52  ;;  %v4188_v53 = vmul.f32 %v6796_v38, %v4122_v12  ;;  %v3531_v50 = vadd.f32 %v3406_v23, %v7358_v20  ;;  %v3408_v18 = vsel %vm3330_vm5, %v3403_v45, %v3407_v29  ;;  %v4001_v22 = vsel %vm3923_vm6, %v3996_v34, %v4000_v4  ;;  %v3235_v62 = vpop.f32.mrb[180].mxu1  ;;  %v3828_v49 = vpop.f32.mrb[180].mxu0  ;;  %v7361_v45 = vld [vmem:[#allocation20_spill] sm:$0xff]  ;;  %v7363_v12 = vld [vmem:[#allocation5_spill] sm:$0xff] }
 0x26e   :  { %4307 = vst.msk [vmem:[%s7264_s4 + $0x108] sm:$0xff] %vm316_vm0, %v4253_v24  ;;  %v4189_v32 = vmul.f32 %v6801_v27, %v4123_v8  ;;  %v3532_v31 = vadd.f32 %v3408_v18, %v7359_v7  ;;  %v3409_v0 = vrot.slane %v3235_v62, 5  ;;  %v4002_v35 = vrot.slane %v3828_v49, 6  ;;  %v3237_v33 = vpop.f32.mrb[181].mxu1  ;;  %v3830_v19 = vpop.f32.mrb[181].mxu0 }
 0x26f   :  { %v4254_v16 = vadd.f32 %v6803_v36, %v4188_v53  ;;  %v4124_v47 = vadd.f32 %v3999_v1, %v3531_v50  ;;  %v3411_v55 = vrot.slane %v3237_v33, 5  ;;  %v4004_v30 = vrot.slane %v3830_v19, 6  ;;  %v3239_v59 = vpop.f32.mrb[182].mxu1  ;;  %v3832_v40 = vpop.f32.mrb[182].mxu0 }
 0x270   :  { %v4255_v42 = vadd.f32 %v6805_v43, %v4189_v32  ;;  %v4125_v46 = vadd.f32 %v4001_v22, %v3532_v31  ;;  %v3410_v9 = vsel %vm3330_vm5, %v3405_v2, %v3409_v0  ;;  %v4003_v13 = vsel %vm3923_vm6, %v3998_v58, %v4002_v35  ;;  %v3241_v17 = vpop.f32.mrb[183].mxu1  ;;  %v3834_v10 = vpop.f32.mrb[183].mxu0 }
 0x271   :  { %4308 = vst [vmem:[%s7264_s4 + $0x110] sm:$0xff] %v4254_v16  ;;  %v4190_v63 = vmul.f32 %v6796_v38, %v4124_v47  ;;  %v3533_v25 = vadd.f32 %v3410_v9, %v7360_v15  ;;  %v3412_v3 = vsel %vm3330_vm5, %v3407_v29, %v3411_v55  ;;  %v4005_v48 = vsel %vm3923_vm6, %v4000_v4, %v4004_v30 }
 0x272   :  { %4309 = vst.msk [vmem:[%s7264_s4 + $0x118] sm:$0xff] %vm316_vm0, %v4255_v42  ;;  %v4191_v61 = vmul.f32 %v6801_v27, %v4125_v46  ;;  %v3534_v34 = vadd.f32 %v3412_v3, %v7361_v45  ;;  %v3413_v51 = vrot.slane %v3239_v59, 5  ;;  %v4006_v11 = vrot.slane %v3832_v40, 6 }
 0x273   :  { %v4256_v54 = vadd.f32 %v6803_v36, %v4190_v63  ;;  %v4126_v28 = vadd.f32 %v4003_v13, %v3533_v25  ;;  %v3415_v6 = vrot.slane %v3241_v17, 5  ;;  %v4008_v5 = vrot.slane %v3834_v10, 6  ;;  %v7365_v25 = vld [vmem:[#allocation3_spill] sm:$0xff] }
 0x274   :  { %v4257_v37 = vadd.f32 %v6805_v43, %v4191_v61  ;;  %v4127_v39 = vadd.f32 %v4005_v48, %v3534_v34  ;;  %v3414_v56 = vsel %vm3330_vm5, %v3409_v0, %v3413_v51  ;;  %v4007_v41 = vsel %vm3923_vm6, %v4002_v35, %v4006_v11 }
 0x275   :  { %4310 = vst [vmem:[%s7264_s4 + $0x120] sm:$0xff] %v4256_v54  ;;  %v4192_v21 = vmul.f32 %v6796_v38, %v4126_v28  ;;  %v3535_v60 = vadd.f32 %v3414_v56, %v7362_v26  ;;  %v3416_v44 = vsel %vm3330_vm5, %v3411_v55, %v3415_v6  ;;  %v4009_v14 = vsel %vm3923_vm6, %v4004_v30, %v4008_v5  ;;  %v3245_v2 = vpop.f32.mrb[184].mxu1  ;;  %v3838_v58 = vpop.f32.mrb[184].mxu0  ;;  %v7364_v55 = vld [vmem:[#allocation2_spill] sm:$0xff] }
 0x276   :  { %4311 = vst.msk [vmem:[%s7264_s4 + $0x128] sm:$0xff] %vm316_vm0, %v4257_v37  ;;  %v4193_v52 = vmul.f32 %v6801_v27, %v4127_v39  ;;  %v3536_v29 = vadd.f32 %v3416_v44, %v7363_v12  ;;  %v3417_v4 = vrot.slane %v3245_v2, 5  ;;  %v4010_v24 = vrot.slane %v3838_v58, 6  ;;  %v3247_v8 = vpop.f32.mrb[185].mxu1  ;;  %v3840_v23 = vpop.f32.mrb[185].mxu0 }
 0x277   :  { %v4258_v1 = vadd.f32 %v6803_v36, %v4192_v21  ;;  %v4128_v53 = vadd.f32 %v4007_v41, %v3535_v60  ;;  %v3419_v20 = vrot.slane %v3247_v8, 5  ;;  %v4012_v50 = vrot.slane %v3840_v23, 6  ;;  %v3249_v18 = vpop.f32.mrb[186].mxu1  ;;  %v3842_v22 = vpop.f32.mrb[186].mxu0 }
 0x278   :  { %v4259_v62 = vadd.f32 %v6805_v43, %v4193_v52  ;;  %v4129_v49 = vadd.f32 %v4009_v14, %v3536_v29  ;;  %v3418_v32 = vsel %vm3330_vm5, %v3413_v51, %v3417_v4  ;;  %v4011_v7 = vsel %vm3923_vm6, %v4006_v11, %v4010_v24  ;;  %v3251_v31 = vpop.f32.mrb[187].mxu1  ;;  %v3844_v0 = vpop.f32.mrb[187].mxu0  ;;  %v7366_v11 = vld [vmem:[#allocation4_spill] sm:$0xff] }
 0x279   :  { %4312 = vst [vmem:[%s7264_s4 + $0x130] sm:$0xff] %v4258_v1  ;;  %v4194_v35 = vmul.f32 %v6796_v38, %v4128_v53  ;;  %v3537_v33 = vadd.f32 %v3418_v32, %v6735_v57  ;;  %v3420_v19 = vsel %vm3330_vm5, %v3415_v6, %v3419_v20  ;;  %v4013_v16 = vsel %vm3923_vm6, %v4008_v5, %v4012_v50  ;;  %v7368_v53 = vld [vmem:[#allocation6_spill] sm:$0xff] }
 0x27a   :  { %4313 = vst.msk [vmem:[%s7264_s4 + $0x138] sm:$0xff] %vm316_vm0, %v4259_v62  ;;  %v4195_v47 = vmul.f32 %v6801_v27, %v4129_v49  ;;  %v3538_v30 = vadd.f32 %v3420_v19, %v7364_v55  ;;  %v3421_v59 = vrot.slane %v3249_v18, 5  ;;  %v4014_v40 = vrot.slane %v3842_v22, 6  ;;  %v7369_v19 = vld [vmem:[#allocation11_spill] sm:$0xff] }
 0x27b   :  { %v4260_v42 = vadd.f32 %v6803_v36, %v4194_v35  ;;  %v4130_v46 = vadd.f32 %v4011_v7, %v3537_v33  ;;  %v3423_v9 = vrot.slane %v3251_v31, 5  ;;  %v4016_v57 = vrot.slane %v3844_v0, 6 }
 0x27c   :  { %v4261_v13 = vadd.f32 %v6805_v43, %v4195_v47  ;;  %v4131_v17 = vadd.f32 %v4013_v16, %v3538_v30  ;;  %v3422_v10 = vsel %vm3330_vm5, %v3417_v4, %v3421_v59  ;;  %v4015_v63 = vsel %vm3923_vm6, %v4010_v24, %v4014_v40  ;;  %v7367_v4 = vld [vmem:[#allocation10_spill] sm:$0xff] }
 0x27d   :  { %4314 = vst [vmem:[%s7264_s4 + $0x140] sm:$0xff] %v4260_v42  ;;  %v4196_v15 = vmul.f32 %v6796_v38, %v4130_v46  ;;  %v3539_v3 = vadd.f32 %v3422_v10, %v7365_v25  ;;  %v3424_v48 = vsel %vm3330_vm5, %v3419_v20, %v3423_v9  ;;  %v4017_v61 = vsel %vm3923_vm6, %v4012_v50, %v4016_v57  ;;  %v3255_v45 = vpop.f32.mrb[188].mxu1  ;;  %v3848_v34 = vpop.f32.mrb[188].mxu0  ;;  %v7370_v42 = vld [vmem:[#allocation7_spill] sm:$0xff] }
 0x27e   :  { %4315 = vst.msk [vmem:[%s7264_s4 + $0x148] sm:$0xff] %vm316_vm0, %v4261_v13  ;;  %v4197_v51 = vmul.f32 %v6801_v27, %v4131_v17  ;;  %v3540_v54 = vadd.f32 %v3424_v48, %v7366_v11  ;;  %v3425_v28 = vrot.slane %v3255_v45, 5  ;;  %v4018_v6 = vrot.slane %v3848_v34, 6  ;;  %v3257_v5 = vpop.f32.mrb[189].mxu1  ;;  %v3850_v37 = vpop.f32.mrb[189].mxu0 }
 0x27f   :  { %v4262_v39 = vadd.f32 %v6803_v36, %v4196_v15  ;;  %v4132_v56 = vadd.f32 %v4015_v63, %v3539_v3  ;;  %v3427_v41 = vrot.slane %v3257_v5, 5  ;;  %v4020_v21 = vrot.slane %v3850_v37, 6  ;;  %v3259_v26 = vpop.f32.mrb[190].mxu1  ;;  %v3852_v60 = vpop.f32.mrb[190].mxu0 }
 0x280   :  { %v4263_v44 = vadd.f32 %v6805_v43, %v4197_v51  ;;  %v4133_v14 = vadd.f32 %v4017_v61, %v3540_v54  ;;  %v3426_v2 = vsel %vm3330_vm5, %v3421_v59, %v3425_v28  ;;  %v4019_v58 = vsel %vm3923_vm6, %v4014_v40, %v4018_v6  ;;  %v3261_v52 = vpop.f32.mrb[191].mxu1  ;;  %v3854_v12 = vpop.f32.mrb[191].mxu0 }
 0x281   :  { %4316 = vst [vmem:[%s7264_s4 + $0x150] sm:$0xff] %v4262_v39  ;;  %v4198_v29 = vmul.f32 %v6796_v38, %v4132_v56  ;;  %v3541_v24 = vadd.f32 %v3426_v2, %v7367_v4  ;;  %v3428_v8 = vsel %vm3330_vm5, %v3423_v9, %v3427_v41  ;;  %v4021_v23 = vsel %vm3923_vm6, %v4016_v57, %v4020_v21 }
 0x282   :  { %4317 = vst.msk [vmem:[%s7264_s4 + $0x158] sm:$0xff] %vm316_vm0, %v4263_v44  ;;  %v4199_v1 = vmul.f32 %v6801_v27, %v4133_v14  ;;  %v3542_v20 = vadd.f32 %v3428_v8, %v7368_v53  ;;  %v3429_v50 = vrot.slane %v3259_v26, 5  ;;  %v4022_v18 = vrot.slane %v3852_v60, 6  ;;  %v7373_v8 = vld [vmem:[#allocation12_spill] sm:$0xff] }
 0x283   :  { %v4264_v22 = vadd.f32 %v6803_v36, %v4198_v29  ;;  %v4134_v62 = vadd.f32 %v4019_v58, %v3541_v24  ;;  %v3431_v49 = vrot.slane %v3261_v52, 5  ;;  %v4024_v32 = vrot.slane %v3854_v12, 6 }
 0x284   :  { %v4265_v7 = vadd.f32 %v6805_v43, %v4199_v1  ;;  %v4135_v31 = vadd.f32 %v4021_v23, %v3542_v20  ;;  %v3430_v0 = vsel %vm3330_vm5, %v3425_v28, %v3429_v50  ;;  %v4023_v35 = vsel %vm3923_vm6, %v4018_v6, %v4022_v18  ;;  %v7371_v6 = vld [vmem:[#allocation8_spill] sm:$0xff] }
 0x285   :  { %4318 = vst [vmem:[%s7264_s4 + $0x160] sm:$0xff] %v4264_v22  ;;  %v4200_v33 = vmul.f32 %v6796_v38, %v4134_v62  ;;  %v3543_v16 = vadd.f32 %v3430_v0, %v7369_v19  ;;  %v3432_v47 = vsel %vm3330_vm5, %v3427_v41, %v3431_v49  ;;  %v4025_v55 = vsel %vm3923_vm6, %v4020_v21, %v4024_v32  ;;  %v3265_v30 = vpop.f32.mrb[192].mxu1  ;;  %v3858_v59 = vpop.f32.mrb[192].mxu0  ;;  %v7372_v41 = vld [vmem:[#allocation9_spill] sm:$0xff] }
 0x286   :  { %4319 = vst.msk [vmem:[%s7264_s4 + $0x168] sm:$0xff] %vm316_vm0, %v4265_v7  ;;  %v4201_v40 = vmul.f32 %v6801_v27, %v4135_v31  ;;  %v3544_v46 = vadd.f32 %v3432_v47, %v7370_v42  ;;  %v3433_v9 = vrot.slane %v3265_v30, 5  ;;  %v4026_v57 = vrot.slane %v3858_v59, 6  ;;  %v3267_v13 = vpop.f32.mrb[193].mxu1  ;;  %v3860_v17 = vpop.f32.mrb[193].mxu0 }
 0x287   :  { %v4266_v10 = vadd.f32 %v6803_v36, %v4200_v33  ;;  %v4136_v63 = vadd.f32 %v4023_v35, %v3543_v16  ;;  %v3435_v15 = vrot.slane %v3267_v13, 5  ;;  %v4028_v25 = vrot.slane %v3860_v17, 6  ;;  %v3269_v3 = vpop.f32.mrb[194].mxu1  ;;  %v3862_v48 = vpop.f32.mrb[194].mxu0 }
 0x288   :  { %v4267_v61 = vadd.f32 %v6805_v43, %v4201_v40  ;;  %v4137_v45 = vadd.f32 %v4025_v55, %v3544_v46  ;;  %v3434_v34 = vsel %vm3330_vm5, %v3429_v50, %v3433_v9  ;;  %v4027_v51 = vsel %vm3923_vm6, %v4022_v18, %v4026_v57  ;;  %v3271_v11 = vpop.f32.mrb[195].mxu1  ;;  %v3864_v54 = vpop.f32.mrb[195].mxu0  ;;  %v7374_v50 = vld [vmem:[#allocation13_spill] sm:$0xff] }
 0x289   :  { %4320 = vst [vmem:[%s7264_s4 + $0x170] sm:$0xff] %v4266_v10  ;;  %v4202_v28 = vmul.f32 %v6796_v38, %v4136_v63  ;;  %v3545_v5 = vadd.f32 %v3434_v34, %v7371_v6  ;;  %v3436_v37 = vsel %vm3330_vm5, %v3431_v49, %v3435_v15  ;;  %v4029_v39 = vsel %vm3923_vm6, %v4024_v32, %v4028_v25 }
 0x28a   :  { %4321 = vst.msk [vmem:[%s7264_s4 + $0x178] sm:$0xff] %vm316_vm0, %v4267_v61  ;;  %v4203_v56 = vmul.f32 %v6801_v27, %v4137_v45  ;;  %v3546_v21 = vadd.f32 %v3436_v37, %v7372_v41  ;;  %v3437_v26 = vrot.slane %v3269_v3, 5  ;;  %v4030_v60 = vrot.slane %v3862_v48, 6 }
 0x28b   :  { %v4268_v44 = vadd.f32 %v6803_v36, %v4202_v28  ;;  %v4138_v14 = vadd.f32 %v4027_v51, %v3545_v5  ;;  %v3439_v2 = vrot.slane %v3271_v11, 5  ;;  %v4032_v58 = vrot.slane %v3864_v54, 6 }
 0x28c   :  { %v4269_v52 = vadd.f32 %v6805_v43, %v4203_v56  ;;  %v4139_v12 = vadd.f32 %v4029_v39, %v3546_v21  ;;  %v3438_v29 = vsel %vm3330_vm5, %v3433_v9, %v3437_v26  ;;  %v4031_v4 = vsel %vm3923_vm6, %v4026_v57, %v4030_v60 }
 0x28d   :  { %4322 = vst [vmem:[%s7264_s4 + $0x180] sm:$0xff] %v4268_v44  ;;  %v4204_v24 = vmul.f32 %v6796_v38, %v4138_v14  ;;  %v3547_v23 = vadd.f32 %v3438_v29, %v7373_v8  ;;  %v3440_v1 = vsel %vm3330_vm5, %v3435_v15, %v3439_v2  ;;  %v4033_v53 = vsel %vm3923_vm6, %v4028_v25, %v4032_v58 }
 0x28e   :  { %4323 = vst.msk [vmem:[%s7264_s4 + $0x188] sm:$0xff] %vm316_vm0, %v4269_v52  ;;  %v4205_v20 = vmul.f32 %v6801_v27, %v4139_v12  ;;  %v3548_v18 = vadd.f32 %v3440_v1, %v7374_v50 }
 0x28f   :  { %v4270_v22 = vadd.f32 %v6803_v36, %v4204_v24  ;;  %v4140_v62 = vadd.f32 %v4031_v4, %v3547_v23 }
 0x290   :  { %v4271_v49 = vadd.f32 %v6805_v43, %v4205_v20  ;;  %v4141_v32 = vadd.f32 %v4033_v53, %v3548_v18 }
 0x291   :  { %4324 = vst [vmem:[%s7264_s4 + $0x190] sm:$0xff] %v4270_v22  ;;  %v4206_v7 = vmul.f32 %v6796_v38, %v4140_v62 }
 0x292   :  { %4325 = vst.msk [vmem:[%s7264_s4 + $0x198] sm:$0xff] %vm316_vm0, %v4271_v49  ;;  %v4207_v31 = vmul.f32 %v6801_v27, %v4141_v32 }
 0x293   :  { %v4272_v0 = vadd.f32 %v6803_v36, %v4206_v7 }
 0x294   :  { %v4273_v35 = vadd.f32 %v6805_v43, %v4207_v31 }
 0x295   :  { %4326 = vst [vmem:[%s7264_s4 + $0x1a0] sm:$0xff] %v4272_v0 }
 0x296   :  { %4327 = vst.msk [vmem:[%s7264_s4 + $0x1a8] sm:$0xff] %vm316_vm0, %v4273_v35 }

</bundles_post_ra>
